<compile_context>
chip_gen: v7x
topology: tpu7x:2x2x1
jax: 0.10.0
libtpu: 0.0.40
codegen_flags: <defaults>
</compile_context>

<pallas_src>
import jax
import jax.numpy as jnp
from jax.experimental import pallas as pl
from jax.experimental.pallas import tpu as pltpu

# ----------------------------- config (CFG) ---------------------------------
CFG_TARGET_SIZE = 6
CFG_LOSS = "bce"          # -> n = target_size - 1 = 5
CFG_MODEL_CLS = "deep"    # deep head: Linear -> BN1d -> ReLU -> Linear
N_OUT = CFG_TARGET_SIZE - (1 if CFG_LOSS == "bce" else 0)   # = 5

K_PAD = 32                # im2col K (=Cin*3*3=27) zero-padded to 32
LANE = 128                # lane-dense padded fc2 output width
BBLK = 8                  # batch rows per grid step (keep B//BBLK >= 2 on v7x)


# ----------------------------- fused Pallas kernel ---------------------------
def _fused_kernel(p_ref, cw_ref, cb_ref, w1_ref, b1_ref, w2_ref, b2_ref, o_ref):
    bblk, hw, kp = p_ref.shape
    cf = cw_ref.shape[1]

    # ---- encoder stand-in: conv3x3/s2 as ONE im2col matmul over the batch
    # block (M = bblk*hw), bf16 operands, f32 accumulation, then bias + ReLU.
    p2d = p_ref[...].reshape(bblk * hw, kp)                       # bf16, major-dim collapse
    fm = jnp.dot(p2d, cw_ref[...], preferred_element_type=jnp.float32)
    fm = jnp.maximum(fm + cb_ref[...], 0.0)                       # (bblk*hw, cf) f32
    fm = fm.reshape(bblk, hw, cf)

    # ---- dual pooling over the spatial (sublane) axis -----------------------
    # 1/HW of AdaptiveAvgPool is folded into the avg rows of w1 -> plain sum.
    ssum = jnp.sum(fm, axis=1)                                    # (bblk, cf)
    smax = jnp.max(fm, axis=1)                                    # (bblk, cf)
    feat = jnp.concatenate([ssum, smax], axis=-1).astype(jnp.bfloat16)  # (bblk, 2cf)

    # ---- deep head: Linear(2C->512) with BN folded, ReLU, Linear(512->LANE) -
    h = jnp.dot(feat, w1_ref[...], preferred_element_type=jnp.float32) + b1_ref[...]
    h = jnp.maximum(h, 0.0).astype(jnp.bfloat16)                  # (bblk, 512)
    # lane-dense unmasked store of the whole (bblk, 128) block; wrapper slices.
    o_ref[...] = (jnp.dot(h, w2_ref[...], preferred_element_type=jnp.float32)
                  + b2_ref[...])


def _fused_call(patches, cw, cb, w1, b1, w2, b2, *, bblk):
    bp, hw, kp = patches.shape
    cf = cw.shape[1]
    h1 = w1.shape[1]
    nl = w2.shape[1]                                              # = LANE

    flops = bp * (2 * hw * kp * cf + 2 * (2 * cf) * h1 + 2 * h1 * nl)
    bytes_accessed = (2 * (patches.size + cw.size + w1.size + w2.size)   # bf16
                      + 4 * (cb.size + b1.size + b2.size + bp * nl))     # f32

    return pl.pallas_call(
        _fused_kernel,
        out_shape=jax.ShapeDtypeStruct((bp, nl), jnp.float32),
        grid=(bp // bblk,),
        in_specs=[
            pl.BlockSpec((bblk, hw, kp), lambda b: (b, 0, 0)),    # per-block patches (bf16)
            pl.BlockSpec((kp, cf),       lambda b: (0, 0)),       # conv weight (im2col, bf16)
            pl.BlockSpec((1, cf),        lambda b: (0, 0)),       # conv bias (f32)
            pl.BlockSpec((2 * cf, h1),   lambda b: (0, 0)),       # fc1 (BN + 1/HW folded, bf16)
            pl.BlockSpec((1, h1),        lambda b: (0, 0)),       # fc1 bias (BN folded, f32)
            pl.BlockSpec((h1, nl),       lambda b: (0, 0)),       # fc2 (lane-padded, bf16)
            pl.BlockSpec((1, nl),        lambda b: (0, 0)),       # fc2 bias (lane-padded, f32)
        ],
        out_specs=pl.BlockSpec((bblk, nl), lambda b: (b, 0)),
        compiler_params=pltpu.CompilerParams(
            dimension_semantics=("parallel",),
            vmem_limit_bytes=32 * 1024 * 1024),
        cost_estimate=pl.CostEstimate(flops=flops, transcendentals=0,
                                      bytes_accessed=bytes_accessed),
    )(patches, cw, cb, w1, b1, w2, b2)


# ----------------------------- parameter prep (one-time) ---------------------
def prepare_params(params, hw, n_out=N_OUT, k_pad=K_PAD, lane=LANE, eps=1e-5):
    """Fold eval-mode BN into fc1, fold 1/HW into the avg half of fc1, pad the
    im2col K dim and the fc2 output to lane width, store matmul weights bf16."""
    cf, cin, kh, kw = params["conv_w"].shape
    k = cin * kh * kw
    w_mat = params["conv_w"].reshape(cf, k).T                        # (K, Cf)
    w_mat = jnp.pad(w_mat, ((0, k_pad - k), (0, 0)))                 # (Kp, Cf)

    s = params["bn_g"] * jax.lax.rsqrt(params["bn_var"] + eps)       # (512,)
    w1 = params["fc1_w"].T * s[None, :]                              # (2Cf, 512), BN folded
    w1 = w1.at[:cf].multiply(1.0 / float(hw))                        # 1/HW into avg half
    b1 = (params["fc1_b"] - params["bn_mu"]) * s + params["bn_b"]    # (512,)

    w2 = jnp.pad(params["fc2_w"].T, ((0, 0), (0, lane - n_out)))     # (512, LANE)
    b2 = jnp.pad(params["fc2_b"], (0, lane - n_out))                 # (LANE,)

    return {
        "conv_w_mat": w_mat.astype(jnp.bfloat16),
        "conv_b": params["conv_b"].reshape(1, cf).astype(jnp.float32),
        "w1": w1.astype(jnp.bfloat16),
        "b1": b1.reshape(1, -1).astype(jnp.float32),
        "w2": w2.astype(jnp.bfloat16),
        "b2": b2.reshape(1, -1).astype(jnp.float32),
    }


# ----------------------------- glue (plain JAX) ------------------------------
def im2col(x, kh, kw, stride, pad, k_pad):
    # x: (B, C, H, W) NCHW -> patches (B, Ho*Wo, Cin*kh*kw [zero-padded to k_pad]).
    # Feature order matches PyTorch conv weight .reshape(Cout, Cin*kh*kw):
    # index = c*(kh*kw) + i*kw + j.
    x = jnp.pad(x, ((0, 0), (0, 0), (pad, pad), (pad, pad)))
    B, C, H, W = x.shape
    Ho = (H - kh) // stride + 1
    Wo = (W - kw) // stride + 1
    cols = []
    for i in range(kh):
        for j in range(kw):
            cols.append(x[:, :, i:i + stride * Ho:stride,
                          j:j + stride * Wo:stride])        # (B, C, Ho, Wo)
    p = jnp.stack(cols, axis=0)                             # (kh*kw, B, C, Ho, Wo)
    p = p.transpose(1, 3, 4, 2, 0)                          # (B, Ho, Wo, C, kh*kw)
    p = p.reshape(B, Ho * Wo, C * kh * kw)
    if k_pad > C * kh * kw:
        p = jnp.pad(p, ((0, 0), (0, 0), (0, k_pad - C * kh * kw)))
    return p, Ho, Wo


def tiles_model_v0_forward(x, prepped, bblk=BBLK):
    B = x.shape[0]
    # bf16 patches: halves im2col HBM traffic feeding the kernel (bf16 MXU).
    patches, _, _ = im2col(x.astype(jnp.bfloat16), 3, 3, stride=2, pad=1,
                           k_pad=prepped["conv_w_mat"].shape[0])
    bp = ((B + bblk - 1) // bblk) * bblk
    if bp != B:                                             # pad batch to a block multiple
        patches = jnp.pad(patches, ((0, bp - B), (0, 0), (0, 0)))
    out_pad = _fused_call(
        patches, prepped["conv_w_mat"], prepped["conv_b"],
        prepped["w1"], prepped["b1"], prepped["w2"], prepped["b2"],
        bblk=bblk)                                          # (bp, 128)
    return out_pad[:B, :N_OUT]                              # (B, n)


# ----------------------------- pure-JAX reference -----------------------------
def reference_forward(x, params, eps=1e-5):
    hp = jax.lax.Precision.HIGHEST
    fm = jax.lax.conv_general_dilated(
        x, params["conv_w"], window_strides=(2, 2), padding=((1, 1), (1, 1)),
        dimension_numbers=("NCHW", "OIHW", "NCHW"), precision=hp)
    fm = jnp.maximum(fm + params["conv_b"][None, :, None, None], 0.0)
    avg = jnp.mean(fm, axis=(2, 3))
    mx = jnp.max(fm, axis=(2, 3))
    feat = jnp.concatenate([avg, mx], axis=1)
    h = jnp.dot(feat, params["fc1_w"].T, precision=hp) + params["fc1_b"]
    inv = jax.lax.rsqrt(params["bn_var"] + eps)
    h = (h - params["bn_mu"]) * inv * params["bn_g"] + params["bn_b"]
    h = jnp.maximum(h, 0.0)
    return jnp.dot(h, params["fc2_w"].T, precision=hp) + params["fc2_b"]


# ----------------------------- main ------------------------------------------
if __name__ == "__main__":
    key = jax.random.PRNGKey(0)
    ks = jax.random.split(key, 12)

    B, Cin, H, W = 16, 3, 32, 32              # B=16 -> grid of 2 blocks of 8
    Cf = 32                                   # stand-in num_ftrs
    H1 = 512                                  # deep-head hidden size (fixed)
    n_out = N_OUT                             # = 5

    # Deterministic synthetic parameters (pretrained weights are not loaded).
    params = {
        "conv_w": 0.1 * jax.random.normal(ks[1], (Cf, Cin, 3, 3), jnp.float32),
        "conv_b": 0.1 * jax.random.normal(ks[2], (Cf,), jnp.float32),
        "fc1_w": jax.random.normal(ks[3], (H1, 2 * Cf), jnp.float32)
                 / jnp.sqrt(2.0 * Cf),
        "fc1_b": 0.1 * jax.random.normal(ks[4], (H1,), jnp.float32),
        "bn_g": jax.random.uniform(ks[5], (H1,), jnp.float32, 0.5, 1.5),
        "bn_b": 0.1 * jax.random.normal(ks[6], (H1,), jnp.float32),
        "bn_mu": 0.1 * jax.random.normal(ks[7], (H1,), jnp.float32),
        "bn_var": jax.random.uniform(ks[8], (H1,), jnp.float32, 0.5, 1.5),
        "fc2_w": jax.random.normal(ks[9], (n_out, H1), jnp.float32)
                 / jnp.sqrt(float(H1)),
        "fc2_b": 0.1 * jax.random.normal(ks[10], (n_out,), jnp.float32),
    }

    x = jax.random.normal(ks[0], (B, Cin, H, W), jnp.float32)

    # One-time parameter prep (BN fold, 1/HW fold, lane padding, bf16 weights).
    ho = (H + 2 * 1 - 3) // 2 + 1
    wo = (W + 2 * 1 - 3) // 2 + 1
    prepped = prepare_params(params, hw=ho * wo, n_out=n_out)

    fwd = jax.jit(tiles_model_v0_forward)
    out = jax.block_until_ready(fwd(x, prepped))

    ref = reference_forward(x, params)
    assert out.shape == (B, n_out) and out.dtype == jnp.float32
    assert bool(jnp.all(jnp.isfinite(out)))
    # Tolerance accounts for bf16 MXU operands (f32 accumulation) vs f32 reference.
    assert bool(jnp.allclose(out, ref, rtol=2e-2, atol=2e-2)), \
        float(jnp.max(jnp.abs(out - ref)))
    print("KERNEL_OK")
</pallas_src>

<mosaic_0001>
module attributes {stable_mosaic.version = 11 : i64} {
  func.func @_fused_kernel(%arg0: i32, %arg1: memref<8x256x32xbf16, #tpu.memory_space<vmem>>, %arg2: memref<32x32xbf16, #tpu.memory_space<vmem>>, %arg3: memref<1x32xf32, #tpu.memory_space<vmem>>, %arg4: memref<64x512xbf16, #tpu.memory_space<vmem>>, %arg5: memref<1x512xf32, #tpu.memory_space<vmem>>, %arg6: memref<512x128xbf16, #tpu.memory_space<vmem>>, %arg7: memref<1x128xf32, #tpu.memory_space<vmem>>, %arg8: memref<8x128xf32, #tpu.memory_space<vmem>>) attributes {dimension_semantics = [#tpu.dimension_semantics<parallel>], iteration_bounds = array<i64: 2>, scalar_prefetch = 0 : i64, scratch_operands = 0 : i64, tpu.core_type = #tpu.core_type<tc>, window_params = [{transform_indices = @transform_0, window_bounds = array<i64: 8, 256, 32>}, {pipeline_mode = #tpu.pipeline_mode<synchronous>, transform_indices = @transform_1, window_bounds = array<i64: 32, 32>}, {pipeline_mode = #tpu.pipeline_mode<synchronous>, transform_indices = @transform_2, window_bounds = array<i64: 1, 32>}, {pipeline_mode = #tpu.pipeline_mode<synchronous>, transform_indices = @transform_3, window_bounds = array<i64: 64, 512>}, {pipeline_mode = #tpu.pipeline_mode<synchronous>, transform_indices = @transform_4, window_bounds = array<i64: 1, 512>}, {pipeline_mode = #tpu.pipeline_mode<synchronous>, transform_indices = @transform_5, window_bounds = array<i64: 512, 128>}, {pipeline_mode = #tpu.pipeline_mode<synchronous>, transform_indices = @transform_6, window_bounds = array<i64: 1, 128>}, {transform_indices = @transform_7, window_bounds = array<i64: 8, 128>}]} {
    %c0 = arith.constant 0 : index
    %c0_0 = arith.constant 0 : index
    %c0_1 = arith.constant 0 : index
    %0 = vector.load %arg1[%c0, %c0_0, %c0_1] : memref<8x256x32xbf16, #tpu.memory_space<vmem>>, vector<8x256x32xbf16>
    %1 = vector.shape_cast %0 : vector<8x256x32xbf16> to vector<2048x32xbf16>
    %c0_2 = arith.constant 0 : index
    %c0_3 = arith.constant 0 : index
    %2 = vector.load %arg2[%c0_2, %c0_3] : memref<32x32xbf16, #tpu.memory_space<vmem>>, vector<32x32xbf16>
    %cst = arith.constant dense<0.000000e+00> : vector<2048x32xf32>
    %3 = tpu.matmul %1, %2, %cst {dimension_numbers = #tpu.dot_dimension_numbers<[1], [0], [0], [1], [0, 0, 1, 1], [], []>} : vector<2048x32xbf16>, vector<32x32xbf16>, vector<2048x32xf32> -> vector<2048x32xf32>
    %c0_4 = arith.constant 0 : index
    %c0_5 = arith.constant 0 : index
    %4 = vector.load %arg3[%c0_4, %c0_5] : memref<1x32xf32, #tpu.memory_space<vmem>>, vector<1x32xf32>
    %5 = vector.broadcast %4 : vector<1x32xf32> to vector<2048x32xf32>
    %6 = arith.addf %3, %5 : vector<2048x32xf32>
    %cst_6 = arith.constant 0.000000e+00 : f32
    %7 = vector.broadcast %cst_6 : f32 to vector<2048x32xf32>
    %8 = arith.maximumf %6, %7 : vector<2048x32xf32>
    %9 = vector.shape_cast %8 : vector<2048x32xf32> to vector<8x256x32xf32>
    %cst_7 = arith.constant dense<0.000000e+00> : vector<8x32xf32>
    %10 = vector.multi_reduction <add>, %9, %cst_7 [1] : vector<8x256x32xf32> to vector<8x32xf32>
    %cst_8 = arith.constant dense<0xFF800000> : vector<8x32xf32>
    %11 = vector.multi_reduction <maximumf>, %9, %cst_8 [1] : vector<8x256x32xf32> to vector<8x32xf32>
    %12 = tpu.concatenate %10, %11 in 1 : vector<8x32xf32>, vector<8x32xf32> -> vector<8x64xf32>
    %13 = arith.truncf %12 : vector<8x64xf32> to vector<8x64xbf16>
    %c0_9 = arith.constant 0 : index
    %c0_10 = arith.constant 0 : index
    %14 = vector.load %arg4[%c0_9, %c0_10] : memref<64x512xbf16, #tpu.memory_space<vmem>>, vector<64x512xbf16>
    %cst_11 = arith.constant dense<0.000000e+00> : vector<8x512xf32>
    %15 = tpu.matmul %13, %14, %cst_11 {dimension_numbers = #tpu.dot_dimension_numbers<[1], [0], [0], [1], [0, 0, 1, 1], [], []>} : vector<8x64xbf16>, vector<64x512xbf16>, vector<8x512xf32> -> vector<8x512xf32>
    %c0_12 = arith.constant 0 : index
    %c0_13 = arith.constant 0 : index
    %16 = vector.load %arg5[%c0_12, %c0_13] : memref<1x512xf32, #tpu.memory_space<vmem>>, vector<1x512xf32>
    %17 = vector.broadcast %16 : vector<1x512xf32> to vector<8x512xf32>
    %18 = arith.addf %15, %17 : vector<8x512xf32>
    %cst_14 = arith.constant 0.000000e+00 : f32
    %19 = vector.broadcast %cst_14 : f32 to vector<8x512xf32>
    %20 = arith.maximumf %18, %19 : vector<8x512xf32>
    %21 = arith.truncf %20 : vector<8x512xf32> to vector<8x512xbf16>
    %c0_15 = arith.constant 0 : index
    %c0_16 = arith.constant 0 : index
    %22 = vector.load %arg6[%c0_15, %c0_16] : memref<512x128xbf16, #tpu.memory_space<vmem>>, vector<512x128xbf16>
    %cst_17 = arith.constant dense<0.000000e+00> : vector<8x128xf32>
    %23 = tpu.matmul %21, %22, %cst_17 {dimension_numbers = #tpu.dot_dimension_numbers<[1], [0], [0], [1], [0, 0, 1, 1], [], []>} : vector<8x512xbf16>, vector<512x128xbf16>, vector<8x128xf32> -> vector<8x128xf32>
    %c0_18 = arith.constant 0 : index
    %c0_19 = arith.constant 0 : index
    %24 = vector.load %arg7[%c0_18, %c0_19] : memref<1x128xf32, #tpu.memory_space<vmem>>, vector<1x128xf32>
    %25 = vector.broadcast %24 : vector<1x128xf32> to vector<8x128xf32>
    %26 = arith.addf %23, %25 : vector<8x128xf32>
    %c0_20 = arith.constant 0 : index
    %c0_21 = arith.constant 0 : index
    %27 = vector.load %arg8[%c0_20, %c0_21] : memref<8x128xf32, #tpu.memory_space<vmem>>, vector<8x128xf32>
    tpu.vector_store %arg8[%c0_20, %c0_21], %26 {strides = array<i32>} : memref<8x128xf32, #tpu.memory_space<vmem>>, vector<8x128xf32>,
    return
  }
  func.func @transform_0(%arg0: i32) -> (i32, i32, i32) {
    %c0_i32 = arith.constant 0 : i32
    %c0_i32_0 = arith.constant 0 : i32
    %c0_i32_1 = arith.constant 0 : i32
    return %arg0, %c0_i32, %c0_i32_0 : i32, i32, i32
  }
  func.func @transform_1(%arg0: i32) -> (i32, i32) {
    %c0_i32 = arith.constant 0 : i32
    %c0_i32_0 = arith.constant 0 : i32
    %c0_i32_1 = arith.constant 0 : i32
    return %c0_i32, %c0_i32_0 : i32, i32
  }
  func.func @transform_2(%arg0: i32) -> (i32, i32) {
    %c0_i32 = arith.constant 0 : i32
    %c0_i32_0 = arith.constant 0 : i32
    %c0_i32_1 = arith.constant 0 : i32
    return %c0_i32, %c0_i32_0 : i32, i32
  }
  func.func @transform_3(%arg0: i32) -> (i32, i32) {
    %c0_i32 = arith.constant 0 : i32
    %c0_i32_0 = arith.constant 0 : i32
    %c0_i32_1 = arith.constant 0 : i32
    return %c0_i32, %c0_i32_0 : i32, i32
  }
  func.func @transform_4(%arg0: i32) -> (i32, i32) {
    %c0_i32 = arith.constant 0 : i32
    %c0_i32_0 = arith.constant 0 : i32
    %c0_i32_1 = arith.constant 0 : i32
    return %c0_i32, %c0_i32_0 : i32, i32
  }
  func.func @transform_5(%arg0: i32) -> (i32, i32) {
    %c0_i32 = arith.constant 0 : i32
    %c0_i32_0 = arith.constant 0 : i32
    %c0_i32_1 = arith.constant 0 : i32
    return %c0_i32, %c0_i32_0 : i32, i32
  }
  func.func @transform_6(%arg0: i32) -> (i32, i32) {
    %c0_i32 = arith.constant 0 : i32
    %c0_i32_0 = arith.constant 0 : i32
    %c0_i32_1 = arith.constant 0 : i32
    return %c0_i32, %c0_i32_0 : i32, i32
  }
  func.func @transform_7(%arg0: i32) -> (i32, i32) {
    %c0_i32 = arith.constant 0 : i32
    %c0_i32_0 = arith.constant 0 : i32
    return %arg0, %c0_i32 : i32, i32
  }
}

</mosaic_0001>

<bundles_post_ra>
// kernel: tiles_model_v0_forward.1
= control target key start
LH: loop header
LB: loop body
LE: loop exit
PB: predicated region body
PF: predicated region fallthrough
CT: control target
= control target key end

     0   :  { %s5665_s24 = smov 0   ;;  %s7703_s0 = inlined_call_operand.vmem [shape: bf16[16,256,32], index: 0, kind: input, shape index: {}]   ;;  %s7704_s1 = inlined_call_operand.vmem [shape: bf16[32,32], index: 1, kind: input, shape index: {}]   ;;  %s7705_s2 = inlined_call_operand.vmem [shape: f32[1,32], index: 2, kind: input, shape index: {}]   ;;  %s7706_s3 = inlined_call_operand.vmem [shape: bf16[64,512], index: 3, kind: input, shape index: {}]   ;;  %s7707_s4 = inlined_call_operand.vmem [shape: f32[1,512], index: 4, kind: input, shape index: {}]   ;;  %s7708_s5 = inlined_call_operand.vmem [shape: bf16[512,128], index: 5, kind: input, shape index: {}]   ;;  %s7709_s6 = inlined_call_operand.vmem [shape: f32[1,128], index: 6, kind: input, shape index: {}]   ;;  %s7710_s7 = inlined_call_operand.vmem [shape: f32[16,128], index: 7, kind: output, shape index: {}]  }
   0x1 LB: > { %s5671_s25 = sadd.s32 4294967295, %s5621_s24   ;;  %p4660_p0 = scmp.ge.s32.totalorder %s5621_s24, 1  ;;  %s5621_s24 = sphi %s5665_s24, %s17_s24  }
   0x2   : > { %p239_p1 = scmp.lt.s32.totalorder %s5621_s24, 3 }
   0x4   : > { %p240_p2 = pnand %p4660_p0, %p239_p1 }
   0x6   : > { %243 = sbr.rel (%p240_p2) target bundleno = 1243 (0x4db), region = 48 }
   0xd   : > { %v5426_v0 = vld [vmem:[%s7704_s1] sm:$0xff]   ;;  %s4661_s28 = sshll.u32 %s5671_s25, 3  ;;  %v5427_v1 = vld [vmem:[%s7704_s1 + $0x8] sm:$0xff]   ;;  %vm1202_vm0 = vcmask 261120   ;;  %vm4012_vm1 = vcmask 1041409   ;;  %vm4014_vm2 = vcmask 1042434  }
   0xe   : > { %p272_p3 = scmp.lt.s32.totalorder %s4661_s28, 15  ;;  %5152 = vmatprep.subr.bf16.mxu0 %v5426_v0  ;;  %5412 = vmatprep.subr.bf16.mxu1 %v5426_v0  ;;  %vm4016_vm3 = vcmask 1043459   ;;  %vm4018_vm4 = vcmask 1044484   ;;  %vm4020_vm5 = vcmask 1045509   ;;  %vm4022_vm6 = vcmask 1046534   ;;  %s5624_s17 = smov 32  }
   0xf   : > { %5153 = vmatpush3.bf16.msra.mxu0 %v5426_v0  ;;  %5414 = vmatpush3.bf16.msra.mxu1 %v5426_v0  ;;  %vm4024_vm7 = vcmask 1047559   ;;  %vm4165_vm8 = vcmask 523264   ;;  %p278_p4 = scmp.lt.s32.totalorder %s5671_s25, 1 }
  0x10   : > { %s7860_s28 = smov (!%p272_p3, %s4661_s28), 15  ;;  %5154 = vmatprep.subr.bf16.mxu0 %v5427_v1  ;;  %5413 = vmatprep.subr.bf16.mxu1 %v5427_v1 }
  0x11   : > { %s4977_s8 = sshll.u32 %s7860_s28, 7  ;;  %s7862_s25 = smov (!%p278_p4, %s5671_s25), 1 }
  0x12   : > { %s5685_s11 = scalar_lea.vmem %s7703_s0, %s4977_s8  ;;  %s4664_s16 = sshll.u32 %s7862_s25, 3 }
  0x13   : > { %5155 = vmatpush3.bf16.msra.mxu0 %v5427_v1  ;;  %v5428_v2 = vld [vmem:[%s5685_s11] sm:$0xff]   ;;  %5415 = vmatpush3.bf16.msra.mxu1 %v5427_v1  ;;  %v5429_v3 = vld [vmem:[%s5685_s11 + $0x8] sm:$0xff]   ;;  %v5430_v4 = vld [vmem:[%s5685_s11 + $0x10] sm:$0xff]   ;;  %s281_s19 = scalar_lea.vmem %s7710_s7, %s4664_s16 }
  0x14   : > { %5156 = vmatprep.mubr.msk.bf16.mxu0 %vm1202_vm0, %v5428_v2  ;;  %v5431_v5 = vld [vmem:[%s5685_s11 + $0x18] sm:$0xff]   ;;  %v5432_v6 = vld [vmem:[%s5685_s11 + $0x20] sm:$0xff]   ;;  %v5433_v7 = vld [vmem:[%s5685_s11 + $0x28] sm:$0xff]  }
  0x15   : > { %v5434_v8 = vld [vmem:[%s5685_s11 + $0x30] sm:$0xff]   ;;  %v5435_v9 = vld [vmem:[%s5685_s11 + $0x38] sm:$0xff]   ;;  %v5436_v10 = vld [vmem:[%s5685_s11 + $0x40] sm:$0xff]  }
  0x16   : > { %5157 = vmatmul.mubr.msk.bf16.vlgmr.msra.gmra.mrb[0].mxu0 %vm1202_vm0, %v5429_v3  ;;  %v5454_v11 = vld [vmem:[%s5685_s11 + $0x260] sm:$0xff]   ;;  %v5455_v12 = vld [vmem:[%s5685_s11 + $0x268] sm:$0xff]   ;;  %v5458_v13 = vld [vmem:[%s5685_s11 + $0x270] sm:$0xff]  }
  0x17   : > { %5160 = vmatprep.mubr.msk.bf16.mxu0 %vm1202_vm0, %v5430_v4  ;;  %5308 = vmatprep.mubr.msk.bf16.mxu1 %vm1202_vm0, %v5454_v11  ;;  %v5437_v14 = vld [vmem:[%s5685_s11 + $0x48] sm:$0xff]   ;;  %v5438_v15 = vld [vmem:[%s5685_s11 + $0x50] sm:$0xff]   ;;  %v5459_v16 = vld [vmem:[%s5685_s11 + $0x278] sm:$0xff]  }
  0x18   : > { %5309 = vmatmul.mubr.msk.bf16.vlgmr.msra.gmra.mrb[0].mxu1 %vm1202_vm0, %v5455_v12  ;;  %v5462_v17 = vld [vmem:[%s5685_s11 + $0x280] sm:$0xff]   ;;  %v5439_v18 = vld [vmem:[%s5685_s11 + $0x58] sm:$0xff]   ;;  %v5463_v20 = vld [vmem:[%s5685_s11 + $0x288] sm:$0xff]  }
  0x19   : > { %5312 = vmatprep.mubr.msk.bf16.mxu1 %vm1202_vm0, %v5458_v13  ;;  %v5440_v19 = vld [vmem:[%s5685_s11 + $0x60] sm:$0xff]   ;;  %v5466_v21 = vld [vmem:[%s5685_s11 + $0x290] sm:$0xff]   ;;  %v5441_v22 = vld [vmem:[%s5685_s11 + $0x68] sm:$0xff]  }
  0x1a   : > { %v5442_v23 = vld [vmem:[%s5685_s11 + $0x70] sm:$0xff]   ;;  %v5467_v24 = vld [vmem:[%s5685_s11 + $0x298] sm:$0xff]   ;;  %v5470_v25 = vld [vmem:[%s5685_s11 + $0x2a0] sm:$0xff]  }
  0x1b   : > { %v5443_v26 = vld [vmem:[%s5685_s11 + $0x78] sm:$0xff]   ;;  %v5444_v27 = vld [vmem:[%s5685_s11 + $0x80] sm:$0xff]   ;;  %v5471_v28 = vld [vmem:[%s5685_s11 + $0x2a8] sm:$0xff]  }
  0x1c   : > { %v5474_v29 = vld [vmem:[%s5685_s11 + $0x2b0] sm:$0xff]   ;;  %v5445_v30 = vld [vmem:[%s5685_s11 + $0x88] sm:$0xff]   ;;  %v5475_v32 = vld [vmem:[%s5685_s11 + $0x2b8] sm:$0xff]  }
  0x1d   : > { %v5446_v31 = vld [vmem:[%s5685_s11 + $0x90] sm:$0xff]   ;;  %v5478_v33 = vld [vmem:[%s5685_s11 + $0x2c0] sm:$0xff]   ;;  %v5447_v34 = vld [vmem:[%s5685_s11 + $0x98] sm:$0xff]  }
  0x1e   : > { %5161 = vmatmul.mubr.msk.bf16.gmra.mrb[4].mxu0 %vm1202_vm0, %v5431_v5  ;;  %v5448_v35 = vld [vmem:[%s5685_s11 + $0xa0] sm:$0xff]   ;;  %v5479_v36 = vld [vmem:[%s5685_s11 + $0x2c8] sm:$0xff]   ;;  %v5482_v37 = vld [vmem:[%s5685_s11 + $0x2d0] sm:$0xff]  }
  0x1f   : > { %5164 = vmatprep.mubr.msk.bf16.mxu0 %vm1202_vm0, %v5432_v6  ;;  %v5449_v38 = vld [vmem:[%s5685_s11 + $0xa8] sm:$0xff]   ;;  %v5450_v39 = vld [vmem:[%s5685_s11 + $0xb0] sm:$0xff]   ;;  %v5483_v40 = vld [vmem:[%s5685_s11 + $0x2d8] sm:$0xff]  }
  0x20   : > { %5313 = vmatmul.mubr.msk.bf16.gmra.mrb[4].mxu1 %vm1202_vm0, %v5459_v16  ;;  %v5486_v41 = vld [vmem:[%s5685_s11 + $0x2e0] sm:$0xff]   ;;  %v5451_v42 = vld [vmem:[%s5685_s11 + $0xb8] sm:$0xff]   ;;  %v5487_v44 = vld [vmem:[%s5685_s11 + $0x2e8] sm:$0xff]  }
  0x21   : > { %5316 = vmatprep.mubr.msk.bf16.mxu1 %vm1202_vm0, %v5462_v17  ;;  %v5452_v43 = vld [vmem:[%s5685_s11 + $0xc0] sm:$0xff]   ;;  %v5490_v45 = vld [vmem:[%s5685_s11 + $0x2f0] sm:$0xff]   ;;  %v5453_v46 = vld [vmem:[%s5685_s11 + $0xc8] sm:$0xff]  }
  0x22   : > { %v5456_v47 = vld [vmem:[%s5685_s11 + $0xd0] sm:$0xff]   ;;  %v5491_v48 = vld [vmem:[%s5685_s11 + $0x2f8] sm:$0xff]   ;;  %v5494_v49 = vld [vmem:[%s5685_s11 + $0x300] sm:$0xff]  }
  0x23   : > { %v5457_v50 = vld [vmem:[%s5685_s11 + $0xd8] sm:$0xff]   ;;  %v5460_v51 = vld [vmem:[%s5685_s11 + $0xe0] sm:$0xff]   ;;  %v5495_v52 = vld [vmem:[%s5685_s11 + $0x308] sm:$0xff]  }
  0x24   : > { %v5498_v53 = vld [vmem:[%s5685_s11 + $0x310] sm:$0xff]   ;;  %v5461_v54 = vld [vmem:[%s5685_s11 + $0xe8] sm:$0xff]   ;;  %v5499_v56 = vld [vmem:[%s5685_s11 + $0x318] sm:$0xff]  }
  0x25   : > { %v5464_v55 = vld [vmem:[%s5685_s11 + $0xf0] sm:$0xff]   ;;  %v5502_v57 = vld [vmem:[%s5685_s11 + $0x320] sm:$0xff]   ;;  %v5465_v58 = vld [vmem:[%s5685_s11 + $0xf8] sm:$0xff]  }
  0x26   : > { %5165 = vmatmul.mubr.msk.bf16.gmra.mrb[8].mxu0 %vm1202_vm0, %v5433_v7  ;;  %v5468_v59 = vld [vmem:[%s5685_s11 + $0x100] sm:$0xff]   ;;  %v5503_v60 = vld [vmem:[%s5685_s11 + $0x328] sm:$0xff]   ;;  %v5506_v61 = vld [vmem:[%s5685_s11 + $0x330] sm:$0xff]  }
  0x27   : > { %5168 = vmatprep.mubr.msk.bf16.mxu0 %vm1202_vm0, %v5434_v8  ;;  %v5469_v62 = vld [vmem:[%s5685_s11 + $0x108] sm:$0xff]   ;;  %v5472_v63 = vld [vmem:[%s5685_s11 + $0x110] sm:$0xff]   ;;  %v5507_v0 = vld [vmem:[%s5685_s11 + $0x338] sm:$0xff]  }
  0x28   : > { %5317 = vmatmul.mubr.msk.bf16.gmra.mrb[8].mxu1 %vm1202_vm0, %v5463_v20  ;;  %v5510_v1 = vld [vmem:[%s5685_s11 + $0x340] sm:$0xff]   ;;  %v5473_v2 = vld [vmem:[%s5685_s11 + $0x118] sm:$0xff]   ;;  %v5511_v4 = vld [vmem:[%s5685_s11 + $0x348] sm:$0xff]  }
  0x29   : > { %5320 = vmatprep.mubr.msk.bf16.mxu1 %vm1202_vm0, %v5466_v21  ;;  %v5476_v3 = vld [vmem:[%s5685_s11 + $0x120] sm:$0xff]   ;;  %v5514_v5 = vld [vmem:[%s5685_s11 + $0x350] sm:$0xff]   ;;  %v5477_v6 = vld [vmem:[%s5685_s11 + $0x128] sm:$0xff]  }
  0x2a   : > { %v5480_v7 = vld [vmem:[%s5685_s11 + $0x130] sm:$0xff]   ;;  %v5515_v8 = vld [vmem:[%s5685_s11 + $0x358] sm:$0xff]   ;;  %v5484_v11 = vld [vmem:[%s5685_s11 + $0x140] sm:$0xff]  }
  0x2b   : > { %v5519_v12 = vld [vmem:[%s5685_s11 + $0x368] sm:$0xff]   ;;  %v5522_v13 = vld [vmem:[%s5685_s11 + $0x370] sm:$0xff]   ;;  %v5523_v16 = vld [vmem:[%s5685_s11 + $0x378] sm:$0xff]  }
  0x2c   : > { %v5526_v17 = vld [vmem:[%s5685_s11 + $0x380] sm:$0xff]   ;;  %v5527_v20 = vld [vmem:[%s5685_s11 + $0x388] sm:$0xff]   ;;  %v5530_v21 = vld [vmem:[%s5685_s11 + $0x390] sm:$0xff]  }
  0x2e   : > { %5169 = vmatmul.mubr.msk.bf16.gmra.mrb[12].mxu0 %vm1202_vm0, %v5435_v9  ;;  %v5518_v9 = vld [vmem:[%s5685_s11 + $0x360] sm:$0xff]  }
  0x2f   : > { %5172 = vmatprep.mubr.msk.bf16.mxu0 %vm1202_vm0, %v5436_v10  ;;  %v5481_v10 = vld [vmem:[%s5685_s11 + $0x138] sm:$0xff]  }
  0x30   : > { %5321 = vmatmul.mubr.msk.bf16.gmra.mrb[12].mxu1 %vm1202_vm0, %v5467_v24  ;;  %v5531_v24 = vld [vmem:[%s5685_s11 + $0x398] sm:$0xff]  }
  0x31   : > { %5324 = vmatprep.mubr.msk.bf16.mxu1 %vm1202_vm0, %v5470_v25  ;;  %v5534_v25 = vld [vmem:[%s5685_s11 + $0x3a0] sm:$0xff]  }
  0x36   : > { %5173 = vmatmul.mubr.msk.bf16.gmra.mrb[16].mxu0 %vm1202_vm0, %v5437_v14  ;;  %v5485_v14 = vld [vmem:[%s5685_s11 + $0x148] sm:$0xff]  }
  0x37   : > { %5176 = vmatprep.mubr.msk.bf16.mxu0 %vm1202_vm0, %v5438_v15  ;;  %v5488_v15 = vld [vmem:[%s5685_s11 + $0x150] sm:$0xff]  }
  0x38   : > { %5325 = vmatmul.mubr.msk.bf16.gmra.mrb[16].mxu1 %vm1202_vm0, %v5471_v28  ;;  %v5535_v28 = vld [vmem:[%s5685_s11 + $0x3a8] sm:$0xff]  }
  0x39   : > { %5328 = vmatprep.mubr.msk.bf16.mxu1 %vm1202_vm0, %v5474_v29  ;;  %v5538_v29 = vld [vmem:[%s5685_s11 + $0x3b0] sm:$0xff]  }
  0x3e   : > { %5177 = vmatmul.mubr.msk.bf16.gmra.mrb[20].mxu0 %vm1202_vm0, %v5439_v18  ;;  %v5489_v18 = vld [vmem:[%s5685_s11 + $0x158] sm:$0xff]  }
  0x3f   : > { %5180 = vmatprep.mubr.msk.bf16.mxu0 %vm1202_vm0, %v5440_v19  ;;  %v5492_v19 = vld [vmem:[%s5685_s11 + $0x160] sm:$0xff]  }
  0x40   : > { %5329 = vmatmul.mubr.msk.bf16.gmra.mrb[20].mxu1 %vm1202_vm0, %v5475_v32  ;;  %v5539_v32 = vld [vmem:[%s5685_s11 + $0x3b8] sm:$0xff]  }
  0x41   : > { %5332 = vmatprep.mubr.msk.bf16.mxu1 %vm1202_vm0, %v5478_v33  ;;  %v5542_v33 = vld [vmem:[%s5685_s11 + $0x3c0] sm:$0xff]  }
  0x46   : > { %5181 = vmatmul.mubr.msk.bf16.gmra.mrb[24].mxu0 %vm1202_vm0, %v5441_v22  ;;  %v5493_v22 = vld [vmem:[%s5685_s11 + $0x168] sm:$0xff]  }
  0x47   : > { %5184 = vmatprep.mubr.msk.bf16.mxu0 %vm1202_vm0, %v5442_v23  ;;  %v5496_v23 = vld [vmem:[%s5685_s11 + $0x170] sm:$0xff]  }
  0x48   : > { %5333 = vmatmul.mubr.msk.bf16.gmra.mrb[24].mxu1 %vm1202_vm0, %v5479_v36  ;;  %v5543_v36 = vld [vmem:[%s5685_s11 + $0x3c8] sm:$0xff]  }
  0x49   : > { %5336 = vmatprep.mubr.msk.bf16.mxu1 %vm1202_vm0, %v5482_v37  ;;  %v5546_v37 = vld [vmem:[%s5685_s11 + $0x3d0] sm:$0xff]  }
  0x4e   : > { %5185 = vmatmul.mubr.msk.bf16.gmra.mrb[28].mxu0 %vm1202_vm0, %v5443_v26  ;;  %v5497_v26 = vld [vmem:[%s5685_s11 + $0x178] sm:$0xff]  }
  0x4f   : > { %5188 = vmatprep.mubr.msk.bf16.mxu0 %vm1202_vm0, %v5444_v27  ;;  %v5500_v27 = vld [vmem:[%s5685_s11 + $0x180] sm:$0xff]  }
  0x50   : > { %5337 = vmatmul.mubr.msk.bf16.gmra.mrb[28].mxu1 %vm1202_vm0, %v5483_v40  ;;  %v5547_v40 = vld [vmem:[%s5685_s11 + $0x3d8] sm:$0xff]  }
  0x51   : > { %5340 = vmatprep.mubr.msk.bf16.mxu1 %vm1202_vm0, %v5486_v41  ;;  %v5550_v41 = vld [vmem:[%s5685_s11 + $0x3e0] sm:$0xff]  }
  0x56   : > { %5189 = vmatmul.mubr.msk.bf16.gmra.mrb[32].mxu0 %vm1202_vm0, %v5445_v30  ;;  %v5501_v30 = vld [vmem:[%s5685_s11 + $0x188] sm:$0xff]  }
  0x57   : > { %5192 = vmatprep.mubr.msk.bf16.mxu0 %vm1202_vm0, %v5446_v31  ;;  %v5504_v31 = vld [vmem:[%s5685_s11 + $0x190] sm:$0xff]  }
  0x58   : > { %5341 = vmatmul.mubr.msk.bf16.gmra.mrb[32].mxu1 %vm1202_vm0, %v5487_v44 }
  0x59   : > { %5344 = vmatprep.mubr.msk.bf16.mxu1 %vm1202_vm0, %v5490_v45  ;;  %v5513_v45 = vld [vmem:[%s5685_s11 + $0x1b8] sm:$0xff]  }
  0x5e   : > { %5193 = vmatmul.mubr.msk.bf16.gmra.mrb[36].mxu0 %vm1202_vm0, %v5447_v34  ;;  %v5505_v34 = vld [vmem:[%s5685_s11 + $0x198] sm:$0xff]  }
  0x5f   : > { %5196 = vmatprep.mubr.msk.bf16.mxu0 %vm1202_vm0, %v5448_v35  ;;  %v5508_v35 = vld [vmem:[%s5685_s11 + $0x1a0] sm:$0xff]  }
  0x60   : > { %5345 = vmatmul.mubr.msk.bf16.gmra.mrb[36].mxu1 %vm1202_vm0, %v5491_v48 }
  0x61   : > { %5348 = vmatprep.mubr.msk.bf16.mxu1 %vm1202_vm0, %v5494_v49  ;;  %v5516_v49 = vld [vmem:[%s5685_s11 + $0x1c0] sm:$0xff]  }
  0x66   : > { %5197 = vmatmul.mubr.msk.bf16.gmra.mrb[40].mxu0 %vm1202_vm0, %v5449_v38  ;;  %v5509_v38 = vld [vmem:[%s5685_s11 + $0x1a8] sm:$0xff]  }
  0x67   : > { %5200 = vmatprep.mubr.msk.bf16.mxu0 %vm1202_vm0, %v5450_v39  ;;  %v5512_v39 = vld [vmem:[%s5685_s11 + $0x1b0] sm:$0xff]  }
  0x68   : > { %5349 = vmatmul.mubr.msk.bf16.gmra.mrb[40].mxu1 %vm1202_vm0, %v5495_v52  ;;  %v5551_v52 = vld [vmem:[%s5685_s11 + $0x3e8] sm:$0xff]  }
  0x69   : > { %5352 = vmatprep.mubr.msk.bf16.mxu1 %vm1202_vm0, %v5498_v53 }
  0x6e   : > { %5201 = vmatmul.mubr.msk.bf16.gmra.mrb[44].mxu0 %vm1202_vm0, %v5451_v42  ;;  %v5896_v42 = vld [vmem:[%s7705_s2] ss:$0 sm:$0xff] }
  0x6f   : > { %5204 = vmatprep.mubr.msk.bf16.mxu0 %vm1202_vm0, %v5452_v43 }
  0x70   : > { %5353 = vmatmul.mubr.msk.bf16.gmra.mrb[44].mxu1 %vm1202_vm0, %v5499_v56 }
  0x71   : > { %5356 = vmatprep.mubr.msk.bf16.mxu1 %vm1202_vm0, %v5502_v57 }
  0x76   : > { %5205 = vmatmul.mubr.msk.bf16.gmra.mrb[48].mxu0 %vm1202_vm0, %v5453_v46 }
  0x77   : > { %5208 = vmatprep.mubr.msk.bf16.mxu0 %vm1202_vm0, %v5456_v47 }
  0x78   : > { %5357 = vmatmul.mubr.msk.bf16.gmra.mrb[48].mxu1 %vm1202_vm0, %v5503_v60 }
  0x79   : > { %5360 = vmatprep.mubr.msk.bf16.mxu1 %vm1202_vm0, %v5506_v61 }
  0x7e   : > { %5209 = vmatmul.mubr.msk.bf16.gmra.mrb[52].mxu0 %vm1202_vm0, %v5457_v50 }
  0x7f   : > { %5212 = vmatprep.mubr.msk.bf16.mxu0 %vm1202_vm0, %v5460_v51 }
  0x80   : > { %5361 = vmatmul.mubr.msk.bf16.gmra.mrb[52].mxu1 %vm1202_vm0, %v5507_v0 }
  0x81   : > { %5364 = vmatprep.mubr.msk.bf16.mxu1 %vm1202_vm0, %v5510_v1 }
  0x86   : > { %5213 = vmatmul.mubr.msk.bf16.gmra.mrb[56].mxu0 %vm1202_vm0, %v5461_v54 }
  0x87   : > { %5216 = vmatprep.mubr.msk.bf16.mxu0 %vm1202_vm0, %v5464_v55  ;;  %v5554_v55 = vld [vmem:[%s5685_s11 + $0x3f0] sm:$0xff]  }
  0x88   : > { %5365 = vmatmul.mubr.msk.bf16.gmra.mrb[56].mxu1 %vm1202_vm0, %v5511_v4 }
  0x89   : > { %5368 = vmatprep.mubr.msk.bf16.mxu1 %vm1202_vm0, %v5514_v5 }
  0x8e   : > { %5217 = vmatmul.mubr.msk.bf16.gmra.mrb[60].mxu0 %vm1202_vm0, %v5465_v58 }
  0x8f   : > { %5220 = vmatprep.mubr.msk.bf16.mxu0 %vm1202_vm0, %v5468_v59 }
  0x90   : > { %5369 = vmatmul.mubr.msk.bf16.gmra.mrb[60].mxu1 %vm1202_vm0, %v5515_v8 }
  0x91   : > { %5372 = vmatprep.mubr.msk.bf16.mxu1 %vm1202_vm0, %v5518_v9  ;;  %v5520_v9 = vld [vmem:[%s5685_s11 + $0x1d0] sm:$0xff]  }
  0x96   : > { %5221 = vmatmul.mubr.msk.bf16.gmra.mrb[64].mxu0 %vm1202_vm0, %v5469_v62 }
  0x97   : > { %5224 = vmatprep.mubr.msk.bf16.mxu0 %vm1202_vm0, %v5472_v63 }
  0x98   : > { %5373 = vmatmul.mubr.msk.bf16.gmra.mrb[64].mxu1 %vm1202_vm0, %v5519_v12 }
  0x99   : > { %5376 = vmatprep.mubr.msk.bf16.mxu1 %vm1202_vm0, %v5522_v13 }
  0x9e   : > { %5225 = vmatmul.mubr.msk.bf16.gmra.mrb[68].mxu0 %vm1202_vm0, %v5473_v2 }
  0x9f   : > { %5228 = vmatprep.mubr.msk.bf16.mxu0 %vm1202_vm0, %v5476_v3  ;;  %v5517_v3 = vld [vmem:[%s5685_s11 + $0x1c8] sm:$0xff]  }
  0xa0   : > { %5377 = vmatmul.mubr.msk.bf16.gmra.mrb[68].mxu1 %vm1202_vm0, %v5523_v16 }
  0xa1   : > { %5380 = vmatprep.mubr.msk.bf16.mxu1 %vm1202_vm0, %v5526_v17 }
  0xa6   : > { %5229 = vmatmul.mubr.msk.bf16.gmra.mrb[72].mxu0 %vm1202_vm0, %v5477_v6 }
  0xa7   : > { %5232 = vmatprep.mubr.msk.bf16.mxu0 %vm1202_vm0, %v5480_v7 }
  0xa8   : > { %5381 = vmatmul.mubr.msk.bf16.gmra.mrb[72].mxu1 %vm1202_vm0, %v5527_v20 }
  0xa9   : > { %5384 = vmatprep.mubr.msk.bf16.mxu1 %vm1202_vm0, %v5530_v21 }
  0xae   : > { %5233 = vmatmul.mubr.msk.bf16.gmra.mrb[76].mxu0 %vm1202_vm0, %v5481_v10 }
  0xaf   : > { %5236 = vmatprep.mubr.msk.bf16.mxu0 %vm1202_vm0, %v5484_v11 }
  0xb0   : > { %5385 = vmatmul.mubr.msk.bf16.gmra.mrb[76].mxu1 %vm1202_vm0, %v5531_v24 }
  0xb1   : > { %5388 = vmatprep.mubr.msk.bf16.mxu1 %vm1202_vm0, %v5534_v25 }
  0xb6   : > { %5237 = vmatmul.mubr.msk.bf16.gmra.mrb[80].mxu0 %vm1202_vm0, %v5485_v14  ;;  %v5555_v14 = vld [vmem:[%s5685_s11 + $0x3f8] sm:$0xff]  }
  0xb7   : > { %5240 = vmatprep.mubr.msk.bf16.mxu0 %vm1202_vm0, %v5488_v15 }
  0xb8   : > { %5389 = vmatmul.mubr.msk.bf16.gmra.mrb[80].mxu1 %vm1202_vm0, %v5535_v28 }
  0xb9   : > { %5392 = vmatprep.mubr.msk.bf16.mxu1 %vm1202_vm0, %v5538_v29 }
  0xbe   : > { %5241 = vmatmul.mubr.msk.bf16.gmra.mrb[84].mxu0 %vm1202_vm0, %v5489_v18 }
  0xbf   : > { %5244 = vmatprep.mubr.msk.bf16.mxu0 %vm1202_vm0, %v5492_v19 }
  0xc0   : > { %5393 = vmatmul.mubr.msk.bf16.gmra.mrb[84].mxu1 %vm1202_vm0, %v5539_v32 }
  0xc1   : > { %5396 = vmatprep.mubr.msk.bf16.mxu1 %vm1202_vm0, %v5542_v33 }
  0xc6   : > { %5245 = vmatmul.mubr.msk.bf16.gmra.mrb[88].mxu0 %vm1202_vm0, %v5493_v22 }
  0xc7   : > { %5248 = vmatprep.mubr.msk.bf16.mxu0 %vm1202_vm0, %v5496_v23 }
  0xc8   : > { %5397 = vmatmul.mubr.msk.bf16.gmra.mrb[88].mxu1 %vm1202_vm0, %v5543_v36 }
  0xc9   : > { %5400 = vmatprep.mubr.msk.bf16.mxu1 %vm1202_vm0, %v5546_v37 }
  0xce   : > { %5249 = vmatmul.mubr.msk.bf16.gmra.mrb[92].mxu0 %vm1202_vm0, %v5497_v26 }
  0xcf   : > { %5252 = vmatprep.mubr.msk.bf16.mxu0 %vm1202_vm0, %v5500_v27 }
  0xd0   : > { %5401 = vmatmul.mubr.msk.bf16.gmra.mrb[92].mxu1 %vm1202_vm0, %v5547_v40  ;;  %v5524_v40 = vld [vmem:[%s5685_s11 + $0x1e0] sm:$0xff]  }
  0xd1   : > { %5404 = vmatprep.mubr.msk.bf16.mxu1 %vm1202_vm0, %v5550_v41 }
  0xd6   : > { %5253 = vmatmul.mubr.msk.bf16.gmra.mrb[96].mxu0 %vm1202_vm0, %v5501_v30 }
  0xd7   : > { %5256 = vmatprep.mubr.msk.bf16.mxu0 %vm1202_vm0, %v5504_v31 }
  0xd8   : > { %5405 = vmatmul.mubr.msk.bf16.gmra.mrb[96].mxu1 %vm1202_vm0, %v5551_v52 }
  0xd9   : > { %5408 = vmatprep.mubr.msk.bf16.mxu1 %vm1202_vm0, %v5554_v55 }
  0xde   : > { %5257 = vmatmul.mubr.msk.bf16.gmra.mrb[100].mxu0 %vm1202_vm0, %v5505_v34 }
  0xdf   : > { %5260 = vmatprep.mubr.msk.bf16.mxu0 %vm1202_vm0, %v5508_v35  ;;  %v5521_v35 = vld [vmem:[%s5685_s11 + $0x1d8] sm:$0xff]  }
  0xe0   : > { %5409 = vmatmul.mubr.msk.bf16.gmra.mrb[100].mxu1 %vm1202_vm0, %v5555_v14 }
  0xe6   : > { %5261 = vmatmul.mubr.msk.bf16.gmra.mrb[104].mxu0 %vm1202_vm0, %v5509_v38 }
  0xe7   : > { %5264 = vmatprep.mubr.msk.bf16.mxu0 %vm1202_vm0, %v5512_v39 }
  0xe9   : > { %v5158_v43 = vpop.f32.mrb[0].mxu0 }
  0xea   : > { %v1621_v44 = vpop.f32.mrb[1].mxu0  ;;  %v1630_v46 = vadd.f32 %v5158_v43, %v5896_v42 }
  0xeb   : > { %v1622_v47 = vadd.f32 %v5896_v42, %v1621_v44  ;;  %v5159_v48 = vpop.f32.mrb[2].mxu0 }
  0xec   : > { %v1633_v50 = vadd.f32 %v5159_v48, %v5896_v42  ;;  %v1624_v51 = vpop.f32.mrb[3].mxu0  ;;  %v2646_v56 = vmax.f32 %v1630_v46, 0.0 }
  0xed   : > { %v2644_v53 = vmax.f32 %v1622_v47, 0.0  ;;  %v1625_v54 = vadd.f32 %v5896_v42, %v1624_v51 }
  0xee   : > { %5265 = vmatmul.mubr.msk.bf16.gmra.mrb[108].mxu0 %vm1202_vm0, %v5513_v45  ;;  %v2647_v58 = vmax.f32 %v1633_v50, 0.0  ;;  %v2903_v4 = vsel %vm1202_vm0, %v2646_v56, 0.0  ;;  %v3455_v5 = vsel %vm1202_vm0, %v2646_v56, -inf }
  0xef   : > { %v2645_v57 = vmax.f32 %v1625_v54, 0.0  ;;  %5268 = vmatprep.mubr.msk.bf16.mxu0 %vm1202_vm0, %v5516_v49  ;;  %v2900_v59 = vsel %vm1202_vm0, %v2644_v53, 0.0  ;;  %v3452_v60 = vsel %vm1202_vm0, %v2644_v53, -inf }
  0xf0   : > { %v2905_v10 = vsel %vm1202_vm0, %v2647_v58, 0.0  ;;  %v3457_v15 = vsel %vm1202_vm0, %v2647_v58, -inf }
  0xf1   : > { %v2901_v61 = vsel %vm1202_vm0, %v2645_v57, 0.0  ;;  %v3453_v62 = vsel %vm1202_vm0, %v2645_v57, -inf  ;;  %v5162_v63 = vpop.f32.mrb[4].mxu0 }
  0xf2   : > { %v2902_v0 = vadd.f32 %v2901_v61, %v2900_v59  ;;  %v3454_v1 = vmax.f32 %v3452_v60, %v3453_v62  ;;  %v1637_v2 = vpop.f32.mrb[5].mxu0  ;;  %v1646_v6 = vadd.f32 %v5162_v63, %v5896_v42 }
  0xf3   : > { %v1638_v7 = vadd.f32 %v5896_v42, %v1637_v2  ;;  %v5163_v8 = vpop.f32.mrb[6].mxu0 }
  0xf4   : > { %v2904_v11 = vadd.f32 %v2903_v4, %v2902_v0  ;;  %v3456_v12 = vmax.f32 %v3454_v1, %v3455_v5  ;;  %v1640_v13 = vpop.f32.mrb[7].mxu0  ;;  %v1649_v17 = vadd.f32 %v5163_v8, %v5896_v42  ;;  %v2650_v21 = vmax.f32 %v1646_v6, 0.0 }
  0xf5   : > { %v2648_v16 = vmax.f32 %v1638_v7, 0.0  ;;  %v1641_v18 = vadd.f32 %v5896_v42, %v1640_v13 }
  0xf6   : > { %v2906_v19 = vadd.f32 %v2905_v10, %v2904_v11  ;;  %v3458_v20 = vmax.f32 %v3456_v12, %v3457_v15  ;;  %5269 = vmatmul.mubr.msk.bf16.gmra.mrb[112].mxu0 %vm1202_vm0, %v5517_v3  ;;  %v2651_v27 = vmax.f32 %v1649_v17, 0.0  ;;  %v2911_v36 = vsel %vm1202_vm0, %v2650_v21, 0.0  ;;  %v5525_v3 = vld [vmem:[%s5685_s11 + $0x1e8] sm:$0xff]   ;;  %v5310_v10 = vpop.f32.mrb[0].mxu1 }
  0xf7   : > { %v2907_v22 = vsel %vm1202_vm0, %v2648_v16, 0.0  ;;  %v3459_v23 = vsel %vm1202_vm0, %v2648_v16, -inf  ;;  %v2649_v24 = vmax.f32 %v1641_v18, 0.0  ;;  %5272 = vmatprep.mubr.msk.bf16.mxu0 %vm1202_vm0, %v5520_v9  ;;  %v3463_v37 = vsel %vm1202_vm0, %v2650_v21, -inf  ;;  %v5528_v9 = vld [vmem:[%s5685_s11 + $0x1f0] sm:$0xff]   ;;  %v2229_v16 = vpop.f32.mrb[1].mxu1 }
  0xf8   : > { %v2908_v25 = vadd.f32 %v2907_v22, %v2906_v19  ;;  %v3460_v26 = vmax.f32 %v3458_v20, %v3459_v23  ;;  %v2913_v46 = vsel %vm1202_vm0, %v2651_v27, 0.0  ;;  %v3465_v47 = vsel %vm1202_vm0, %v2651_v27, -inf  ;;  %v5311_v21 = vpop.f32.mrb[2].mxu1 }
  0xf9   : > { %v2909_v28 = vsel %vm1202_vm0, %v2649_v24, 0.0  ;;  %v3461_v29 = vsel %vm1202_vm0, %v2649_v24, -inf  ;;  %v5166_v30 = vpop.f32.mrb[8].mxu0  ;;  %v5961_v19 = vadd.f32 %v5310_v10, %v5896_v42  ;;  %v5964_v20 = vadd.f32 %v5896_v42, %v2229_v16  ;;  %v2232_v24 = vpop.f32.mrb[3].mxu1 }
  0xfa   : > { %v2910_v31 = vadd.f32 %v2909_v28, %v2908_v25  ;;  %v3462_v32 = vmax.f32 %v3460_v26, %v3461_v29  ;;  %v1662_v33 = vadd.f32 %v5166_v30, %v5896_v42  ;;  %v1653_v34 = vpop.f32.mrb[9].mxu0 }
  0xfb   : > { %v1654_v38 = vadd.f32 %v5896_v42, %v1653_v34  ;;  %v5167_v39 = vpop.f32.mrb[10].mxu0 }
  0xfc   : > { %v2912_v41 = vadd.f32 %v2911_v36, %v2910_v31  ;;  %v3464_v43 = vmax.f32 %v3462_v32, %v3463_v37  ;;  %v1665_v44 = vadd.f32 %v5167_v39, %v5896_v42  ;;  %v1656_v45 = vpop.f32.mrb[11].mxu0  ;;  %v2654_v50 = vmax.f32 %v1662_v33, 0.0 }
  0xfd   : > { %v2652_v48 = vmax.f32 %v1654_v38, 0.0  ;;  %v1657_v49 = vadd.f32 %v5896_v42, %v1656_v45  ;;  %v2798_v31 = vmax.f32 %v5961_v19, 0.0  ;;  %v2796_v32 = vmax.f32 %v5964_v20, 0.0 }
  0xfe   : > { %v2914_v51 = vadd.f32 %v2913_v46, %v2912_v41  ;;  %v3466_v52 = vmax.f32 %v3464_v43, %v3465_v47  ;;  %5273 = vmatmul.mubr.msk.bf16.gmra.mrb[116].mxu0 %vm1202_vm0, %v5521_v35  ;;  %v2655_v55 = vmax.f32 %v1665_v44, 0.0  ;;  %v2919_v62 = vsel %vm1202_vm0, %v2654_v50, 0.0  ;;  %v5529_v44 = vld [vmem:[%s5685_s11 + $0x1f8] sm:$0xff]  }
  0xff   : > { %v2915_v53 = vsel %vm1202_vm0, %v2652_v48, 0.0  ;;  %v3467_v54 = vsel %vm1202_vm0, %v2652_v48, -inf  ;;  %v2653_v56 = vmax.f32 %v1657_v49, 0.0  ;;  %5276 = vmatprep.mubr.msk.bf16.mxu0 %vm1202_vm0, %v5524_v40  ;;  %v3471_v4 = vsel %vm1202_vm0, %v2654_v50, -inf  ;;  %v5532_v48 = vld [vmem:[%s5685_s11 + $0x200] sm:$0xff]  }
 0x100   : > { %v2916_v57 = vadd.f32 %v2915_v53, %v2914_v51  ;;  %v3468_v58 = vmax.f32 %v3466_v52, %v3467_v54  ;;  %v2921_v5 = vsel %vm1202_vm0, %v2655_v55, 0.0  ;;  %v3473_v6 = vsel %vm1202_vm0, %v2655_v55, -inf  ;;  %v5314_v51 = vpop.f32.mrb[4].mxu1 }
 0x101   : > { %v2917_v59 = vsel %vm1202_vm0, %v2653_v56, 0.0  ;;  %v3469_v60 = vsel %vm1202_vm0, %v2653_v56, -inf  ;;  %v5170_v61 = vpop.f32.mrb[12].mxu0  ;;  %v3779_v49 = vsel %vm1202_vm0, %v2798_v31, -inf  ;;  %v3775_v50 = vsel %vm1202_vm0, %v2796_v32, -inf }
 0x102   : > { %v2918_v63 = vadd.f32 %v2917_v59, %v2916_v57  ;;  %v3470_v0 = vmax.f32 %v3468_v58, %v3469_v60  ;;  %v1678_v1 = vadd.f32 %v5170_v61, %v5896_v42  ;;  %v1669_v2 = vpop.f32.mrb[13].mxu0  ;;  %v5989_v57 = vpop.f32.mrb[5].mxu1  ;;  %v3776_v60 = vmax.f32 %v3779_v49, %v3775_v50 }
 0x103   : > { %v1670_v7 = vadd.f32 %v5896_v42, %v1669_v2  ;;  %v5171_v8 = vpop.f32.mrb[14].mxu0  ;;  %v5993_v61 = vadd.f32 %v5311_v21, %v5896_v42  ;;  %v6165_v19 = vsel %vm1202_vm0, %v2796_v32, 0.0 }
 0x104   : > { %v2920_v11 = vadd.f32 %v2919_v62, %v2918_v63  ;;  %v3472_v12 = vmax.f32 %v3470_v0, %v3471_v4  ;;  %v2658_v13 = vmax.f32 %v1678_v1, 0.0  ;;  %v1681_v14 = vadd.f32 %v5171_v8, %v5896_v42  ;;  %v1672_v15 = vpop.f32.mrb[15].mxu0  ;;  %v5995_v62 = vpop.f32.mrb[6].mxu1  ;;  %7721 = vst [vmem:[#allocation6_spill] sm:$0xff] %v6165_v19 }
 0x105   : > { %v2656_v17 = vmax.f32 %v1670_v7, 0.0  ;;  %v1673_v18 = vadd.f32 %v5896_v42, %v1672_v15  ;;  %v5998_v1 = vpop.f32.mrb[7].mxu1  ;;  %v2799_v8 = vmax.f32 %v5993_v61, 0.0 }
 0x106   : > { %v2922_v22 = vadd.f32 %v2921_v5, %v2920_v11  ;;  %v3474_v23 = vmax.f32 %v3472_v12, %v3473_v6  ;;  %5277 = vmatmul.mubr.msk.bf16.gmra.mrb[120].mxu0 %vm1202_vm0, %v5525_v3  ;;  %v2659_v27 = vmax.f32 %v1681_v14, 0.0  ;;  %v2927_v33 = vsel %vm1202_vm0, %v2658_v13, 0.0 }
 0x107   : > { %v2923_v25 = vsel %vm1202_vm0, %v2656_v17, 0.0  ;;  %v3475_v26 = vsel %vm1202_vm0, %v2656_v17, -inf  ;;  %v2657_v28 = vmax.f32 %v1673_v18, 0.0  ;;  %5280 = vmatprep.mubr.msk.bf16.mxu0 %vm1202_vm0, %v5528_v9  ;;  %v3479_v34 = vsel %vm1202_vm0, %v2658_v13, -inf }
 0x108   : > { %v2924_v29 = vadd.f32 %v2923_v25, %v2922_v22  ;;  %v3476_v30 = vmax.f32 %v3474_v23, %v3475_v26  ;;  %v2929_v38 = vsel %vm1202_vm0, %v2659_v27, 0.0  ;;  %v3481_v45 = vsel %vm1202_vm0, %v2659_v27, -inf  ;;  %v5533_v22 = vld [vmem:[%s5685_s11 + $0x208] sm:$0xff]   ;;  %v5536_v25 = vld [vmem:[%s5685_s11 + $0x210] sm:$0xff]  }
 0x109   : > { %v2925_v35 = vsel %vm1202_vm0, %v2657_v28, 0.0  ;;  %v3477_v36 = vsel %vm1202_vm0, %v2657_v28, -inf  ;;  %v5174_v37 = vpop.f32.mrb[16].mxu0  ;;  %v6005_v9 = vadd.f32 %v5896_v42, %v2232_v24  ;;  %v3781_v26 = vsel %vm1202_vm0, %v2799_v8, -inf }
 0x10a   : > { %v2926_v39 = vadd.f32 %v2925_v35, %v2924_v29  ;;  %v3478_v40 = vmax.f32 %v3476_v30, %v3477_v36  ;;  %v1694_v41 = vadd.f32 %v5174_v37, %v5896_v42  ;;  %v1685_v43 = vpop.f32.mrb[17].mxu0  ;;  %v6021_v28 = vadd.f32 %v5314_v51, %v5896_v42  ;;  %v6023_v29 = vpop.f32.mrb[8].mxu1 }
 0x10b   : > { %v1686_v46 = vadd.f32 %v5896_v42, %v1685_v43  ;;  %v5175_v47 = vpop.f32.mrb[18].mxu0  ;;  %v2797_v27 = vmax.f32 %v6005_v9, 0.0  ;;  %v6026_v37 = vpop.f32.mrb[9].mxu1  ;;  %v6179_v32 = vsel %vm1202_vm0, %v2799_v8, 0.0 }
 0x10c   : > { %v2928_v52 = vadd.f32 %v2927_v33, %v2926_v39  ;;  %v3480_v53 = vmax.f32 %v3478_v40, %v3479_v34  ;;  %v2662_v54 = vmax.f32 %v1694_v41, 0.0  ;;  %v1697_v55 = vadd.f32 %v5175_v47, %v5896_v42  ;;  %v1688_v56 = vpop.f32.mrb[19].mxu0  ;;  %v6030_v43 = vpop.f32.mrb[10].mxu1  ;;  %7722 = vst [vmem:[#allocation7_spill] sm:$0xff] %v6179_v32 }
 0x10d   : > { %v2660_v58 = vmax.f32 %v1686_v46, 0.0  ;;  %v1689_v59 = vadd.f32 %v5896_v42, %v1688_v56  ;;  %v3778_v41 = vmax.f32 %v3776_v60, %v3781_v26  ;;  %v6034_v47 = vpop.f32.mrb[11].mxu1 }
 0x10e   : > { %v2930_v63 = vadd.f32 %v2929_v38, %v2928_v52  ;;  %v3482_v0 = vmax.f32 %v3480_v53, %v3481_v45  ;;  %5281 = vmatmul.mubr.msk.bf16.gmra.mrb[124].mxu0 %vm1202_vm0, %v5529_v44  ;;  %v2663_v4 = vmax.f32 %v1697_v55, 0.0  ;;  %v2935_v10 = vsel %vm1202_vm0, %v2662_v54, 0.0 }
 0x10f   : > { %v2931_v2 = vsel %vm1202_vm0, %v2660_v58, 0.0  ;;  %v3483_v3 = vsel %vm1202_vm0, %v2660_v58, -inf  ;;  %v2661_v5 = vmax.f32 %v1689_v59, 0.0  ;;  %5284 = vmatprep.mubr.msk.bf16.mxu0 %vm1202_vm0, %v5532_v48  ;;  %v3487_v11 = vsel %vm1202_vm0, %v2662_v54, -inf }
 0x110   : > { %v2932_v6 = vadd.f32 %v2931_v2, %v2930_v63  ;;  %v3484_v7 = vmax.f32 %v3482_v0, %v3483_v3  ;;  %v2937_v15 = vsel %vm1202_vm0, %v2663_v4, 0.0  ;;  %v3489_v38 = vsel %vm1202_vm0, %v2663_v4, -inf }
 0x111   : > { %v2933_v12 = vsel %vm1202_vm0, %v2661_v5, 0.0  ;;  %v3485_v13 = vsel %vm1202_vm0, %v2661_v5, -inf  ;;  %v5178_v14 = vpop.f32.mrb[20].mxu0  ;;  %v3777_v54 = vsel %vm1202_vm0, %v2797_v27, -inf  ;;  %v2802_v55 = vmax.f32 %v6021_v28, 0.0  ;;  %v5537_v5 = vld [vmem:[%s5685_s11 + $0x218] sm:$0xff]  }
 0x112   : > { %v2934_v16 = vadd.f32 %v2933_v12, %v2932_v6  ;;  %v3486_v17 = vmax.f32 %v3484_v7, %v3485_v13  ;;  %v1710_v18 = vadd.f32 %v5178_v14, %v5896_v42  ;;  %v1701_v21 = vpop.f32.mrb[21].mxu0  ;;  %v3780_v6 = vmax.f32 %v3778_v41, %v3777_v54  ;;  %v5540_v12 = vld [vmem:[%s5685_s11 + $0x220] sm:$0xff]  }
 0x113   : > { %v1702_v23 = vadd.f32 %v5896_v42, %v1701_v21  ;;  %v5179_v24 = vpop.f32.mrb[22].mxu0  ;;  %v3787_v13 = vsel %vm1202_vm0, %v2802_v55, -inf  ;;  %v6057_v14 = vadd.f32 %v5896_v42, %v5989_v57 }
 0x114   : > { %v2936_v30 = vadd.f32 %v2935_v10, %v2934_v16  ;;  %v3488_v33 = vmax.f32 %v3486_v17, %v3487_v11  ;;  %v2666_v34 = vmax.f32 %v1710_v18, 0.0  ;;  %v1713_v35 = vadd.f32 %v5179_v24, %v5896_v42  ;;  %v1704_v36 = vpop.f32.mrb[23].mxu0 }
 0x115   : > { %v2664_v39 = vmax.f32 %v1702_v23, 0.0  ;;  %v1705_v40 = vadd.f32 %v5896_v42, %v1704_v36  ;;  %v6065_v26 = vmax.f32 %v3780_v6, %v3787_v13 }
 0x116   : > { %v2943_v44 = vsel %vm1202_vm0, %v2666_v34, 0.0  ;;  %v2938_v45 = vadd.f32 %v2937_v15, %v2936_v30  ;;  %v3490_v46 = vmax.f32 %v3488_v33, %v3489_v38  ;;  %5285 = vmatmul.mubr.msk.bf16.gmra.mrb[128].mxu0 %vm1202_vm0, %v5533_v22  ;;  %v2667_v50 = vmax.f32 %v1713_v35, 0.0  ;;  %v6059_v15 = vpop.f32.mrb[12].mxu1 }
 0x117   : > { %v2939_v48 = vsel %vm1202_vm0, %v2664_v39, 0.0  ;;  %v3491_v49 = vsel %vm1202_vm0, %v2664_v39, -inf  ;;  %v2665_v51 = vmax.f32 %v1705_v40, 0.0  ;;  %5288 = vmatprep.mubr.msk.bf16.mxu0 %vm1202_vm0, %v5536_v25  ;;  %v3495_v56 = vsel %vm1202_vm0, %v2666_v34, -inf  ;;  %v6062_v23 = vpop.f32.mrb[13].mxu1 }
 0x118   : > { %v2940_v52 = vadd.f32 %v2939_v48, %v2938_v45  ;;  %v3492_v53 = vmax.f32 %v3490_v46, %v3491_v49  ;;  %v2945_v58 = vsel %vm1202_vm0, %v2667_v50, 0.0  ;;  %v3497_v7 = vsel %vm1202_vm0, %v2667_v50, -inf  ;;  %v6068_v33 = vpop.f32.mrb[14].mxu1 }
 0x119   : > { %v2941_v59 = vsel %vm1202_vm0, %v2665_v51, 0.0  ;;  %v3493_v60 = vsel %vm1202_vm0, %v2665_v51, -inf  ;;  %v5182_v63 = vpop.f32.mrb[24].mxu0  ;;  %v2800_v30 = vmax.f32 %v6057_v14, 0.0  ;;  %v6071_v35 = vpop.f32.mrb[15].mxu1 }
 0x11a   : > { %v2942_v0 = vadd.f32 %v2941_v59, %v2940_v52  ;;  %v3494_v2 = vmax.f32 %v3492_v53, %v3493_v60  ;;  %v1726_v3 = vadd.f32 %v5182_v63, %v5896_v42  ;;  %v1717_v4 = vpop.f32.mrb[25].mxu0 }
 0x11b   : > { %v1718_v10 = vadd.f32 %v5896_v42, %v1717_v4  ;;  %v5183_v11 = vpop.f32.mrb[26].mxu0  ;;  %v3783_v45 = vsel %vm1202_vm0, %v2800_v30, -inf  ;;  %v6096_v4 = vpop.f32.mrb[16].mxu1 }
 0x11c   : > { %v2944_v16 = vadd.f32 %v2943_v44, %v2942_v0  ;;  %v3496_v17 = vmax.f32 %v3494_v2, %v3495_v56  ;;  %v2670_v18 = vmax.f32 %v1726_v3, 0.0  ;;  %v1729_v21 = vadd.f32 %v5183_v11, %v5896_v42  ;;  %v1720_v22 = vpop.f32.mrb[27].mxu0  ;;  %v5541_v56 = vld [vmem:[%s5685_s11 + $0x228] sm:$0xff]   ;;  %v5544_v0 = vld [vmem:[%s5685_s11 + $0x230] sm:$0xff]  }
 0x11d   : > { %v2668_v24 = vmax.f32 %v1718_v10, 0.0  ;;  %v1721_v25 = vadd.f32 %v5896_v42, %v1720_v22  ;;  %v6090_v2 = vadd.f32 %v5995_v62, %v5896_v42  ;;  %v6094_v3 = vadd.f32 %v5896_v42, %v5998_v1 }
 0x11e   : > { %v2946_v57 = vadd.f32 %v2945_v58, %v2944_v16  ;;  %v3498_v34 = vmax.f32 %v3496_v17, %v3497_v7  ;;  %5289 = vmatmul.mubr.msk.bf16.gmra.mrb[132].mxu0 %vm1202_vm0, %v5537_v5  ;;  %v2671_v44 = vmax.f32 %v1729_v21, 0.0  ;;  %v2951_v46 = vsel %vm1202_vm0, %v2670_v18, 0.0 }
 0x11f   : > { %v2947_v36 = vsel %vm1202_vm0, %v2668_v24, 0.0  ;;  %v3499_v38 = vsel %vm1202_vm0, %v2668_v24, -inf  ;;  %v2669_v39 = vmax.f32 %v1721_v25, 0.0  ;;  %5292 = vmatprep.mubr.msk.bf16.mxu0 %vm1202_vm0, %v5540_v12  ;;  %v3784_v58 = vmax.f32 %v6065_v26, %v3783_v45  ;;  %7717 = vst [vmem:[#allocation2_spill] sm:$0xff] %v6090_v2  ;;  %v6100_v12 = vpop.f32.mrb[17].mxu1 }
 0x120   : > { %v2948_v40 = vadd.f32 %v2947_v36, %v2946_v57  ;;  %v3500_v41 = vmax.f32 %v3498_v34, %v3499_v38  ;;  %v3503_v59 = vsel %vm1202_vm0, %v2670_v18, -inf  ;;  %v2953_v5 = vsel %vm1202_vm0, %v2671_v44, 0.0  ;;  %v6105_v1 = vpop.f32.mrb[18].mxu1 }
 0x121   : > { %v2949_v48 = vsel %vm1202_vm0, %v2669_v39, 0.0  ;;  %v3501_v49 = vsel %vm1202_vm0, %v2669_v39, -inf  ;;  %v5186_v50 = vpop.f32.mrb[28].mxu0  ;;  %v3505_v13 = vsel %vm1202_vm0, %v2671_v44, -inf  ;;  %v7711_v17 = vmax.f32 %v6090_v2, 0.0  ;;  %v6108_v24 = vpop.f32.mrb[19].mxu1 }
 0x122   : > { %v2950_v51 = vadd.f32 %v2949_v48, %v2948_v40  ;;  %v3502_v52 = vmax.f32 %v3500_v41, %v3501_v49  ;;  %v1742_v53 = vadd.f32 %v5186_v50, %v5896_v42  ;;  %v1733_v54 = vpop.f32.mrb[29].mxu0  ;;  %v2801_v34 = vmax.f32 %v6094_v3, 0.0 }
 0x123   : > { %v1734_v60 = vadd.f32 %v5896_v42, %v1733_v54  ;;  %v5187_v63 = vpop.f32.mrb[30].mxu0  ;;  %v3789_v40 = vsel %vm1202_vm0, %v7711_v17, -inf }
 0x124   : > { %v2952_v6 = vadd.f32 %v2951_v46, %v2950_v51  ;;  %v3504_v7 = vmax.f32 %v3502_v52, %v3503_v59  ;;  %v1745_v10 = vadd.f32 %v5187_v63, %v5896_v42  ;;  %v1736_v11 = vpop.f32.mrb[31].mxu0  ;;  %v2674_v18 = vmax.f32 %v1742_v53, 0.0  ;;  %v5545_v51 = vld [vmem:[%s5685_s11 + $0x238] sm:$0xff]  }
 0x125   : > { %v2672_v16 = vmax.f32 %v1734_v60, 0.0  ;;  %v1737_v62 = vadd.f32 %v5896_v42, %v1736_v11  ;;  %v6121_v52 = vmax.f32 %v3784_v58, %v3789_v40  ;;  %v5548_v60 = vld [vmem:[%s5685_s11 + $0x240] sm:$0xff]   ;;  %v6130_v63 = vsel %vm1202_vm0, %v2801_v34, -inf }
 0x126   : > { %v2954_v21 = vadd.f32 %v2953_v5, %v2952_v6  ;;  %v3506_v22 = vmax.f32 %v3504_v7, %v3505_v13  ;;  %5293 = vmatmul.mubr.msk.bf16.gmra.mrb[136].mxu0 %vm1202_vm0, %v5541_v56  ;;  %v2675_v39 = vmax.f32 %v1745_v10, 0.0  ;;  %v2959_v46 = vsel %vm1202_vm0, %v2674_v18, 0.0  ;;  %7719 = vst [vmem:[#allocation4_spill] sm:$0xff] %v6130_v63 }
 0x127   : > { %v2955_v25 = vsel %vm1202_vm0, %v2672_v16, 0.0  ;;  %v3507_v26 = vsel %vm1202_vm0, %v2672_v16, -inf  ;;  %v2673_v57 = vmax.f32 %v1737_v62, 0.0  ;;  %5296 = vmatprep.mubr.msk.bf16.mxu0 %vm1202_vm0, %v5544_v0  ;;  %7718 = vst [vmem:[#allocation3_spill] sm:$0xff] %v6121_v52  ;;  %v3511_v53 = vsel %vm1202_vm0, %v2674_v18, -inf  ;;  %v6132_v0 = vpop.f32.mrb[20].mxu1 }
 0x128   : > { %v2956_v36 = vadd.f32 %v2955_v25, %v2954_v21  ;;  %v3508_v38 = vmax.f32 %v3506_v22, %v3507_v26  ;;  %v2961_v5 = vsel %vm1202_vm0, %v2675_v39, 0.0  ;;  %v3513_v58 = vsel %vm1202_vm0, %v2675_v39, -inf  ;;  %v6136_v11 = vpop.f32.mrb[21].mxu1 }
 0x129   : > { %v2957_v41 = vsel %vm1202_vm0, %v2673_v57, 0.0  ;;  %v3509_v44 = vsel %vm1202_vm0, %v2673_v57, -inf  ;;  %v5190_v45 = vpop.f32.mrb[32].mxu0  ;;  %v6142_v21 = vpop.f32.mrb[22].mxu1  ;;  %v6156_v39 = vsel %vm1202_vm0, %v2798_v31, 0.0  ;;  %v2270_v31 = vadd.f32 %v6023_v29, %v5896_v42 }
 0x12a   : > { %v2958_v48 = vadd.f32 %v2957_v41, %v2956_v36  ;;  %v3510_v49 = vmax.f32 %v3508_v38, %v3509_v44  ;;  %v1749_v50 = vpop.f32.mrb[33].mxu0  ;;  %v1758_v54 = vadd.f32 %v5190_v45, %v5896_v42  ;;  %v6149_v26 = vpop.f32.mrb[23].mxu1  ;;  %7720 = vst [vmem:[#allocation5_spill] sm:$0xff] %v6156_v39  ;;  %v2262_v29 = vadd.f32 %v5896_v42, %v6026_v37 }
 0x12b   : > { %v1750_v56 = vadd.f32 %v5896_v42, %v1749_v50  ;;  %v5191_v59 = vpop.f32.mrb[34].mxu0  ;;  %v2806_v8 = vmax.f32 %v2270_v31, 0.0  ;;  %v6217_v9 = vsel %vm1202_vm0, %v2801_v34, 0.0 }
 0x12c   : > { %v2960_v6 = vadd.f32 %v2959_v46, %v2958_v48  ;;  %v3512_v7 = vmax.f32 %v3510_v49, %v3511_v53  ;;  %v1752_v10 = vpop.f32.mrb[35].mxu0  ;;  %v1761_v16 = vadd.f32 %v5191_v59, %v5896_v42  ;;  %v2678_v57 = vmax.f32 %v1758_v54, 0.0  ;;  %7726 = vst [vmem:[#allocation11_spill] sm:$0xff] %v6217_v9 }
 0x12d   : > { %v2676_v13 = vmax.f32 %v1750_v56, 0.0  ;;  %v1753_v62 = vadd.f32 %v5896_v42, %v1752_v10 }
 0x12e   : > { %v6144_v22 = vadd.f32 %v2961_v5, %v2960_v6  ;;  %v6146_v25 = vmax.f32 %v3512_v7, %v3513_v58  ;;  %5297 = vmatmul.mubr.msk.bf16.gmra.mrb[140].mxu0 %vm1202_vm0, %v5545_v51  ;;  %v2679_v41 = vmax.f32 %v1761_v16, 0.0  ;;  %v5549_v51 = vld [vmem:[%s5685_s11 + $0x248] sm:$0xff]   ;;  %v2972_v53 = vsel %vm1202_vm0, %v2678_v57, 0.0  ;;  %v5552_v5 = vld [vmem:[%s5685_s11 + $0x250] sm:$0xff]   ;;  %v6174_v58 = vpop.f32.mrb[24].mxu1 }
 0x12f   : > { %v2677_v36 = vmax.f32 %v1753_v62, 0.0  ;;  %5300 = vmatprep.mubr.msk.bf16.mxu0 %vm1202_vm0, %v5548_v60  ;;  %v2969_v38 = vsel %vm1202_vm0, %v2676_v13, 0.0  ;;  %v3521_v40 = vsel %vm1202_vm0, %v2676_v13, -inf  ;;  %v3524_v54 = vsel %vm1202_vm0, %v2678_v57, -inf  ;;  %v6183_v10 = vpop.f32.mrb[25].mxu1 }
 0x130   : > { %v2974_v13 = vsel %vm1202_vm0, %v2679_v41, 0.0  ;;  %v3526_v16 = vsel %vm1202_vm0, %v2679_v41, -inf }
 0x131   : > { %v2970_v44 = vsel %vm1202_vm0, %v2677_v36, 0.0  ;;  %v3522_v45 = vsel %vm1202_vm0, %v2677_v36, -inf  ;;  %v5194_v46 = vpop.f32.mrb[36].mxu0  ;;  %v6188_v36 = vpop.f32.mrb[26].mxu1 }
 0x132   : > { %v2971_v48 = vadd.f32 %v2970_v44, %v2969_v38  ;;  %v3523_v49 = vmax.f32 %v3521_v40, %v3522_v45  ;;  %v1765_v50 = vpop.f32.mrb[37].mxu0  ;;  %v1774_v56 = vadd.f32 %v5194_v46, %v5896_v42  ;;  %v6192_v44 = vpop.f32.mrb[27].mxu1  ;;  %v6200_v46 = vsel %vm1202_vm0, %v2797_v27, 0.0 }
 0x133   : > { %v1766_v59 = vadd.f32 %v5896_v42, %v1765_v50  ;;  %v5195_v60 = vpop.f32.mrb[38].mxu0  ;;  %7723 = vst [vmem:[#allocation8_spill] sm:$0xff] %v6200_v46  ;;  %v6205_v50 = vsel %vm1202_vm0, %v2802_v55, 0.0  ;;  %v2804_v27 = vmax.f32 %v2262_v29, 0.0 }
 0x134   : > { %v2973_v6 = vadd.f32 %v2972_v53, %v2971_v48  ;;  %v3525_v20 = vmax.f32 %v3523_v49, %v3524_v54  ;;  %v1768_v7 = vpop.f32.mrb[39].mxu0  ;;  %v1777_v61 = vadd.f32 %v5195_v60, %v5896_v42  ;;  %v2682_v37 = vmax.f32 %v1774_v56, 0.0  ;;  %7724 = vst [vmem:[#allocation9_spill] sm:$0xff] %v6205_v50 }
 0x135   : > { %v2680_v62 = vmax.f32 %v1766_v59, 0.0  ;;  %v1769_v57 = vadd.f32 %v5896_v42, %v1768_v7  ;;  %v6212_v54 = vsel %vm1202_vm0, %v2800_v30, 0.0  ;;  %v5553_v59 = vld [vmem:[%s5685_s11 + $0x258] sm:$0xff]   ;;  %v6225_v60 = vsel %vm1202_vm0, %v2806_v8, -inf }
 0x136   : > { %v2975_v38 = vadd.f32 %v2974_v13, %v2973_v6  ;;  %v3527_v40 = vmax.f32 %v3525_v20, %v3526_v16  ;;  %5301 = vmatmul.mubr.msk.bf16.gmra.mrb[144].mxu0 %vm1202_vm0, %v5549_v51  ;;  %v2273_v51 = vadd.f32 %v6030_v43, %v5896_v42  ;;  %7725 = vst [vmem:[#allocation10_spill] sm:$0xff] %v6212_v54  ;;  %v2683_v28 = vmax.f32 %v1777_v61, 0.0  ;;  %v6231_v6 = vpop.f32.mrb[28].mxu1 }
 0x137   : > { %v2976_v45 = vsel %vm1202_vm0, %v2680_v62, 0.0  ;;  %v3528_v41 = vsel %vm1202_vm0, %v2680_v62, -inf  ;;  %5304 = vmatprep.mubr.msk.bf16.mxu0 %vm1202_vm0, %v5552_v5  ;;  %v2681_v31 = vmax.f32 %v1769_v57, 0.0  ;;  %v6222_v43 = vsel %vm1202_vm0, %v2806_v8, 0.0  ;;  %v6234_v62 = vpop.f32.mrb[29].mxu1 }
 0x138   : > { %v2977_v48 = vadd.f32 %v2976_v45, %v2975_v38  ;;  %v3529_v49 = vmax.f32 %v3527_v40, %v3528_v41  ;;  %v2980_v14 = vsel %vm1202_vm0, %v2682_v37, 0.0  ;;  %v3532_v30 = vsel %vm1202_vm0, %v2682_v37, -inf  ;;  %v6241_v8 = vpop.f32.mrb[30].mxu1 }
 0x139   : > { %v5198_v53 = vpop.f32.mrb[40].mxu0  ;;  %v2978_v3 = vsel %vm1202_vm0, %v2681_v31, 0.0  ;;  %v3530_v34 = vsel %vm1202_vm0, %v2681_v31, -inf  ;;  %v2807_v16 = vmax.f32 %v2273_v51, 0.0  ;;  %v3245_v40 = vsel %vm1202_vm0, %v2804_v27, 0.0 }
 0x13a   : > { %v1790_v55 = vadd.f32 %v5198_v53, %v5896_v42  ;;  %v1781_v56 = vpop.f32.mrb[41].mxu0  ;;  %v2979_v20 = vadd.f32 %v2978_v3, %v2977_v48  ;;  %v3531_v7 = vmax.f32 %v3529_v49, %v3530_v34  ;;  %v6239_v61 = vsel %vm1202_vm0, %v2804_v27, -inf  ;;  %v6246_v49 = vpop.f32.mrb[31].mxu1 }
 0x13b   : > { %v5199_v5 = vpop.f32.mrb[42].mxu0  ;;  %v1782_v29 = vadd.f32 %v5896_v42, %v1781_v56  ;;  %v2982_v37 = vsel %vm1202_vm0, %v2683_v28, 0.0  ;;  %v3534_v45 = vsel %vm1202_vm0, %v2683_v28, -inf  ;;  %v2265_v27 = vadd.f32 %v5896_v42, %v6034_v47 }
 0x13c   : > { %v1784_v13 = vpop.f32.mrb[43].mxu0  ;;  %v2686_v57 = vmax.f32 %v1790_v55, 0.0  ;;  %v2981_v41 = vadd.f32 %v2980_v14, %v2979_v20  ;;  %v3533_v48 = vmax.f32 %v3531_v7, %v3532_v30  ;;  %v1793_v31 = vadd.f32 %v5199_v5, %v5896_v42 }
 0x13d   : > { %v1785_v38 = vadd.f32 %v5896_v42, %v1784_v13  ;;  %v2684_v51 = vmax.f32 %v1782_v29, 0.0  ;;  %v6252_v3 = vsel %vm1202_vm0, %v2807_v16, 0.0  ;;  %v6255_v28 = vsel %vm1202_vm0, %v2807_v16, -inf }
 0x13e   : > { %5305 = vmatmul.mubr.msk.bf16.gmra.mrb[148].mxu0 %vm1202_vm0, %v5553_v59  ;;  %v2983_v55 = vadd.f32 %v2982_v37, %v2981_v41  ;;  %v3535_v56 = vmax.f32 %v3533_v48, %v3534_v45  ;;  %v2988_v14 = vsel %vm1202_vm0, %v2686_v57, 0.0  ;;  %v3540_v59 = vsel %vm1202_vm0, %v2686_v57, -inf  ;;  %v6265_v57 = vpop.f32.mrb[32].mxu1 }
 0x13f   : > { %v2685_v53 = vmax.f32 %v1785_v38, 0.0  ;;  %v2984_v30 = vsel %vm1202_vm0, %v2684_v51, 0.0  ;;  %v3536_v34 = vsel %vm1202_vm0, %v2684_v51, -inf  ;;  %v2687_v38 = vmax.f32 %v1793_v31, 0.0 }
 0x140   : > { %v2985_v20 = vadd.f32 %v2984_v30, %v2983_v55  ;;  %v3537_v7 = vmax.f32 %v3535_v56, %v3536_v34  ;;  %v2805_v41 = vmax.f32 %v2265_v27, 0.0  ;;  %v6270_v56 = vadd.f32 %v5896_v42, %v6062_v23 }
 0x141   : > { %v5202_v5 = vpop.f32.mrb[44].mxu0  ;;  %v2986_v47 = vsel %vm1202_vm0, %v2685_v53, 0.0  ;;  %v3538_v29 = vsel %vm1202_vm0, %v2685_v53, -inf  ;;  %v6272_v53 = vpop.f32.mrb[33].mxu1  ;;  %v2990_v23 = vsel %vm1202_vm0, %v2687_v38, 0.0 }
 0x142   : > { %v1797_v13 = vpop.f32.mrb[45].mxu0  ;;  %v1806_v16 = vadd.f32 %v5202_v5, %v5896_v42  ;;  %v2987_v48 = vadd.f32 %v2986_v47, %v2985_v20  ;;  %v3539_v17 = vmax.f32 %v3537_v7, %v3538_v29  ;;  %v3246_v5 = vsel %vm1202_vm0, %v2805_v41, 0.0  ;;  %v6276_v27 = vpop.f32.mrb[34].mxu1 }
 0x143   : > { %v1798_v37 = vadd.f32 %v5896_v42, %v1797_v13  ;;  %v5203_v45 = vpop.f32.mrb[46].mxu0  ;;  %v3247_v7 = vadd.f32 %v3246_v5, %v3245_v40  ;;  %v6280_v47 = vadd.f32 %v6059_v15, %v5896_v42  ;;  %v6282_v29 = vpop.f32.mrb[35].mxu1 }
 0x144   : > { %v1809_v51 = vadd.f32 %v5203_v45, %v5896_v42  ;;  %v1800_v55 = vpop.f32.mrb[47].mxu0  ;;  %v2690_v31 = vmax.f32 %v1806_v16, 0.0  ;;  %v2989_v13 = vadd.f32 %v2988_v14, %v2987_v48  ;;  %v3541_v20 = vmax.f32 %v3539_v17, %v3540_v59 }
 0x145   : > { %v2688_v30 = vmax.f32 %v1798_v37, 0.0  ;;  %v1801_v34 = vadd.f32 %v5896_v42, %v1800_v55  ;;  %v3542_v16 = vsel %vm1202_vm0, %v2687_v38, -inf  ;;  %v2808_v17 = vmax.f32 %v6270_v56, 0.0 }
 0x146   : > { %v2991_v55 = vadd.f32 %v2990_v23, %v2989_v13  ;;  %v3543_v18 = vmax.f32 %v3541_v20, %v3542_v16  ;;  %v2691_v2 = vmax.f32 %v1809_v51, 0.0  ;;  %v2996_v40 = vsel %vm1202_vm0, %v2690_v31, 0.0  ;;  %v6298_v23 = vpop.f32.mrb[36].mxu1 }
 0x147   : > { %v2992_v37 = vsel %vm1202_vm0, %v2688_v30, 0.0  ;;  %v3544_v45 = vsel %vm1202_vm0, %v2688_v30, -inf  ;;  %v2689_v14 = vmax.f32 %v1801_v34, 0.0  ;;  %v3249_v59 = vadd.f32 %v6222_v43, %v3247_v7 }
 0x148   : > { %v3798_v48 = vsel %vm1202_vm0, %v2805_v41, -inf  ;;  %v2993_v5 = vadd.f32 %v2992_v37, %v2991_v55  ;;  %v3545_v50 = vmax.f32 %v3543_v18, %v3544_v45  ;;  %v3548_v13 = vsel %vm1202_vm0, %v2690_v31, -inf  ;;  %v6302_v37 = vpop.f32.mrb[37].mxu1 }
 0x149   : > { %v5206_v15 = vpop.f32.mrb[48].mxu0  ;;  %v3799_v30 = vmax.f32 %v6239_v61, %v3798_v48  ;;  %v2994_v51 = vsel %vm1202_vm0, %v2689_v14, 0.0  ;;  %v3546_v56 = vsel %vm1202_vm0, %v2689_v14, -inf  ;;  %v2998_v43 = vsel %vm1202_vm0, %v2691_v2, 0.0 }
 0x14a   : > { %v1822_v38 = vadd.f32 %v5206_v15, %v5896_v42  ;;  %v1813_v9 = vpop.f32.mrb[49].mxu0  ;;  %v2995_v41 = vadd.f32 %v2994_v51, %v2993_v5  ;;  %v3547_v18 = vmax.f32 %v3545_v50, %v3546_v56  ;;  %v3251_v55 = vadd.f32 %v6252_v3, %v3249_v59 }
 0x14b   : > { %v1814_v34 = vadd.f32 %v5896_v42, %v1813_v9  ;;  %v5207_v20 = vpop.f32.mrb[50].mxu0  ;;  %v3801_v45 = vmax.f32 %v3799_v30, %v6225_v60  ;;  %v6307_v9 = vpop.f32.mrb[38].mxu1  ;;  %v3550_v14 = vsel %vm1202_vm0, %v2691_v2, -inf  ;;  %v3252_v60 = vsel %vm1202_vm0, %v2808_v17, 0.0 }
 0x14c   : > { %v1825_v7 = vadd.f32 %v5207_v20, %v5896_v42  ;;  %v1816_v16 = vpop.f32.mrb[51].mxu0  ;;  %v2997_v15 = vadd.f32 %v2996_v40, %v2995_v41  ;;  %v3549_v48 = vmax.f32 %v3547_v18, %v3548_v13  ;;  %v2694_v5 = vmax.f32 %v1822_v38, 0.0  ;;  %v6310_v50 = vpop.f32.mrb[39].mxu1 }
 0x14d   : > { %v2692_v61 = vmax.f32 %v1814_v34, 0.0  ;;  %v1817_v31 = vadd.f32 %v5896_v42, %v1816_v16  ;;  %v3803_v3 = vmax.f32 %v3801_v45, %v6255_v28  ;;  %v2810_v30 = vmax.f32 %v6280_v47, 0.0  ;;  %v6327_v28 = vld [vmem:[%s7705_s2] ss:$0 sm:$0xff] }
 0x14e   : > { %v2695_v34 = vmax.f32 %v1825_v7, 0.0  ;;  %v2999_v42 = vadd.f32 %v2998_v43, %v2997_v15  ;;  %v3551_v16 = vmax.f32 %v3549_v48, %v3550_v14  ;;  %v3004_v13 = vsel %vm1202_vm0, %v2694_v5, 0.0  ;;  %v6332_v15 = vpop.f32.mrb[40].mxu1 }
 0x14f   : > { %v3000_v51 = vsel %vm1202_vm0, %v2692_v61, 0.0  ;;  %v3552_v56 = vsel %vm1202_vm0, %v2692_v61, -inf  ;;  %v2693_v20 = vmax.f32 %v1817_v31, 0.0  ;;  %v6321_v43 = vadd.f32 %v3252_v60, %v3251_v55 }
 0x150   : > { %v3001_v41 = vadd.f32 %v3000_v51, %v2999_v42  ;;  %v3553_v18 = vmax.f32 %v3551_v16, %v3552_v56  ;;  %v3556_v61 = vsel %vm1202_vm0, %v2694_v5, -inf  ;;  %v3804_v47 = vsel %vm1202_vm0, %v2808_v17, -inf }
 0x151   : > { %v3002_v2 = vsel %vm1202_vm0, %v2693_v20, 0.0  ;;  %v3554_v40 = vsel %vm1202_vm0, %v2693_v20, -inf  ;;  %v5210_v38 = vpop.f32.mrb[52].mxu0  ;;  %v3006_v48 = vsel %vm1202_vm0, %v2695_v34, 0.0  ;;  %v6336_v20 = vpop.f32.mrb[41].mxu1  ;;  %v3558_v42 = vsel %vm1202_vm0, %v2695_v34, -inf }
 0x152   : > { %v1829_v7 = vpop.f32.mrb[53].mxu0  ;;  %v1838_v31 = vadd.f32 %v6327_v28, %v5210_v38  ;;  %v3003_v55 = vadd.f32 %v3002_v2, %v3001_v41  ;;  %v3555_v51 = vmax.f32 %v3553_v18, %v3554_v40  ;;  %v6340_v38 = vmax.f32 %v3803_v3, %v3804_v47 }
 0x153   : > { %v1830_v45 = vadd.f32 %v6327_v28, %v1829_v7  ;;  %v5211_v14 = vpop.f32.mrb[54].mxu0  ;;  %v6342_v7 = vpop.f32.mrb[42].mxu1  ;;  %v6346_v2 = vadd.f32 %v6327_v28, %v6068_v33  ;;  %v2281_v40 = vadd.f32 %v6327_v28, %v6071_v35  ;;  %v3256_v35 = vsel %vm1202_vm0, %v2810_v30, 0.0 }
 0x154   : > { %v1841_v5 = vadd.f32 %v6327_v28, %v5211_v14  ;;  %v1832_v56 = vpop.f32.mrb[55].mxu0  ;;  %v3005_v17 = vadd.f32 %v3004_v13, %v3003_v55  ;;  %v3557_v59 = vmax.f32 %v3555_v51, %v3556_v61  ;;  %v6350_v41 = vpop.f32.mrb[43].mxu1  ;;  %v2698_v18 = vmax.f32 %v1838_v31, 0.0 }
 0x155   : > { %v2696_v16 = vmax.f32 %v1830_v45, 0.0  ;;  %v1833_v60 = vadd.f32 %v6327_v28, %v1832_v56  ;;  %v3808_v56 = vsel %vm1202_vm0, %v2810_v30, -inf }
 0x156   : > { %v3007_v47 = vadd.f32 %v3006_v48, %v3005_v17  ;;  %v3559_v13 = vmax.f32 %v3557_v59, %v3558_v42  ;;  %v2699_v61 = vmax.f32 %v1841_v5, 0.0  ;;  %v3012_v14 = vsel %vm1202_vm0, %v2698_v18, 0.0  ;;  %v6364_v17 = vpop.f32.mrb[44].mxu1 }
 0x157   : > { %v3008_v34 = vsel %vm1202_vm0, %v2696_v16, 0.0  ;;  %v3560_v45 = vsel %vm1202_vm0, %v2696_v16, -inf  ;;  %v2697_v3 = vmax.f32 %v1833_v60, 0.0  ;;  %v2811_v16 = vmax.f32 %v6346_v2, 0.0  ;;  %v6368_v2 = vpop.f32.mrb[45].mxu1 }
 0x158   : > { %v3009_v31 = vadd.f32 %v3008_v34, %v3007_v47  ;;  %v3561_v54 = vmax.f32 %v3559_v13, %v3560_v45  ;;  %v2809_v60 = vmax.f32 %v2281_v40, 0.0  ;;  %v3564_v59 = vsel %vm1202_vm0, %v2698_v18, -inf }
 0x159   : > { %v3010_v55 = vsel %vm1202_vm0, %v2697_v3, 0.0  ;;  %v3562_v33 = vsel %vm1202_vm0, %v2697_v3, -inf  ;;  %v5214_v51 = vpop.f32.mrb[56].mxu0  ;;  %v3014_v3 = vsel %vm1202_vm0, %v2699_v61, 0.0  ;;  %v3566_v39 = vsel %vm1202_vm0, %v2699_v61, -inf }
 0x15a   : > { %v1845_v32 = vpop.f32.mrb[57].mxu0  ;;  %v1854_v48 = vadd.f32 %v6327_v28, %v5214_v51  ;;  %v3011_v30 = vadd.f32 %v3010_v55, %v3009_v31  ;;  %v3563_v34 = vmax.f32 %v3561_v54, %v3562_v33  ;;  %v3254_v18 = vsel %vm1202_vm0, %v2809_v60, 0.0 }
 0x15b   : > { %v1846_v5 = vadd.f32 %v6327_v28, %v1845_v32  ;;  %v5215_v42 = vpop.f32.mrb[58].mxu0  ;;  %v3806_v51 = vsel %vm1202_vm0, %v2809_v60, -inf  ;;  %v6373_v32 = vpop.f32.mrb[46].mxu1  ;;  %v6378_v54 = vadd.f32 %v6327_v28, %v6100_v12  ;;  %v3255_v52 = vadd.f32 %v3254_v18, %v6321_v43 }
 0x15c   : > { %v1857_v45 = vadd.f32 %v6327_v28, %v5215_v42  ;;  %v1848_v47 = vpop.f32.mrb[59].mxu0  ;;  %v3013_v46 = vadd.f32 %v3012_v14, %v3011_v30  ;;  %v3565_v63 = vmax.f32 %v3563_v34, %v3564_v59  ;;  %v6380_v55 = vpop.f32.mrb[47].mxu1  ;;  %v2702_v33 = vmax.f32 %v1854_v48, 0.0 }
 0x15d   : > { %v2700_v40 = vmax.f32 %v1846_v5, 0.0  ;;  %v1849_v13 = vadd.f32 %v6327_v28, %v1848_v47  ;;  %v3807_v61 = vmax.f32 %v6340_v38, %v3806_v51  ;;  %v7727_v14 = vrot.slane %v6144_v22, 4 }
 0x15e   : > { %v3015_v47 = vadd.f32 %v3014_v3, %v3013_v46  ;;  %v3567_v60 = vmax.f32 %v3565_v63, %v3566_v39  ;;  %v2703_v12 = vmax.f32 %v1857_v45, 0.0  ;;  %v3258_v63 = vsel %vm1202_vm0, %v2811_v16, 0.0  ;;  %v6397_v45 = vpop.f32.mrb[48].mxu1 }
 0x15f   : > { %v3016_v31 = vsel %vm1202_vm0, %v2700_v40, 0.0  ;;  %v3568_v5 = vsel %vm1202_vm0, %v2700_v40, -inf  ;;  %v2701_v42 = vmax.f32 %v1849_v13, 0.0  ;;  %v6389_v59 = vadd.f32 %v7727_v14, %v6144_v22  ;;  %7728 = vst [vmem:[#allocation12_spill] sm:$0xff] %v6397_v45 }
 0x160   : > { %v3017_v19 = vadd.f32 %v3016_v31, %v3015_v47  ;;  %v3569_v40 = vmax.f32 %v3567_v60, %v3568_v5  ;;  %v3257_v39 = vadd.f32 %v3256_v35, %v3255_v52  ;;  %v3810_v22 = vsel %vm1202_vm0, %v2811_v16, -inf  ;;  %v6401_v47 = vpop.f32.mrb[49].mxu1 }
 0x161   : > { %v3018_v30 = vsel %vm1202_vm0, %v2701_v42, 0.0  ;;  %v3570_v48 = vsel %vm1202_vm0, %v2701_v42, -inf  ;;  %v5218_v34 = vpop.f32.mrb[60].mxu0  ;;  %v3809_v3 = vmax.f32 %v3807_v61, %v3808_v56  ;;  %v3020_v18 = vsel %vm1202_vm0, %v2702_v33, 0.0  ;;  %v6406_v16 = vpop.f32.mrb[50].mxu1 }
 0x162   : > { %v1861_v13 = vpop.f32.mrb[61].mxu0  ;;  %v1870_v46 = vadd.f32 %v6327_v28, %v5218_v34  ;;  %v3019_v51 = vadd.f32 %v3018_v30, %v3017_v19  ;;  %v3571_v42 = vmax.f32 %v3569_v40, %v3570_v48  ;;  %v2812_v5 = vmax.f32 %v6378_v54, 0.0  ;;  %7729 = vst [vmem:[#allocation13_spill] sm:$0xff] %v6406_v16  ;;  %v6410_v30 = vpop.f32.mrb[51].mxu1 }
 0x163   : > { %v1862_v43 = vadd.f32 %v6327_v28, %v1861_v13  ;;  %v5219_v38 = vpop.f32.mrb[62].mxu0  ;;  %v3572_v52 = vsel %vm1202_vm0, %v2702_v33, -inf  ;;  %v3022_v35 = vsel %vm1202_vm0, %v2703_v12, 0.0  ;;  %v3574_v56 = vsel %vm1202_vm0, %v2703_v12, -inf }
 0x164   : > { %v1864_v31 = vpop.f32.mrb[63].mxu0  ;;  %v3021_v61 = vadd.f32 %v3020_v18, %v3019_v51  ;;  %v3573_v34 = vmax.f32 %v3571_v42, %v3572_v52  ;;  %v1873_v19 = vadd.f32 %v6327_v28, %v5219_v38  ;;  %v2706_v54 = vmax.f32 %v1870_v46, 0.0 }
 0x165   : > { %v2704_v60 = vmax.f32 %v1862_v43, 0.0  ;;  %v1865_v14 = vadd.f32 %v6327_v28, %v1864_v31  ;;  %v3259_v45 = vadd.f32 %v3258_v63, %v3257_v39  ;;  %v3260_v31 = vsel %vm1202_vm0, %v2812_v5, 0.0 }
 0x166   : > { %v3023_v13 = vadd.f32 %v3022_v35, %v3021_v61  ;;  %v3575_v43 = vmax.f32 %v3573_v34, %v3574_v56  ;;  %v7730_v16 = vrot.slane %v6146_v25, 4  ;;  %v6424_v51 = vadd.f32 %v6327_v28, %v6096_v4  ;;  %v6431_v61 = vpop.f32.mrb[52].mxu1 }
 0x167   : > { %v3024_v48 = vsel %vm1202_vm0, %v2704_v60, 0.0  ;;  %v3576_v33 = vsel %vm1202_vm0, %v2704_v60, -inf  ;;  %v2705_v40 = vmax.f32 %v1865_v14, 0.0  ;;  %v2707_v35 = vmax.f32 %v1873_v19, 0.0  ;;  %7731 = vst [vmem:[#allocation14_spill] sm:$0xff] %v6431_v61 }
 0x168   : > { %v6418_v12 = vmax.f32 %v6146_v25, %v7730_v16  ;;  %v3025_v42 = vadd.f32 %v3024_v48, %v3023_v13  ;;  %v3577_v52 = vmax.f32 %v3575_v43, %v3576_v33  ;;  %v6426_v39 = vadd.f32 %v3260_v31, %v3259_v45 }
 0x169   : > { %v3026_v38 = vsel %vm1202_vm0, %v2705_v40, 0.0  ;;  %v3578_v18 = vsel %vm1202_vm0, %v2705_v40, -inf  ;;  %v5222_v46 = vpop.f32.mrb[64].mxu0  ;;  %v3811_v16 = vmax.f32 %v3809_v3, %v3810_v22  ;;  %v3812_v56 = vsel %vm1202_vm0, %v2812_v5, -inf  ;;  %v6435_v40 = vpop.f32.mrb[53].mxu1 }
 0x16a   : > { %v1877_v63 = vpop.f32.mrb[65].mxu0  ;;  %v1886_v60 = vadd.f32 %v6327_v28, %v5222_v46  ;;  %v3028_v34 = vsel %vm1202_vm0, %v2706_v54, 0.0  ;;  %v3580_v4 = vsel %vm1202_vm0, %v2706_v54, -inf  ;;  %v3027_v48 = vadd.f32 %v3026_v38, %v3025_v42  ;;  %7732 = vst [vmem:[#allocation15_spill] sm:$0xff] %v6435_v40  ;;  %v6441_v22 = vpop.f32.mrb[54].mxu1 }
 0x16b   : > { %v1878_v25 = vadd.f32 %v6327_v28, %v1877_v63  ;;  %v5223_v14 = vpop.f32.mrb[66].mxu0  ;;  %v3579_v33 = vmax.f32 %v3577_v52, %v3578_v18  ;;  %v6439_v31 = vmax.f32 %v3811_v16, %v3812_v56  ;;  %7733 = vst [vmem:[#allocation16_spill] sm:$0xff] %v6441_v22  ;;  %v2814_v46 = vmax.f32 %v6424_v51, 0.0  ;;  %v6446_v38 = vpop.f32.mrb[55].mxu1 }
 0x16c   : > { %v1880_v19 = vpop.f32.mrb[67].mxu0  ;;  %v1889_v13 = vadd.f32 %v6327_v28, %v5223_v14  ;;  %v3029_v3 = vadd.f32 %v3028_v34, %v3027_v48  ;;  %v2305_v54 = vadd.f32 %v6327_v28, %v6105_v1  ;;  %7734 = vst [vmem:[#allocation17_spill] sm:$0xff] %v6446_v38  ;;  %v3030_v18 = vsel %vm1202_vm0, %v2707_v35, 0.0 }
 0x16d   : > { %v2708_v45 = vmax.f32 %v1878_v25, 0.0  ;;  %v1881_v43 = vadd.f32 %v6327_v28, %v1880_v19  ;;  %v3581_v5 = vmax.f32 %v3579_v33, %v3580_v4  ;;  %v3582_v42 = vsel %vm1202_vm0, %v2707_v35, -inf }
 0x16e   : > { %v2710_v52 = vmax.f32 %v1886_v60, 0.0  ;;  %v3031_v25 = vadd.f32 %v3030_v18, %v3029_v3  ;;  %v2297_v56 = vadd.f32 %v6327_v28, %v6108_v24  ;;  %v2711_v34 = vmax.f32 %v1889_v13, 0.0  ;;  %v6463_v18 = vpop.f32.mrb[56].mxu1 }
 0x16f   : > { %v2709_v63 = vmax.f32 %v1881_v43, 0.0  ;;  %v6450_v14 = vmax.f32 %v3581_v5, %v3582_v42  ;;  %v3038_v16 = vsel %vm1202_vm0, %v2708_v45, 0.0  ;;  %v3590_v51 = vsel %vm1202_vm0, %v2708_v45, -inf  ;;  %7735 = vst [vmem:[#allocation18_spill] sm:$0xff] %v6463_v18 }
 0x170   : > { %v2965_v35 = vrot.slane %v6389_v59, 2  ;;  %v3517_v60 = vrot.slane %v6418_v12, 2  ;;  %v3041_v3 = vsel %vm1202_vm0, %v2710_v52, 0.0  ;;  %v3593_v5 = vsel %vm1202_vm0, %v2710_v52, -inf }
 0x171   : > { %v3039_v1 = vsel %vm1202_vm0, %v2709_v63, 0.0  ;;  %v3591_v4 = vsel %vm1202_vm0, %v2709_v63, -inf  ;;  %v5226_v48 = vpop.f32.mrb[68].mxu0  ;;  %v2813_v45 = vmax.f32 %v2297_v56, 0.0  ;;  %v3264_v38 = vsel %vm1202_vm0, %v2814_v46, 0.0 }
 0x172   : > { %v3040_v33 = vadd.f32 %v3039_v1, %v3038_v16  ;;  %v3592_v19 = vmax.f32 %v3590_v51, %v3591_v4  ;;  %v1893_v43 = vpop.f32.mrb[69].mxu0  ;;  %v1902_v22 = vadd.f32 %v6327_v28, %v5226_v48  ;;  %v6467_v16 = vpop.f32.mrb[57].mxu1  ;;  %v3043_v51 = vsel %vm1202_vm0, %v2711_v34, 0.0 }
 0x173   : > { %v1894_v24 = vadd.f32 %v6327_v28, %v1893_v43  ;;  %v5227_v13 = vpop.f32.mrb[70].mxu0  ;;  %7736 = vst [vmem:[#allocation19_spill] sm:$0xff] %v6467_v16  ;;  %v3595_v1 = vsel %vm1202_vm0, %v2711_v34, -inf  ;;  %v2815_v52 = vmax.f32 %v2305_v54, 0.0  ;;  %v6471_v43 = vpop.f32.mrb[58].mxu1  ;;  %v3032_v48 = vrot.slane %v3031_v25, 4 }
 0x174   : > { %v3042_v42 = vadd.f32 %v3041_v3, %v3040_v33  ;;  %v3594_v63 = vmax.f32 %v3592_v19, %v3593_v5  ;;  %v1896_v40 = vpop.f32.mrb[71].mxu0  ;;  %7737 = vst [vmem:[#allocation20_spill] sm:$0xff] %v6471_v43  ;;  %v3262_v33 = vsel %vm1202_vm0, %v2813_v45, 0.0  ;;  %v3814_v19 = vsel %vm1202_vm0, %v2813_v45, -inf  ;;  %v6475_v3 = vpop.f32.mrb[59].mxu1 }
 0x175   : > { %v2712_v4 = vmax.f32 %v1894_v24, 0.0  ;;  %7738 = vst [vmem:[#allocation21_spill] sm:$0xff] %v6475_v3  ;;  %v3816_v5 = vsel %vm1202_vm0, %v2814_v46, -inf  ;;  %v2714_v34 = vmax.f32 %v1902_v22, 0.0  ;;  %v1905_v45 = vadd.f32 %v6327_v28, %v5227_v13 }
 0x176   : > { %v3044_v56 = vadd.f32 %v3043_v51, %v3042_v42  ;;  %v3596_v61 = vmax.f32 %v3594_v63, %v3595_v1  ;;  %v2318_v42 = vadd.f32 %v6327_v28, %v6132_v0  ;;  %v3263_v63 = vadd.f32 %v3262_v33, %v6426_v39 }
 0x177   : > { %v3045_v16 = vsel %vm1202_vm0, %v2712_v4, 0.0  ;;  %v3597_v18 = vsel %vm1202_vm0, %v2712_v4, -inf  ;;  %v3815_v51 = vmax.f32 %v6439_v31, %v3814_v19  ;;  %v1897_v1 = vadd.f32 %v6327_v28, %v1896_v40  ;;  %v6496_v40 = vpop.f32.mrb[60].mxu1 }
 0x178   : > { %v3046_v54 = vadd.f32 %v3045_v16, %v3044_v56  ;;  %v3598_v24 = vmax.f32 %v3596_v61, %v3597_v18  ;;  %v6487_v46 = vadd.f32 %v2965_v35, %v6389_v59  ;;  %v6490_v4 = vmax.f32 %v6418_v12, %v3517_v60  ;;  %7739 = vst [vmem:[#allocation22_spill] sm:$0xff] %v6496_v40  ;;  %v6503_v33 = vpop.f32.mrb[61].mxu1 }
 0x179   : > { %v5230_v3 = vpop.f32.mrb[72].mxu0  ;;  %v3266_v61 = vsel %vm1202_vm0, %v2815_v52, 0.0  ;;  %v2310_v0 = vadd.f32 %v6327_v28, %v6136_v11  ;;  %v3818_v39 = vsel %vm1202_vm0, %v2815_v52, -inf  ;;  %v3265_v31 = vadd.f32 %v3264_v38, %v3263_v63  ;;  %7740 = vst [vmem:[#allocation23_spill] sm:$0xff] %v6503_v33 }
 0x17a   : > { %v1909_v22 = vpop.f32.mrb[73].mxu0  ;;  %v3817_v18 = vmax.f32 %v3815_v51, %v3816_v5  ;;  %v2713_v13 = vmax.f32 %v1897_v1, 0.0  ;;  %v6498_v56 = vadd.f32 %v3032_v48, %v3031_v25  ;;  %v3049_v12 = vsel %vm1202_vm0, %v2714_v34, 0.0  ;;  %v6507_v5 = vpop.f32.mrb[62].mxu1 }
 0x17b   : > { %v5231_v16 = vpop.f32.mrb[74].mxu0  ;;  %v3601_v35 = vsel %vm1202_vm0, %v2714_v34, -inf  ;;  %v2715_v11 = vmax.f32 %v1905_v45, 0.0  ;;  %v2818_v19 = vmax.f32 %v2318_v42, 0.0  ;;  %v2816_v48 = vmax.f32 %v2310_v0, 0.0  ;;  %v6509_v1 = vpop.f32.mrb[63].mxu1 }
 0x17c   : > { %v1912_v60 = vpop.f32.mrb[75].mxu0  ;;  %v3047_v52 = vsel %vm1202_vm0, %v2713_v13, 0.0  ;;  %v3599_v38 = vsel %vm1202_vm0, %v2713_v13, -inf  ;;  %v3267_v51 = vadd.f32 %v3266_v61, %v3265_v31  ;;  %v3819_v59 = vmax.f32 %v3817_v18, %v3818_v39 }
 0x17d   : > { %v3048_v63 = vadd.f32 %v3047_v52, %v3046_v54  ;;  %v3600_v25 = vmax.f32 %v3598_v24, %v3599_v38  ;;  %v1918_v34 = vadd.f32 %v6327_v28, %v5230_v3  ;;  %v2321_v33 = vadd.f32 %v6327_v28, %v6142_v21 }
 0x17e   : > { %v1910_v45 = vadd.f32 %v6327_v28, %v1909_v22  ;;  %v3268_v42 = vsel %vm1202_vm0, %v2816_v48, 0.0  ;;  %v3820_v13 = vsel %vm1202_vm0, %v2816_v48, -inf  ;;  %v3051_v54 = vsel %vm1202_vm0, %v2715_v11, 0.0 }
 0x17f   : > { %v3050_v40 = vadd.f32 %v3049_v12, %v3048_v63  ;;  %v3602_v43 = vmax.f32 %v3600_v25, %v3601_v35  ;;  %v3603_v24 = vsel %vm1202_vm0, %v2715_v11, -inf  ;;  %v3269_v61 = vadd.f32 %v3268_v42, %v3267_v51  ;;  %v6523_v25 = vpop.f32.mrb[64].mxu1 }
 0x180   : > { %v3821_v0 = vmax.f32 %v3819_v59, %v3820_v13  ;;  %v2716_v31 = vmax.f32 %v1910_v45, 0.0  ;;  %v2313_v21 = vadd.f32 %v6327_v28, %v6149_v26  ;;  %v3272_v12 = vsel %vm1202_vm0, %v2818_v19, 0.0  ;;  %7741 = vst [vmem:[#allocation24_spill] sm:$0xff] %v6523_v25  ;;  %v6528_v51 = vpop.f32.mrb[65].mxu1 }
 0x181   : > { %v5234_v39 = vpop.f32.mrb[76].mxu0  ;;  %v3052_v3 = vadd.f32 %v3051_v54, %v3050_v40  ;;  %v3604_v18 = vmax.f32 %v3602_v43, %v3603_v24  ;;  %v3824_v35 = vsel %vm1202_vm0, %v2818_v19, -inf  ;;  %v2718_v52 = vmax.f32 %v1918_v34, 0.0  ;;  %7742 = vst [vmem:[#allocation25_spill] sm:$0xff] %v6528_v51  ;;  %v6533_v19 = vpop.f32.mrb[66].mxu1 }
 0x182   : > { %v1925_v22 = vpop.f32.mrb[77].mxu0  ;;  %v2819_v38 = vmax.f32 %v2321_v33, 0.0  ;;  %v3053_v11 = vsel %vm1202_vm0, %v2716_v31, 0.0  ;;  %v3605_v59 = vsel %vm1202_vm0, %v2716_v31, -inf  ;;  %v2817_v48 = vmax.f32 %v2313_v21, 0.0  ;;  %7743 = vst [vmem:[#allocation26_spill] sm:$0xff] %v6533_v19 }
 0x183   : > { %v5235_v63 = vpop.f32.mrb[78].mxu0  ;;  %v1921_v43 = vadd.f32 %v6327_v28, %v5231_v16  ;;  %v3054_v26 = vadd.f32 %v3053_v11, %v3052_v3  ;;  %v3606_v45 = vmax.f32 %v3604_v18, %v3605_v59  ;;  %v1913_v42 = vadd.f32 %v6327_v28, %v1912_v60  ;;  %v6539_v24 = vpop.f32.mrb[67].mxu1 }
 0x184   : > { %v1928_v40 = vpop.f32.mrb[79].mxu0  ;;  %v2334_v33 = vadd.f32 %v6327_v28, %v6174_v58  ;;  %v3270_v34 = vsel %vm1202_vm0, %v2817_v48, 0.0  ;;  %v3822_v13 = vsel %vm1202_vm0, %v2817_v48, -inf  ;;  %v2326_v16 = vadd.f32 %v6327_v28, %v6183_v10  ;;  %7744 = vst [vmem:[#allocation27_spill] sm:$0xff] %v6539_v24 }
 0x185   : > { %v2719_v54 = vmax.f32 %v1921_v43, 0.0  ;;  %v3057_v31 = vsel %vm1202_vm0, %v2718_v52, 0.0  ;;  %v3271_v3 = vadd.f32 %v3270_v34, %v3269_v61  ;;  %v3823_v18 = vmax.f32 %v3821_v0, %v3822_v13 }
 0x186   : > { %v2717_v60 = vmax.f32 %v1913_v42, 0.0  ;;  %v3609_v21 = vsel %vm1202_vm0, %v2718_v52, -inf  ;;  %v3274_v58 = vsel %vm1202_vm0, %v2819_v38, 0.0  ;;  %v3826_v11 = vsel %vm1202_vm0, %v2819_v38, -inf }
 0x187   : > { %v2820_v59 = vmax.f32 %v2326_v16, 0.0  ;;  %v3273_v19 = vadd.f32 %v3272_v12, %v3271_v3  ;;  %v3825_v48 = vmax.f32 %v3823_v18, %v3824_v35  ;;  %v3059_v24 = vsel %vm1202_vm0, %v2719_v54, 0.0 }
 0x188   : > { %v3055_v43 = vsel %vm1202_vm0, %v2717_v60, 0.0  ;;  %v3607_v10 = vsel %vm1202_vm0, %v2717_v60, -inf  ;;  %v2822_v0 = vmax.f32 %v2334_v33, 0.0  ;;  %v1934_v3 = vadd.f32 %v6327_v28, %v5234_v39 }
 0x189   : > { %v5238_v25 = vpop.f32.mrb[80].mxu0  ;;  %v3056_v51 = vadd.f32 %v3055_v43, %v3054_v26  ;;  %v3608_v61 = vmax.f32 %v3606_v45, %v3607_v10  ;;  %v3275_v52 = vadd.f32 %v3274_v58, %v3273_v19  ;;  %v3276_v34 = vsel %vm1202_vm0, %v2820_v59, 0.0 }
 0x18a   : > { %v6548_v42 = vpop.f32.mrb[81].mxu0  ;;  %v3827_v13 = vmax.f32 %v3825_v48, %v3826_v11  ;;  %v3828_v38 = vsel %vm1202_vm0, %v2820_v59, -inf  ;;  %v2337_v18 = vadd.f32 %v6327_v28, %v6188_v36  ;;  %v1926_v19 = vadd.f32 %v6327_v28, %v1925_v22  ;;  %v6565_v48 = vpop.f32.mrb[68].mxu1 }
 0x18b   : > { %v6552_v12 = vpop.f32.mrb[82].mxu0  ;;  %v3058_v35 = vadd.f32 %v3057_v31, %v3056_v51  ;;  %v3610_v16 = vmax.f32 %v3608_v61, %v3609_v21  ;;  %v3277_v45 = vadd.f32 %v3276_v34, %v3275_v52  ;;  %v2329_v60 = vadd.f32 %v6327_v28, %v6192_v44 }
 0x18c   : > { %v6557_v26 = vpop.f32.mrb[83].mxu0  ;;  %v3829_v33 = vmax.f32 %v3827_v13, %v3828_v38  ;;  %v3611_v58 = vsel %vm1202_vm0, %v2719_v54, -inf  ;;  %v3280_v11 = vsel %vm1202_vm0, %v2822_v0, 0.0  ;;  %v3832_v51 = vsel %vm1202_vm0, %v2822_v0, -inf  ;;  %v6571_v54 = vpop.f32.mrb[69].mxu1 }
 0x18d   : > { %v3060_v31 = vadd.f32 %v3059_v24, %v3058_v35  ;;  %v2823_v39 = vmax.f32 %v2337_v18, 0.0  ;;  %v2720_v21 = vmax.f32 %v1926_v19, 0.0  ;;  %v3612_v59 = vmax.f32 %v3610_v16, %v3611_v58  ;;  %v6579_v13 = vpop.f32.mrb[70].mxu1 }
 0x18e   : > { %v2821_v36 = vmax.f32 %v2329_v60, 0.0  ;;  %v2722_v43 = vmax.f32 %v1934_v3, 0.0  ;;  %v1937_v10 = vadd.f32 %v6327_v28, %v5235_v63  ;;  %v1929_v22 = vadd.f32 %v6327_v28, %v1928_v40  ;;  %7745 = vst [vmem:[#allocation28_spill] sm:$0xff] %v6579_v13 }
 0x18f   : > { %v2350_v44 = vadd.f32 %v6327_v28, %v6231_v6  ;;  %v3061_v61 = vsel %vm1202_vm0, %v2720_v21, 0.0  ;;  %v3613_v24 = vsel %vm1202_vm0, %v2720_v21, -inf  ;;  %v6583_v6 = vpop.f32.mrb[71].mxu1  ;;  %v7747_v3 = vrot.slane %v6450_v14, 4 }
 0x190   : > { %v3278_v0 = vsel %vm1202_vm0, %v2821_v36, 0.0  ;;  %v3830_v52 = vsel %vm1202_vm0, %v2821_v36, -inf  ;;  %v3062_v63 = vadd.f32 %v3061_v61, %v3060_v31  ;;  %v3614_v38 = vmax.f32 %v3612_v59, %v3613_v24  ;;  %7746 = vst [vmem:[#allocation29_spill] sm:$0xff] %v6583_v6 }
 0x191   : > { %v6577_v34 = vpop.f32.mrb[84].mxu0  ;;  %v3279_v40 = vadd.f32 %v3278_v0, %v3277_v45  ;;  %v3831_v35 = vmax.f32 %v3829_v33, %v3830_v52  ;;  %v6588_v18 = vmax.f32 %v6450_v14, %v7747_v3  ;;  %v3282_v19 = vsel %vm1202_vm0, %v2823_v39, 0.0 }
 0x192   : > { %v6581_v16 = vpop.f32.mrb[85].mxu0  ;;  %v2721_v60 = vmax.f32 %v1929_v22, 0.0  ;;  %v2342_v58 = vadd.f32 %v6327_v28, %v6234_v62  ;;  %v3834_v45 = vsel %vm1202_vm0, %v2823_v39, -inf  ;;  %v1950_v59 = vadd.f32 %v6327_v28, %v5238_v25 }
 0x193   : > { %v6593_v21 = vpop.f32.mrb[86].mxu0  ;;  %v3281_v33 = vadd.f32 %v3280_v11, %v3279_v40  ;;  %v3833_v31 = vmax.f32 %v3831_v35, %v3832_v51  ;;  %v3065_v61 = vsel %vm1202_vm0, %v2722_v43, 0.0  ;;  %v2723_v14 = vmax.f32 %v1937_v10, 0.0 }
 0x194   : > { %v6597_v36 = vpop.f32.mrb[87].mxu0  ;;  %v3063_v24 = vsel %vm1202_vm0, %v2721_v60, 0.0  ;;  %v3615_v22 = vsel %vm1202_vm0, %v2721_v60, -inf  ;;  %v3617_v0 = vsel %vm1202_vm0, %v2722_v43, -inf  ;;  %v2826_v3 = vmax.f32 %v2350_v44, 0.0 }
 0x195   : > { %v3064_v62 = vadd.f32 %v3063_v24, %v3062_v63  ;;  %v3616_v52 = vmax.f32 %v3614_v38, %v3615_v22  ;;  %v2824_v6 = vmax.f32 %v2342_v58, 0.0  ;;  %v3283_v39 = vadd.f32 %v3282_v19, %v3281_v33 }
 0x196   : > { %v3835_v11 = vmax.f32 %v3833_v31, %v3834_v45  ;;  %v2353_v25 = vadd.f32 %v6327_v28, %v6241_v8  ;;  %v2726_v35 = vmax.f32 %v1950_v59, 0.0  ;;  %v1942_v10 = vadd.f32 %v6327_v28, %v6548_v42 }
 0x197   : > { %v3066_v51 = vadd.f32 %v3065_v61, %v3064_v62  ;;  %v3618_v40 = vmax.f32 %v3616_v52, %v3617_v0  ;;  %v3067_v13 = vsel %vm1202_vm0, %v2723_v14, 0.0  ;;  %v3619_v60 = vsel %vm1202_vm0, %v2723_v14, -inf  ;;  %v6621_v14 = vpop.f32.mrb[72].mxu1 }
 0x198   : > { %v3284_v43 = vsel %vm1202_vm0, %v2824_v6, 0.0  ;;  %v3836_v44 = vsel %vm1202_vm0, %v2824_v6, -inf  ;;  %v3288_v38 = vsel %vm1202_vm0, %v2826_v3, 0.0  ;;  %v3840_v8 = vsel %vm1202_vm0, %v2826_v3, -inf }
 0x199   : > { %v6611_v63 = vpop.f32.mrb[88].mxu0  ;;  %v3285_v19 = vadd.f32 %v3284_v43, %v3283_v39  ;;  %v3837_v58 = vmax.f32 %v3835_v11, %v3836_v44  ;;  %v2724_v33 = vmax.f32 %v1942_v10, 0.0  ;;  %v3068_v42 = vadd.f32 %v3067_v13, %v3066_v51  ;;  %v6630_v13 = vpop.f32.mrb[73].mxu1 }
 0x19a   : > { %v6615_v45 = vpop.f32.mrb[89].mxu0  ;;  %v3620_v31 = vmax.f32 %v3618_v40, %v3619_v60  ;;  %v2345_v59 = vadd.f32 %v6327_v28, %v6246_v49  ;;  %v3073_v6 = vsel %vm1202_vm0, %v2726_v35, 0.0  ;;  %v2827_v24 = vmax.f32 %v2353_v25, 0.0  ;;  %7748 = vst [vmem:[#allocation30_spill] sm:$0xff] %v6630_v13  ;;  %v6636_v11 = vpop.f32.mrb[74].mxu1 }
 0x19b   : > { %v6619_v61 = vpop.f32.mrb[90].mxu0  ;;  %v1945_v22 = vadd.f32 %v6327_v28, %v6557_v26  ;;  %v2358_v0 = vadd.f32 %v6327_v28, %v6272_v53  ;;  %v3069_v52 = vsel %vm1202_vm0, %v2724_v33, 0.0  ;;  %v3621_v49 = vsel %vm1202_vm0, %v2724_v33, -inf  ;;  %7749 = vst [vmem:[#allocation31_spill] sm:$0xff] %v6636_v11  ;;  %v6639_v53 = vpop.f32.mrb[75].mxu1 }
 0x19c   : > { %v6628_v62 = vpop.f32.mrb[91].mxu0  ;;  %v2825_v3 = vmax.f32 %v2345_v59, 0.0  ;;  %v1953_v39 = vadd.f32 %v6327_v28, %v6552_v12  ;;  %v3625_v25 = vsel %vm1202_vm0, %v2726_v35, -inf  ;;  %v3070_v26 = vadd.f32 %v3069_v52, %v3068_v42  ;;  %7750 = vst [vmem:[#allocation32_spill] sm:$0xff] %v6639_v53 }
 0x19d   : > { %v3622_v51 = vmax.f32 %v3620_v31, %v3621_v49  ;;  %v2725_v40 = vmax.f32 %v1945_v22, 0.0  ;;  %v2366_v43 = vadd.f32 %v6327_v28, %v6265_v57  ;;  %v2828_v44 = vmax.f32 %v2358_v0, 0.0 }
 0x19e   : > { %v3286_v10 = vsel %vm1202_vm0, %v2825_v3, 0.0  ;;  %v3838_v60 = vsel %vm1202_vm0, %v2825_v3, -inf  ;;  %v3290_v33 = vsel %vm1202_vm0, %v2827_v24, 0.0  ;;  %v3842_v12 = vsel %vm1202_vm0, %v2827_v24, -inf }
 0x19f   : > { %v3287_v59 = vadd.f32 %v3286_v10, %v3285_v19  ;;  %v3839_v11 = vmax.f32 %v3837_v58, %v3838_v60  ;;  %v2727_v35 = vmax.f32 %v1953_v39, 0.0  ;;  %v3071_v42 = vsel %vm1202_vm0, %v2725_v40, 0.0 }
 0x1a0   : > { %v3623_v31 = vsel %vm1202_vm0, %v2725_v40, -inf  ;;  %v1966_v22 = vadd.f32 %v6327_v28, %v6577_v34  ;;  %v3072_v57 = vadd.f32 %v3071_v42, %v3070_v26  ;;  %v2830_v13 = vmax.f32 %v2366_v43, 0.0 }
 0x1a1   : > { %v6651_v52 = vpop.f32.mrb[92].mxu0  ;;  %v3289_v49 = vadd.f32 %v3288_v38, %v3287_v59  ;;  %v3841_v3 = vmax.f32 %v3839_v11, %v3840_v8  ;;  %v3624_v0 = vmax.f32 %v3622_v51, %v3623_v31  ;;  %v3292_v19 = vsel %vm1202_vm0, %v2828_v44, 0.0 }
 0x1a2   : > { %v6653_v53 = vpop.f32.mrb[93].mxu0  ;;  %v3844_v58 = vsel %vm1202_vm0, %v2828_v44, -inf  ;;  %v2369_v24 = vadd.f32 %v6327_v28, %v6276_v27  ;;  %v3074_v40 = vadd.f32 %v3073_v6, %v3072_v57  ;;  %v3075_v8 = vsel %vm1202_vm0, %v2727_v35, 0.0 }
 0x1a3   : > { %v6659_v39 = vpop.f32.mrb[94].mxu0  ;;  %v3626_v34 = vmax.f32 %v3624_v0, %v3625_v25  ;;  %v3291_v10 = vadd.f32 %v3290_v33, %v3289_v49  ;;  %v3843_v60 = vmax.f32 %v3841_v3, %v3842_v12  ;;  %v3627_v11 = vsel %vm1202_vm0, %v2727_v35, -inf  ;;  %v6671_v12 = vpop.f32.mrb[76].mxu1 }
 0x1a4   : > { %v6661_v38 = vpop.f32.mrb[95].mxu0  ;;  %v2730_v26 = vmax.f32 %v1966_v22, 0.0  ;;  %v1958_v51 = vadd.f32 %v6327_v28, %v6581_v16  ;;  %v3076_v59 = vadd.f32 %v3075_v8, %v3074_v40  ;;  %v3296_v6 = vsel %vm1202_vm0, %v2830_v13, 0.0  ;;  %v6678_v49 = vpop.f32.mrb[77].mxu1 }
 0x1a5   : > { %v3293_v43 = vadd.f32 %v3292_v19, %v3291_v10  ;;  %v3845_v44 = vmax.f32 %v3843_v60, %v3844_v58  ;;  %v3628_v27 = vmax.f32 %v3626_v34, %v3627_v11  ;;  %v2361_v33 = vadd.f32 %v6327_v28, %v6282_v29  ;;  %7751 = vst [vmem:[#allocation33_spill] sm:$0xff] %v6678_v49 }
 0x1a6   : > { %v2728_v25 = vmax.f32 %v1958_v51, 0.0  ;;  %v3848_v35 = vsel %vm1202_vm0, %v2830_v13, -inf  ;;  %v2831_v31 = vmax.f32 %v2369_v24, 0.0  ;;  %v1961_v16 = vadd.f32 %v6327_v28, %v6597_v36 }
 0x1a7   : > { %v2374_v22 = vadd.f32 %v6327_v28, %v6302_v37  ;;  %v2829_v0 = vmax.f32 %v2361_v33, 0.0  ;;  %v1969_v29 = vadd.f32 %v6327_v28, %v6593_v21  ;;  %v3081_v13 = vsel %vm1202_vm0, %v2730_v26, 0.0  ;;  %v6695_v21 = vpop.f32.mrb[78].mxu1 }
 0x1a8   : > { %v3077_v3 = vsel %vm1202_vm0, %v2728_v25, 0.0  ;;  %v3629_v57 = vsel %vm1202_vm0, %v2728_v25, -inf  ;;  %v2729_v36 = vmax.f32 %v1961_v16, 0.0  ;;  %v2382_v10 = vadd.f32 %v6327_v28, %v6298_v23  ;;  %7752 = vst [vmem:[#allocation34_spill] sm:$0xff] %v6695_v21  ;;  %v6701_v33 = vpop.f32.mrb[79].mxu1 }
 0x1a9   : > { %v6684_v19 = vpop.f32.mrb[96].mxu0  ;;  %v3078_v58 = vadd.f32 %v3077_v3, %v3076_v59  ;;  %v3630_v24 = vmax.f32 %v3628_v27, %v3629_v57  ;;  %v3294_v37 = vsel %vm1202_vm0, %v2829_v0, 0.0  ;;  %v3846_v34 = vsel %vm1202_vm0, %v2829_v0, -inf  ;;  %7753 = vst [vmem:[#allocation35_spill] sm:$0xff] %v6701_v33 }
 0x1aa   : > { %v6687_v40 = vpop.f32.mrb[97].mxu0  ;;  %v2832_v60 = vmax.f32 %v2374_v22, 0.0  ;;  %v3633_v11 = vsel %vm1202_vm0, %v2730_v26, -inf  ;;  %v3298_v51 = vsel %vm1202_vm0, %v2831_v31, 0.0  ;;  %v3295_v59 = vadd.f32 %v3294_v37, %v3293_v43 }
 0x1ab   : > { %v6693_v8 = vpop.f32.mrb[98].mxu0  ;;  %v3847_v27 = vmax.f32 %v3845_v44, %v3846_v34  ;;  %v3850_v16 = vsel %vm1202_vm0, %v2831_v31, -inf  ;;  %v2731_v3 = vmax.f32 %v1969_v29, 0.0  ;;  %v3079_v23 = vsel %vm1202_vm0, %v2729_v36, 0.0 }
 0x1ac   : > { %v6699_v25 = vpop.f32.mrb[99].mxu0  ;;  %v3631_v22 = vsel %vm1202_vm0, %v2729_v36, -inf  ;;  %v3297_v57 = vadd.f32 %v3296_v6, %v3295_v59  ;;  %v3080_v42 = vadd.f32 %v3079_v23, %v3078_v58  ;;  %v2834_v26 = vmax.f32 %v2382_v10, 0.0 }
 0x1ad   : > { %v3849_v0 = vmax.f32 %v3847_v27, %v3848_v35  ;;  %v3632_v21 = vmax.f32 %v3630_v24, %v3631_v22  ;;  %v3300_v49 = vsel %vm1202_vm0, %v2832_v60, 0.0  ;;  %v3852_v43 = vsel %vm1202_vm0, %v2832_v60, -inf }
 0x1ae   : > { %v2385_v44 = vadd.f32 %v6327_v28, %v6307_v9  ;;  %v3082_v37 = vadd.f32 %v3081_v13, %v3080_v42  ;;  %v3299_v31 = vadd.f32 %v3298_v51, %v3297_v57  ;;  %v3083_v36 = vsel %vm1202_vm0, %v2731_v3, 0.0 }
 0x1af   : > { %v3634_v34 = vmax.f32 %v3632_v21, %v3633_v11  ;;  %v3851_v29 = vmax.f32 %v3849_v0, %v3850_v16  ;;  %v3635_v6 = vsel %vm1202_vm0, %v2731_v3, -inf  ;;  %v1974_v35 = vadd.f32 %v6327_v28, %v6615_v45  ;;  %v6726_v45 = vpop.f32.mrb[80].mxu1 }
 0x1b0   : > { %v3301_v24 = vadd.f32 %v3300_v49, %v3299_v31  ;;  %v3084_v60 = vadd.f32 %v3083_v36, %v3082_v37  ;;  %v3586_v42 = vrot.slane %v6588_v18, 2  ;;  %v1982_v13 = vadd.f32 %v6327_v28, %v6611_v63  ;;  %v6738_v22 = vpop.f32.mrb[81].mxu1 }
 0x1b1   : > { %v6715_v58 = vpop.f32.mrb[100].mxu0  ;;  %v3853_v10 = vmax.f32 %v3851_v29, %v3852_v43  ;;  %v3636_v59 = vmax.f32 %v3634_v34, %v3635_v6  ;;  %v2732_v21 = vmax.f32 %v1974_v35, 0.0  ;;  %v2377_v11 = vadd.f32 %v6327_v28, %v6310_v50  ;;  %v6749_v6 = vpop.f32.mrb[82].mxu1 }
 0x1b2   : > { %v6717_v9 = vpop.f32.mrb[101].mxu0  ;;  %v7754_v49 = vrot.slane %v6498_v56, 2  ;;  %v3304_v16 = vsel %vm1202_vm0, %v2834_v26, 0.0  ;;  %v2835_v3 = vmax.f32 %v2385_v44, 0.0  ;;  %v1977_v23 = vadd.f32 %v6327_v28, %v6628_v62  ;;  %7755 = vst [vmem:[#allocation36_spill] sm:$0xff] %v6749_v6 }
 0x1b3   : > { %v6724_v51 = vpop.f32.mrb[102].mxu0  ;;  %v3085_v50 = vsel %vm1202_vm0, %v2732_v21, 0.0  ;;  %v3637_v57 = vsel %vm1202_vm0, %v2732_v21, -inf  ;;  %v2833_v0 = vmax.f32 %v2377_v11, 0.0  ;;  %v1985_v43 = vadd.f32 %v6327_v28, %v6619_v61 }
 0x1b4   : > { %v6731_v27 = vadd.f32 %v7754_v49, %v6498_v56  ;;  %v6736_v63 = vpop.f32.mrb[103].mxu0  ;;  %v3856_v56 = vsel %vm1202_vm0, %v2834_v26, -inf  ;;  %v3086_v37 = vadd.f32 %v3085_v50, %v3084_v60  ;;  %v3638_v34 = vmax.f32 %v3636_v59, %v3637_v57  ;;  %v6753_v26 = vpop.f32.mrb[83].mxu1 }
 0x1b5   : > { %v2733_v44 = vmax.f32 %v1977_v23, 0.0  ;;  %v2734_v31 = vmax.f32 %v1982_v13, 0.0  ;;  %v3302_v62 = vsel %vm1202_vm0, %v2833_v0, 0.0  ;;  %v3854_v29 = vsel %vm1202_vm0, %v2833_v0, -inf  ;;  %7756 = vst [vmem:[#allocation37_spill] sm:$0xff] %v6753_v26 }
 0x1b6   : > { %v2390_v36 = vadd.f32 %v6327_v28, %v6336_v20  ;;  %v3306_v35 = vsel %vm1202_vm0, %v2835_v3, 0.0  ;;  %v3858_v21 = vsel %vm1202_vm0, %v2835_v3, -inf  ;;  %v3303_v61 = vadd.f32 %v3302_v62, %v3301_v24  ;;  %v5556_v24 = vld [vmem:[%s7706_s3] ss:$16 sps:$4 sm:$0xff]  }
 0x1b7   : > { %v3855_v11 = vmax.f32 %v3853_v10, %v3854_v29  ;;  %v2735_v60 = vmax.f32 %v1985_v43, 0.0  ;;  %v3087_v59 = vsel %vm1202_vm0, %v2733_v44, 0.0  ;;  %v3639_v13 = vsel %vm1202_vm0, %v2733_v44, -inf  ;;  %v5558_v10 = vld [vmem:[%s7706_s3 + $0x4] ss:$16 sps:$4 sm:$0xff]  }
 0x1b8   : > { %v2398_v49 = vadd.f32 %v6327_v28, %v6332_v15  ;;  %v3305_v20 = vadd.f32 %v3304_v16, %v3303_v61  ;;  %v3088_v57 = vadd.f32 %v3087_v59, %v3086_v37  ;;  %v3640_v0 = vmax.f32 %v3638_v34, %v3639_v13  ;;  %v6774_v16 = vld [vmem:[%s7705_s2] ss:$0 sm:$0xff]  ;;  %4169 = vmatprep.subr.bf16.mxu1 %v5558_v10 }
 0x1b9   : > { %v6759_v23 = vpop.f32.mrb[104].mxu0  ;;  %v3857_v50 = vmax.f32 %v3855_v11, %v3856_v56  ;;  %v3089_v3 = vsel %vm1202_vm0, %v2734_v31, 0.0  ;;  %v3641_v28 = vsel %vm1202_vm0, %v2734_v31, -inf  ;;  %v2836_v15 = vmax.f32 %v2390_v36, 0.0  ;;  %4170 = vmatpush1.bf16.msra.mxu1 %v5556_v24 }
 0x1ba   : > { %v6761_v33 = vpop.f32.mrb[105].mxu0  ;;  %v2401_v43 = vadd.f32 %v6774_v16, %v6342_v7  ;;  %v6780_v37 = vadd.f32 %v3306_v35, %v3305_v20  ;;  %v3090_v44 = vadd.f32 %v3089_v3, %v3088_v57  ;;  %v3642_v62 = vmax.f32 %v3640_v0, %v3641_v28 }
 0x1bb   : > { %v6778_v56 = vpop.f32.mrb[106].mxu0  ;;  %v6782_v34 = vmax.f32 %v3857_v50, %v3858_v21  ;;  %v3091_v36 = vsel %vm1202_vm0, %v2735_v60, 0.0  ;;  %v3643_v61 = vsel %vm1202_vm0, %v2735_v60, -inf  ;;  %v1990_v7 = vadd.f32 %v6774_v16, %v6653_v53 }
 0x1bc   : > { %7757 = vst [vmem:[#allocation38_spill] sm:$0xff] %v6780_v37  ;;  %v6784_v29 = vpop.f32.mrb[107].mxu0  ;;  %v6792_v35 = vmax.f32 %v6588_v18, %v3586_v42  ;;  %v2838_v21 = vmax.f32 %v2398_v49, 0.0  ;;  %v3092_v11 = vadd.f32 %v3091_v36, %v3090_v44  ;;  %v3644_v59 = vmax.f32 %v3642_v62, %v3643_v61  ;;  %v6813_v44 = vpop.f32.mrb[84].mxu1 }
 0x1bd   : > { %v1998_v20 = vadd.f32 %v6774_v16, %v6651_v52  ;;  %v2736_v50 = vmax.f32 %v1990_v7, 0.0  ;;  %v2393_v57 = vadd.f32 %v6774_v16, %v6350_v41  ;;  %v3314_v60 = vsel %vm1202_vm0, %v2836_v15, 0.0  ;;  %7758 = vst [vmem:[#allocation39_spill] sm:$0xff] %v6813_v44 }
 0x1be   : > { %v3866_v53 = vsel %vm1202_vm0, %v2836_v15, -inf  ;;  %v2839_v0 = vmax.f32 %v2401_v43, 0.0  ;;  %v1993_v18 = vadd.f32 %v6774_v16, %v6661_v38  ;;  %v2001_v52 = vadd.f32 %v6774_v16, %v6659_v39  ;;  %v6819_v39 = vpop.f32.mrb[85].mxu1 }
 0x1bf   : > { %v3093_v42 = vsel %vm1202_vm0, %v2736_v50, 0.0  ;;  %v3645_v49 = vsel %vm1202_vm0, %v2736_v50, -inf  ;;  %v2837_v24 = vmax.f32 %v2393_v57, 0.0  ;;  %v3317_v41 = vsel %vm1202_vm0, %v2838_v21, 0.0  ;;  %7759 = vst [vmem:[#allocation40_spill] sm:$0xff] %v6819_v39 }
 0x1c0   : > { %v3869_v3 = vsel %vm1202_vm0, %v2838_v21, -inf  ;;  %v3094_v28 = vadd.f32 %v3093_v42, %v3092_v11  ;;  %v3646_v15 = vmax.f32 %v3644_v59, %v3645_v49  ;;  %v2738_v38 = vmax.f32 %v1998_v20, 0.0 }
 0x1c1   : > { %v6807_v10 = vpop.f32.mrb[108].mxu0  ;;  %v3315_v62 = vsel %vm1202_vm0, %v2837_v24, 0.0  ;;  %v3867_v36 = vsel %vm1202_vm0, %v2837_v24, -inf  ;;  %v2737_v61 = vmax.f32 %v1993_v18, 0.0  ;;  %v3588_v50 = vrot.slane %v6792_v35, 1  ;;  %v6828_v18 = vpop.f32.mrb[86].mxu1 }
 0x1c2   : > { %v6811_v43 = vpop.f32.mrb[109].mxu0  ;;  %v3319_v21 = vsel %vm1202_vm0, %v2839_v0, 0.0  ;;  %v3316_v11 = vadd.f32 %v3315_v62, %v3314_v60  ;;  %v3868_v59 = vmax.f32 %v3866_v53, %v3867_v36  ;;  %v3871_v42 = vsel %vm1202_vm0, %v2839_v0, -inf  ;;  %7760 = vst [vmem:[#allocation41_spill] sm:$0xff] %v6828_v18  ;;  %v6832_v26 = vpop.f32.mrb[87].mxu1 }
 0x1c3   : > { %v6817_v7 = vpop.f32.mrb[110].mxu0  ;;  %v2739_v20 = vmax.f32 %v2001_v52, 0.0  ;;  %v3095_v49 = vsel %vm1202_vm0, %v2737_v61, 0.0  ;;  %v3647_v24 = vsel %vm1202_vm0, %v2737_v61, -inf  ;;  %v2414_v44 = vadd.f32 %v6774_v16, %v6364_v17  ;;  %7761 = vst [vmem:[#allocation42_spill] sm:$0xff] %v6832_v26 }
 0x1c4   : > { %v6823_v57 = vpop.f32.mrb[111].mxu0  ;;  %v3318_v13 = vadd.f32 %v3317_v41, %v3316_v11  ;;  %v3870_v31 = vmax.f32 %v3868_v59, %v3869_v3  ;;  %v3096_v39 = vadd.f32 %v3095_v49, %v3094_v28  ;;  %v3097_v60 = vsel %vm1202_vm0, %v2738_v38, 0.0 }
 0x1c5   : > { %v3649_v53 = vsel %vm1202_vm0, %v2738_v38, -inf  ;;  %v3648_v0 = vmax.f32 %v3646_v15, %v3647_v24  ;;  %v2406_v52 = vadd.f32 %v6774_v16, %v6368_v2  ;;  %v6840_v41 = vadd.f32 %v6774_v16, %v6684_v19 }
 0x1c6   : > { %v3098_v62 = vadd.f32 %v3097_v60, %v3096_v39  ;;  %v3320_v36 = vadd.f32 %v3319_v21, %v3318_v13  ;;  %v3872_v61 = vmax.f32 %v3870_v31, %v3871_v42  ;;  %v3099_v3 = vsel %vm1202_vm0, %v2739_v20, 0.0 }
 0x1c7   : > { %v3650_v17 = vmax.f32 %v3648_v0, %v3649_v53  ;;  %v2840_v28 = vmax.f32 %v2406_v52, 0.0  ;;  %v2417_v11 = vadd.f32 %v6774_v16, %v6373_v32  ;;  %v3651_v15 = vsel %vm1202_vm0, %v2739_v20, -inf }
 0x1c8   : > { %v3100_v38 = vadd.f32 %v3099_v3, %v3098_v62  ;;  %v2842_v2 = vmax.f32 %v2414_v44, 0.0  ;;  %v2409_v31 = vadd.f32 %v6774_v16, %v6380_v55  ;;  %v2006_v32 = vadd.f32 %v6774_v16, %v6687_v40 }
 0x1c9   : > { %v6845_v59 = vpop.f32.mrb[112].mxu0  ;;  %v6852_v19 = vmax.f32 %v3650_v17, %v3651_v15  ;;  %v3321_v39 = vsel %vm1202_vm0, %v2840_v28, 0.0  ;;  %v3873_v21 = vsel %vm1202_vm0, %v2840_v28, -inf  ;;  %v7762_v20 = vrot.slane %v6487_v46, 1 }
 0x1ca   : > { %v6850_v13 = vpop.f32.mrb[113].mxu0  ;;  %v3322_v49 = vadd.f32 %v3321_v39, %v3320_v36  ;;  %v3874_v55 = vmax.f32 %v3872_v61, %v3873_v21  ;;  %v2742_v24 = vmax.f32 %v6840_v41, 0.0  ;;  %v7764_v53 = vrot.slane %v6490_v4, 1 }
 0x1cb   : > { %v6858_v42 = vpop.f32.mrb[114].mxu0  ;;  %v6863_v44 = vadd.f32 %v7762_v20, %v6487_v46  ;;  %v7766_v40 = vrot.slane %v6731_v27, 1  ;;  %v6879_v62 = vmax.f32 %v6792_v35, %v3588_v50  ;;  %v2843_v46 = vmax.f32 %v2417_v11, 0.0  ;;  %v6890_v35 = vpop.f32.mrb[88].mxu1 }
 0x1cc   : > { %v6866_v60 = vpop.f32.mrb[115].mxu0  ;;  %v6871_v0 = vmax.f32 %v6490_v4, %v7764_v53  ;;  %v2841_v41 = vmax.f32 %v2409_v31, 0.0  ;;  %v2017_v3 = vadd.f32 %v6774_v16, %v6693_v8  ;;  %v3325_v4 = vsel %vm1202_vm0, %v2842_v2, 0.0  ;;  %7769 = vst [vmem:[#allocation47_spill] sm:$0xff] %v6890_v35  ;;  %v6895_v39 = vpop.f32.mrb[89].mxu1 }
 0x1cd   : > { %7763 = vst [vmem:[#allocation43_spill] sm:$0xff] %v6863_v44  ;;  %v6876_v52 = vadd.f32 %v7766_v40, %v6731_v27  ;;  %7768 = vst [vmem:[#allocation46_spill] sm:$0xff] %v6879_v62  ;;  %v2740_v17 = vmax.f32 %v2006_v32, 0.0  ;;  %v2009_v28 = vadd.f32 %v6774_v16, %v6699_v25  ;;  %v2422_v27 = vadd.f32 %v6774_v16, %v6401_v47  ;;  %v6902_v47 = vpop.f32.mrb[90].mxu1  ;;  %v7773_v62 = vld [vmem:[#allocation12_spill] sm:$0xff] }
 0x1ce   : > { %7765 = vst [vmem:[#allocation44_spill] sm:$0xff] %v6871_v0  ;;  %v3101_v50 = vrot.slane %v3100_v38, 4  ;;  %v3877_v11 = vsel %vm1202_vm0, %v2842_v2, -inf  ;;  %v3110_v15 = vsel %vm1202_vm0, %v2742_v24, 0.0  ;;  %v3323_v31 = vsel %vm1202_vm0, %v2841_v41, 0.0  ;;  %7770 = vst [vmem:[#allocation48_spill] sm:$0xff] %v6895_v39 }
 0x1cf   : > { %7767 = vst [vmem:[#allocation45_spill] sm:$0xff] %v6876_v52  ;;  %v3653_v8 = vrot.slane %v6852_v19, 4  ;;  %v3327_v21 = vsel %vm1202_vm0, %v2843_v46, 0.0  ;;  %v3324_v32 = vadd.f32 %v3323_v31, %v3322_v49  ;;  %v3875_v25 = vsel %vm1202_vm0, %v2841_v41, -inf  ;;  %7771 = vst [vmem:[#allocation49_spill] sm:$0xff] %v6902_v47  ;;  %v6907_v37 = vpop.f32.mrb[91].mxu1 }
 0x1d0   : > { %v3879_v53 = vsel %vm1202_vm0, %v2843_v46, -inf  ;;  %v3876_v2 = vmax.f32 %v3874_v55, %v3875_v25  ;;  %v2743_v40 = vmax.f32 %v2017_v3, 0.0  ;;  %v2741_v36 = vmax.f32 %v2009_v28, 0.0  ;;  %7772 = vst [vmem:[#allocation50_spill] sm:$0xff] %v6907_v37 }
 0x1d1   : > { %v6900_v20 = vpop.f32.mrb[116].mxu0  ;;  %v3107_v52 = vsel %vm1202_vm0, %v2740_v17, 0.0  ;;  %v3326_v44 = vadd.f32 %v3325_v4, %v3324_v32  ;;  %v2430_v49 = vadd.f32 %v6774_v16, %v7773_v62  ;;  %v2844_v41 = vmax.f32 %v2422_v27, 0.0 }
 0x1d2   : > { %v6905_v61 = vpop.f32.mrb[117].mxu0  ;;  %v3659_v0 = vsel %vm1202_vm0, %v2740_v17, -inf  ;;  %v3878_v47 = vmax.f32 %v3876_v2, %v3877_v11  ;;  %v3108_v55 = vsel %vm1202_vm0, %v2741_v36, 0.0  ;;  %v3660_v46 = vsel %vm1202_vm0, %v2741_v36, -inf }
 0x1d3   : > { %v6912_v31 = vpop.f32.mrb[118].mxu0  ;;  %v6919_v28 = vadd.f32 %v3101_v50, %v3100_v38  ;;  %v3662_v25 = vsel %vm1202_vm0, %v2742_v24, -inf  ;;  %v3109_v4 = vadd.f32 %v3108_v55, %v3107_v52  ;;  %v3661_v32 = vmax.f32 %v3659_v0, %v3660_v46  ;;  %v7774_v24 = vld [vmem:[#allocation13_spill] sm:$0xff]  ;;  %v7776_v55 = vld [vmem:[#allocation14_spill] sm:$0xff]  ;;  %v7777_v46 = vld [vmem:[#allocation15_spill] sm:$0xff] }
 0x1d4   : > { %v6917_v3 = vpop.f32.mrb[119].mxu0  ;;  %v3112_v62 = vsel %vm1202_vm0, %v2743_v40, 0.0  ;;  %v3664_v27 = vsel %vm1202_vm0, %v2743_v40, -inf  ;;  %v3328_v37 = vadd.f32 %v3327_v21, %v3326_v44  ;;  %v3329_v17 = vsel %vm1202_vm0, %v2844_v41, 0.0 }
 0x1d5   : > { %v3111_v11 = vadd.f32 %v3110_v15, %v3109_v4  ;;  %v3663_v2 = vmax.f32 %v3661_v32, %v3662_v25  ;;  %v2846_v39 = vmax.f32 %v2430_v49, 0.0  ;;  %v3880_v35 = vmax.f32 %v3878_v47, %v3879_v53 }
 0x1d6   : > { %v3330_v36 = vadd.f32 %v3329_v17, %v3328_v37  ;;  %v3881_v26 = vsel %vm1202_vm0, %v2844_v41, -inf  ;;  %v2030_v38 = vadd.f32 %v6774_v16, %v6715_v58  ;;  %v2433_v0 = vadd.f32 %v6774_v16, %v7774_v24 }
 0x1d7   : > { %v3882_v52 = vmax.f32 %v3880_v35, %v3881_v26  ;;  %v2022_v50 = vadd.f32 %v6774_v16, %v6717_v9  ;;  %v3113_v44 = vadd.f32 %v3112_v62, %v3111_v11  ;;  %v3665_v21 = vmax.f32 %v3663_v2, %v3664_v27 }
 0x1d8   : > { %v6935_v15 = vmax.f32 %v6852_v19, %v3653_v8  ;;  %v2746_v37 = vmax.f32 %v2030_v38, 0.0  ;;  %v2425_v47 = vadd.f32 %v6774_v16, %v6410_v30  ;;  %v2033_v58 = vadd.f32 %v6774_v16, %v6724_v51  ;;  %v6948_v19 = vpop.f32.mrb[92].mxu1 }
 0x1d9   : > { %v6932_v40 = vpop.f32.mrb[120].mxu0  ;;  %v3333_v26 = vsel %vm1202_vm0, %v2846_v39, 0.0  ;;  %v2847_v35 = vmax.f32 %v2433_v0, 0.0  ;;  %v2744_v9 = vmax.f32 %v2022_v50, 0.0  ;;  %v2025_v49 = vadd.f32 %v6774_v16, %v6736_v63  ;;  %7775 = vst [vmem:[#allocation12_spill] sm:$0xff] %v6948_v19  ;;  %v6958_v32 = vpop.f32.mrb[93].mxu1 }
 0x1da   : > { %v6941_v53 = vpop.f32.mrb[121].mxu0  ;;  %v3885_v8 = vsel %vm1202_vm0, %v2846_v39, -inf  ;;  %v3118_v30 = vsel %vm1202_vm0, %v2746_v37, 0.0  ;;  %v2446_v51 = vadd.f32 %v6774_v16, %v7776_v55  ;;  %v2438_v25 = vadd.f32 %v6774_v16, %v7777_v46  ;;  %7778 = vst [vmem:[#allocation13_spill] sm:$0xff] %v6958_v32  ;;  %v6962_v11 = vpop.f32.mrb[94].mxu1 }
 0x1db   : > { %v6946_v41 = vpop.f32.mrb[122].mxu0  ;;  %v3114_v63 = vsel %vm1202_vm0, %v2744_v9, 0.0  ;;  %v3666_v62 = vsel %vm1202_vm0, %v2744_v9, -inf  ;;  %v2845_v27 = vmax.f32 %v2425_v47, 0.0  ;;  %v2747_v17 = vmax.f32 %v2033_v58, 0.0  ;;  %7779 = vst [vmem:[#allocation14_spill] sm:$0xff] %v6962_v11 }
 0x1dc   : > { %v6956_v4 = vpop.f32.mrb[123].mxu0  ;;  %v3670_v39 = vsel %vm1202_vm0, %v2746_v37, -inf  ;;  %v3115_v2 = vadd.f32 %v3114_v63, %v3113_v44  ;;  %v3667_v38 = vmax.f32 %v3665_v21, %v3666_v62  ;;  %v2745_v24 = vmax.f32 %v2025_v49, 0.0  ;;  %v6965_v0 = vpop.f32.mrb[95].mxu1 }
 0x1dd   : > { %7780 = vst [vmem:[#allocation15_spill] sm:$0xff] %v6965_v0  ;;  %v3335_v50 = vsel %vm1202_vm0, %v2847_v35, 0.0  ;;  %v3887_v55 = vsel %vm1202_vm0, %v2847_v35, -inf  ;;  %v3331_v46 = vsel %vm1202_vm0, %v2845_v27, 0.0  ;;  %v3883_v19 = vsel %vm1202_vm0, %v2845_v27, -inf }
 0x1de   : > { %v3332_v9 = vadd.f32 %v3331_v46, %v3330_v36  ;;  %v3884_v47 = vmax.f32 %v3882_v52, %v3883_v19  ;;  %v3116_v58 = vsel %vm1202_vm0, %v2745_v24, 0.0  ;;  %v3668_v11 = vsel %vm1202_vm0, %v2745_v24, -inf  ;;  %v7781_v19 = vld [vmem:[#allocation16_spill] sm:$0xff] }
 0x1df   : > { %v3120_v44 = vsel %vm1202_vm0, %v2747_v17, 0.0  ;;  %v3117_v21 = vadd.f32 %v3116_v58, %v3115_v2  ;;  %v3669_v37 = vmax.f32 %v3667_v38, %v3668_v11  ;;  %v2850_v49 = vmax.f32 %v2446_v51, 0.0 }
 0x1e0   : > { %v3334_v62 = vadd.f32 %v3333_v26, %v3332_v9  ;;  %v3886_v0 = vmax.f32 %v3884_v47, %v3885_v8  ;;  %v2848_v35 = vmax.f32 %v2438_v25, 0.0  ;;  %v2046_v32 = vadd.f32 %v6774_v16, %v6759_v23  ;;  %v6992_v9 = vpop.f32.mrb[96].mxu1 }
 0x1e1   : > { %v6974_v63 = vpop.f32.mrb[124].mxu0  ;;  %v3119_v36 = vadd.f32 %v3118_v30, %v3117_v21  ;;  %v3671_v52 = vmax.f32 %v3669_v37, %v3670_v39  ;;  %v2449_v24 = vadd.f32 %v6774_v16, %v7781_v19  ;;  %v2038_v2 = vadd.f32 %v6774_v16, %v6761_v33  ;;  %7782 = vst [vmem:[#allocation16_spill] sm:$0xff] %v6992_v9  ;;  %v7783_v21 = vld [vmem:[#allocation17_spill] sm:$0xff]  ;;  %v6996_v37 = vpop.f32.mrb[97].mxu1 }
 0x1e2   : > { %v6978_v27 = vpop.f32.mrb[125].mxu0  ;;  %v3336_v51 = vadd.f32 %v3335_v50, %v3334_v62  ;;  %v3337_v26 = vsel %vm1202_vm0, %v2848_v35, 0.0  ;;  %v3888_v8 = vmax.f32 %v3886_v0, %v3887_v55  ;;  %v3889_v25 = vsel %vm1202_vm0, %v2848_v35, -inf  ;;  %7784 = vst [vmem:[#allocation17_spill] sm:$0xff] %v6996_v37 }
 0x1e3   : > { %v6984_v11 = vpop.f32.mrb[126].mxu0  ;;  %v3672_v30 = vsel %vm1202_vm0, %v2747_v17, -inf  ;;  %v2748_v39 = vmax.f32 %v2038_v2, 0.0  ;;  %v3121_v46 = vadd.f32 %v3120_v44, %v3119_v36  ;;  %v2441_v50 = vadd.f32 %v6774_v16, %v7783_v21 }
 0x1e4   : > { %v6988_v38 = vpop.f32.mrb[127].mxu0  ;;  %v3338_v47 = vadd.f32 %v3337_v26, %v3336_v51  ;;  %v3890_v33 = vmax.f32 %v3888_v8, %v3889_v25  ;;  %v3673_v58 = vmax.f32 %v3671_v52, %v3672_v30  ;;  %v3341_v0 = vsel %vm1202_vm0, %v2850_v49, 0.0  ;;  %v7004_v52 = vpop.f32.mrb[98].mxu1  ;;  %v7786_v8 = vld [vmem:[#allocation18_spill] sm:$0xff] }
 0x1e5   : > { %v3893_v55 = vsel %vm1202_vm0, %v2850_v49, -inf  ;;  %v2750_v62 = vmax.f32 %v2046_v32, 0.0  ;;  %v2851_v35 = vmax.f32 %v2449_v24, 0.0  ;;  %v3122_v17 = vsel %vm1202_vm0, %v2748_v39, 0.0  ;;  %7785 = vst [vmem:[#allocation51_spill] sm:$0xff] %v7004_v52  ;;  %v7012_v24 = vpop.f32.mrb[99].mxu1 }
 0x1e6   : > { %v3674_v44 = vsel %vm1202_vm0, %v2748_v39, -inf  ;;  %v2849_v36 = vmax.f32 %v2441_v50, 0.0  ;;  %v2049_v19 = vadd.f32 %v6774_v16, %v6778_v56  ;;  %v3123_v2 = vadd.f32 %v3122_v17, %v3121_v46  ;;  %7787 = vst [vmem:[#allocation18_spill] sm:$0xff] %v7012_v24  ;;  %v7788_v56 = vld [vmem:[#allocation19_spill] sm:$0xff] }
 0x1e7   : > { %v3675_v51 = vmax.f32 %v3673_v58, %v3674_v44  ;;  %v2041_v26 = vadd.f32 %v6774_v16, %v6784_v29  ;;  %v2462_v49 = vadd.f32 %v6774_v16, %v7786_v8  ;;  %v2454_v21 = vadd.f32 %v6774_v16, %v7788_v56 }
 0x1e8   : > { %v3339_v25 = vsel %vm1202_vm0, %v2849_v36, 0.0  ;;  %v3891_v30 = vsel %vm1202_vm0, %v2849_v36, -inf  ;;  %v2751_v39 = vmax.f32 %v2049_v19, 0.0  ;;  %v3126_v58 = vsel %vm1202_vm0, %v2750_v62, 0.0 }
 0x1e9   : > { %v7010_v32 = vpop.f32.mrb[128].mxu0  ;;  %v3340_v29 = vadd.f32 %v3339_v25, %v3338_v47  ;;  %v3892_v50 = vmax.f32 %v3890_v33, %v3891_v30  ;;  %v2749_v17 = vmax.f32 %v2041_v26, 0.0  ;;  %v3678_v8 = vsel %vm1202_vm0, %v2750_v62, -inf }
 0x1ea   : > { %v7018_v46 = vpop.f32.mrb[129].mxu0  ;;  %v3343_v23 = vsel %vm1202_vm0, %v2851_v35, 0.0  ;;  %v3895_v24 = vsel %vm1202_vm0, %v2851_v35, -inf  ;;  %v2852_v36 = vmax.f32 %v2454_v21, 0.0  ;;  %v3128_v47 = vsel %vm1202_vm0, %v2751_v39, 0.0 }
 0x1eb   : > { %v7021_v44 = vpop.f32.mrb[130].mxu0  ;;  %v3342_v52 = vadd.f32 %v3341_v0, %v3340_v29  ;;  %v3894_v56 = vmax.f32 %v3892_v50, %v3893_v55  ;;  %v3124_v37 = vsel %vm1202_vm0, %v2749_v17, 0.0  ;;  %v3676_v9 = vsel %vm1202_vm0, %v2749_v17, -inf  ;;  %v7789_v55 = vld [vmem:[#allocation20_spill] sm:$0xff] }
 0x1ec   : > { %v7026_v19 = vpop.f32.mrb[131].mxu0  ;;  %v3125_v33 = vadd.f32 %v3124_v37, %v3123_v2  ;;  %v3677_v26 = vmax.f32 %v3675_v51, %v3676_v9  ;;  %v2854_v25 = vmax.f32 %v2462_v49, 0.0  ;;  %v3345_v62 = vsel %vm1202_vm0, %v2852_v36, 0.0  ;;  %v7790_v37 = vld [vmem:[#allocation21_spill] sm:$0xff] }
 0x1ed   : > { %v3344_v30 = vadd.f32 %v3343_v23, %v3342_v52  ;;  %v3896_v18 = vmax.f32 %v3894_v56, %v3895_v24  ;;  %v3897_v35 = vsel %vm1202_vm0, %v2852_v36, -inf  ;;  %v2062_v0 = vadd.f32 %v6774_v16, %v6807_v10  ;;  %v7051_v56 = vpop.f32.mrb[100].mxu1 }
 0x1ee   : > { %v3127_v21 = vadd.f32 %v3126_v58, %v3125_v33  ;;  %v3679_v6 = vmax.f32 %v3677_v26, %v3678_v8  ;;  %v2465_v29 = vadd.f32 %v6774_v16, %v7789_v55  ;;  %v2054_v9 = vadd.f32 %v6774_v16, %v6811_v43  ;;  %7792 = vst [vmem:[#allocation20_spill] sm:$0xff] %v7051_v56  ;;  %v7798_v56 = vld [vmem:[#allocation23_spill] sm:$0xff] }
 0x1ef   : > { %v3346_v50 = vadd.f32 %v3345_v62, %v3344_v30  ;;  %v3898_v17 = vmax.f32 %v3896_v18, %v3897_v35  ;;  %v2457_v23 = vadd.f32 %v6774_v16, %v7790_v37  ;;  %v3680_v2 = vsel %vm1202_vm0, %v2751_v39, -inf  ;;  %v7793_v30 = vld [vmem:[#allocation22_spill] sm:$0xff] }
 0x1f0   : > { %v3349_v51 = vsel %vm1202_vm0, %v2854_v25, 0.0  ;;  %v2855_v49 = vmax.f32 %v2465_v29, 0.0  ;;  %v3129_v24 = vadd.f32 %v3128_v47, %v3127_v21  ;;  %v2752_v58 = vmax.f32 %v2054_v9, 0.0 }
 0x1f1   : > { %v7041_v52 = vpop.f32.mrb[132].mxu0  ;;  %v3681_v8 = vmax.f32 %v3679_v6, %v3680_v2  ;;  %v2853_v36 = vmax.f32 %v2457_v23, 0.0  ;;  %v2065_v18 = vadd.f32 %v6774_v16, %v6817_v7  ;;  %v3901_v33 = vsel %vm1202_vm0, %v2854_v25, -inf  ;;  %v7060_v6 = vpop.f32.mrb[101].mxu1 }
 0x1f2   : > { %v7045_v10 = vpop.f32.mrb[133].mxu0  ;;  %v2754_v26 = vmax.f32 %v2062_v0, 0.0  ;;  %v2057_v39 = vadd.f32 %v6774_v16, %v6823_v57  ;;  %v2478_v47 = vadd.f32 %v6774_v16, %v7793_v30  ;;  %7795 = vst [vmem:[#allocation22_spill] sm:$0xff] %v7060_v6  ;;  %v3130_v35 = vsel %vm1202_vm0, %v2752_v58, 0.0  ;;  %v7066_v25 = vpop.f32.mrb[102].mxu1 }
 0x1f3   : > { %v7049_v43 = vpop.f32.mrb[134].mxu0  ;;  %v3682_v7 = vsel %vm1202_vm0, %v2752_v58, -inf  ;;  %v3347_v21 = vsel %vm1202_vm0, %v2853_v36, 0.0  ;;  %v3899_v55 = vsel %vm1202_vm0, %v2853_v36, -inf  ;;  %7796 = vst [vmem:[#allocation52_spill] sm:$0xff] %v7066_v25  ;;  %v3131_v0 = vadd.f32 %v3130_v35, %v3129_v24  ;;  %v7068_v37 = vpop.f32.mrb[103].mxu1 }
 0x1f4   : > { %7791 = vst [vmem:[#allocation19_spill] sm:$0xff] %v7049_v43  ;;  %v7058_v62 = vpop.f32.mrb[135].mxu0  ;;  %v3683_v29 = vmax.f32 %v3681_v8, %v3682_v7  ;;  %v3348_v57 = vadd.f32 %v3347_v21, %v3346_v50  ;;  %v3900_v9 = vmax.f32 %v3898_v17, %v3899_v55  ;;  %7797 = vst [vmem:[#allocation53_spill] sm:$0xff] %v7068_v37  ;;  %v3351_v23 = vsel %vm1202_vm0, %v2855_v49, 0.0 }
 0x1f5   : > { %7794 = vst [vmem:[#allocation21_spill] sm:$0xff] %v7058_v62  ;;  %v2755_v2 = vmax.f32 %v2065_v18, 0.0  ;;  %v2753_v30 = vmax.f32 %v2057_v39, 0.0  ;;  %v2470_v6 = vadd.f32 %v6774_v16, %v7798_v56  ;;  %v3903_v58 = vsel %vm1202_vm0, %v2855_v49, -inf }
 0x1f6   : > { %v3350_v62 = vadd.f32 %v3349_v51, %v3348_v57  ;;  %v3902_v43 = vmax.f32 %v3900_v9, %v3901_v33  ;;  %v2078_v36 = vadd.f32 %v6774_v16, %v6845_v59  ;;  %v3134_v24 = vsel %vm1202_vm0, %v2754_v26, 0.0 }
 0x1f7   : > { %v3132_v50 = vsel %vm1202_vm0, %v2753_v30, 0.0  ;;  %v3684_v17 = vsel %vm1202_vm0, %v2753_v30, -inf  ;;  %v2858_v8 = vmax.f32 %v2478_v47, 0.0  ;;  %v3686_v18 = vsel %vm1202_vm0, %v2754_v26, -inf }
 0x1f8   : > { %v3133_v39 = vadd.f32 %v3132_v50, %v3131_v0  ;;  %v3685_v56 = vmax.f32 %v3683_v29, %v3684_v17  ;;  %v2481_v51 = vadd.f32 %v6774_v16, %v6507_v5  ;;  %v3136_v59 = vsel %vm1202_vm0, %v2755_v2, 0.0 }
 0x1f9   : > { %v7079_v35 = vpop.f32.mrb[136].mxu0  ;;  %v2856_v33 = vmax.f32 %v2470_v6, 0.0  ;;  %v3352_v7 = vadd.f32 %v3351_v23, %v3350_v62  ;;  %v3904_v21 = vmax.f32 %v3902_v43, %v3903_v58  ;;  %v2758_v9 = vmax.f32 %v2078_v36, 0.0 }
 0x1fa   : > { %v7084_v49 = vpop.f32.mrb[137].mxu0  ;;  %v3135_v57 = vadd.f32 %v3134_v24, %v3133_v39  ;;  %v3687_v47 = vmax.f32 %v3685_v56, %v3686_v18  ;;  %v2070_v26 = vadd.f32 %v6774_v16, %v6850_v13  ;;  %v3688_v29 = vsel %vm1202_vm0, %v2755_v2, -inf  ;;  %v7799_v39 = vld [vmem:[#allocation25_spill] sm:$0xff] }
 0x1fb   : > { %v7087_v55 = vpop.f32.mrb[138].mxu0  ;;  %v3357_v5 = vsel %vm1202_vm0, %v2858_v8, 0.0  ;;  %v3353_v30 = vsel %vm1202_vm0, %v2856_v33, 0.0  ;;  %v3905_v6 = vsel %vm1202_vm0, %v2856_v33, -inf  ;;  %v3909_v43 = vsel %vm1202_vm0, %v2858_v8, -inf  ;;  %v7800_v33 = vld [vmem:[#allocation24_spill] sm:$0xff] }
 0x1fc   : > { %v7091_v0 = vpop.f32.mrb[139].mxu0  ;;  %v3354_v62 = vadd.f32 %v3353_v30, %v3352_v7  ;;  %v3906_v23 = vmax.f32 %v3904_v21, %v3905_v6  ;;  %v2859_v58 = vmax.f32 %v2481_v51, 0.0  ;;  %v2756_v24 = vmax.f32 %v2070_v26, 0.0 }
 0x1fd   : > { %v3137_v36 = vadd.f32 %v3136_v59, %v3135_v57  ;;  %v3689_v50 = vmax.f32 %v3687_v47, %v3688_v29  ;;  %v2473_v13 = vadd.f32 %v6774_v16, %v6509_v1  ;;  %v3142_v17 = vsel %vm1202_vm0, %v2758_v9, 0.0 }
 0x1fe   : > { %v2081_v2 = vadd.f32 %v6774_v16, %v6858_v42  ;;  %v2073_v18 = vadd.f32 %v6774_v16, %v6866_v60  ;;  %v2486_v8 = vadd.f32 %v6774_v16, %v7799_v39  ;;  %v3138_v56 = vsel %vm1202_vm0, %v2756_v24, 0.0 }
 0x1ff   : > { %v3690_v51 = vsel %vm1202_vm0, %v2756_v24, -inf  ;;  %v2857_v59 = vmax.f32 %v2473_v13, 0.0  ;;  %v2494_v7 = vadd.f32 %v6774_v16, %v7800_v33  ;;  %v3694_v21 = vsel %vm1202_vm0, %v2758_v9, -inf }
 0x200   : > { %v3139_v57 = vadd.f32 %v3138_v56, %v3137_v36  ;;  %v3691_v42 = vmax.f32 %v3689_v50, %v3690_v51  ;;  %v2757_v47 = vmax.f32 %v2073_v18, 0.0  ;;  %v2860_v30 = vmax.f32 %v2486_v8, 0.0 }
 0x201   : > { %v7111_v1 = vpop.f32.mrb[140].mxu0  ;;  %v3355_v60 = vsel %vm1202_vm0, %v2857_v59, 0.0  ;;  %v3907_v29 = vsel %vm1202_vm0, %v2857_v59, -inf  ;;  %v2094_v6 = vadd.f32 %v6774_v16, %v6900_v20  ;;  %v3359_v13 = vsel %vm1202_vm0, %v2859_v58, 0.0 }
 0x202   : > { %v7114_v26 = vpop.f32.mrb[141].mxu0  ;;  %v3911_v39 = vsel %vm1202_vm0, %v2859_v58, -inf  ;;  %v3356_v9 = vadd.f32 %v3355_v60, %v3354_v62  ;;  %v3908_v36 = vmax.f32 %v3906_v23, %v3907_v29  ;;  %v2759_v18 = vmax.f32 %v2081_v2, 0.0  ;;  %v7803_v58 = vld [vmem:[#allocation26_spill] sm:$0xff] }
 0x203   : > { %7801 = vst [vmem:[#allocation23_spill] sm:$0xff] %v7114_v26  ;;  %v7120_v24 = vpop.f32.mrb[142].mxu0  ;;  %v3140_v56 = vsel %vm1202_vm0, %v2757_v47, 0.0  ;;  %v3692_v51 = vsel %vm1202_vm0, %v2757_v47, -inf  ;;  %v2862_v59 = vmax.f32 %v2494_v7, 0.0  ;;  %v3361_v25 = vsel %vm1202_vm0, %v2860_v30, 0.0 }
 0x204   : > { %7802 = vst [vmem:[#allocation25_spill] sm:$0xff] %v7120_v24  ;;  %v7124_v50 = vpop.f32.mrb[143].mxu0  ;;  %v3358_v8 = vadd.f32 %v3357_v5, %v3356_v9  ;;  %v3910_v33 = vmax.f32 %v3908_v36, %v3909_v43  ;;  %v3141_v37 = vadd.f32 %v3140_v56, %v3139_v57  ;;  %v3693_v20 = vmax.f32 %v3691_v42, %v3692_v51  ;;  %v5559_v23 = vld [vmem:[%s7706_s3 + $0x20] ss:$16 sps:$4 sm:$0xff]   ;;  %v5561_v5 = vld [vmem:[%s7706_s3 + $0x24] ss:$16 sps:$4 sm:$0xff]  }
 0x205   : > { %v3913_v24 = vsel %vm1202_vm0, %v2860_v30, -inf  ;;  %v2762_v26 = vmax.f32 %v2094_v6, 0.0  ;;  %v2497_v62 = vadd.f32 %v6774_v16, %v7803_v58  ;;  %v3655_v43 = vrot.slane %v6935_v15, 2  ;;  %4171 = vmatprep.subr.bf16.mxu1 %v5561_v5  ;;  %v7804_v56 = vld [vmem:[#allocation27_spill] sm:$0xff] }
 0x206   : > { %v3143_v2 = vadd.f32 %v3142_v17, %v3141_v37  ;;  %v3695_v60 = vmax.f32 %v3693_v20, %v3694_v21  ;;  %v3360_v47 = vadd.f32 %v3359_v13, %v3358_v8  ;;  %v3912_v7 = vmax.f32 %v3910_v33, %v3911_v39  ;;  %4172 = vmatpush1.bf16.msra.mxu1 %v5559_v23 }
 0x207   : > { %v3144_v57 = vsel %vm1202_vm0, %v2759_v18, 0.0  ;;  %v3696_v42 = vsel %vm1202_vm0, %v2759_v18, -inf  ;;  %v2086_v29 = vadd.f32 %v6774_v16, %v6905_v61  ;;  %v3365_v39 = vsel %vm1202_vm0, %v2862_v59, 0.0 }
 0x208   : > { %v3362_v6 = vadd.f32 %v3361_v25, %v3360_v47  ;;  %v3914_v37 = vmax.f32 %v3912_v7, %v3913_v24  ;;  %v3145_v17 = vadd.f32 %v3144_v57, %v3143_v2  ;;  %v3697_v21 = vmax.f32 %v3695_v60, %v3696_v42 }
 0x209   : > { %v7143_v30 = vpop.f32.mrb[144].mxu0  ;;  %v3917_v9 = vsel %vm1202_vm0, %v2862_v59, -inf  ;;  %v2760_v36 = vmax.f32 %v2086_v29, 0.0  ;;  %v2489_v18 = vadd.f32 %v6774_v16, %v7804_v56  ;;  %v3150_v61 = vsel %vm1202_vm0, %v2762_v26, 0.0 }
 0x20a   : > { %v7145_v13 = vpop.f32.mrb[145].mxu0  ;;  %v2863_v25 = vmax.f32 %v2497_v62, 0.0  ;;  %v2089_v24 = vadd.f32 %v6774_v16, %v6917_v3  ;;  %v2502_v8 = vadd.f32 %v6774_v16, %v6571_v54  ;;  %v2097_v2 = vadd.f32 %v6774_v16, %v6912_v31  ;;  %v5562_v31 = vld [vmem:[%s7706_s3 + $0x40] ss:$16 sps:$4 sm:$0xff]  }
 0x20b   : > { %v7151_v51 = vpop.f32.mrb[146].mxu0  ;;  %v3146_v59 = vsel %vm1202_vm0, %v2760_v36, 0.0  ;;  %v3698_v20 = vsel %vm1202_vm0, %v2760_v36, -inf  ;;  %v2861_v58 = vmax.f32 %v2489_v18, 0.0  ;;  %v3702_v23 = vsel %vm1202_vm0, %v2762_v26, -inf }
 0x20c   : > { %v7158_v33 = vpop.f32.mrb[147].mxu0  ;;  %v3147_v60 = vadd.f32 %v3146_v59, %v3145_v17  ;;  %v3699_v62 = vmax.f32 %v3697_v21, %v3698_v20  ;;  %v2761_v47 = vmax.f32 %v2089_v24, 0.0  ;;  %v2510_v54 = vadd.f32 %v6774_v16, %v6565_v48  ;;  %v5564_v26 = vld [vmem:[%s7706_s3 + $0x44] ss:$16 sps:$4 sm:$0xff]  }
 0x20d   : > { %v3363_v3 = vsel %vm1202_vm0, %v2861_v58, 0.0  ;;  %v3915_v7 = vsel %vm1202_vm0, %v2861_v58, -inf  ;;  %v2864_v5 = vmax.f32 %v2502_v8, 0.0  ;;  %v3367_v57 = vsel %vm1202_vm0, %v2863_v25, 0.0  ;;  %4173 = vmatprep.subr.bf16.mxu1 %v5564_v26  ;;  %v5567_v59 = vld [vmem:[%s7706_s3 + $0x64] ss:$16 sps:$4 sm:$0xff]  }
 0x20e   : > { %v3919_v42 = vsel %vm1202_vm0, %v2863_v25, -inf  ;;  %v3364_v29 = vadd.f32 %v3363_v3, %v3362_v6  ;;  %v3916_v36 = vmax.f32 %v3914_v37, %v3915_v7  ;;  %v2763_v17 = vmax.f32 %v2097_v2, 0.0  ;;  %4174 = vmatpush1.bf16.msra.mxu1 %v5562_v31 }
 0x20f   : > { %v3148_v21 = vsel %vm1202_vm0, %v2761_v47, 0.0  ;;  %v3700_v48 = vsel %vm1202_vm0, %v2761_v47, -inf  ;;  %v7181_v56 = vadd.f32 %v6774_v16, %v6932_v40  ;;  %v2866_v20 = vmax.f32 %v2510_v54, 0.0  ;;  %v7805_v40 = vld [vmem:[#allocation28_spill] sm:$0xff]  ;;  %4175 = vmatprep.subr.bf16.mxu1 %v5567_v59 }
 0x210   : > { %v3366_v6 = vadd.f32 %v3365_v39, %v3364_v29  ;;  %v3918_v37 = vmax.f32 %v3916_v36, %v3917_v9  ;;  %v3149_v25 = vadd.f32 %v3148_v21, %v3147_v60  ;;  %v3701_v24 = vmax.f32 %v3699_v62, %v3700_v48  ;;  %v5565_v39 = vld [vmem:[%s7706_s3 + $0x60] ss:$16 sps:$4 sm:$0xff]  }
 0x211   : > { %v7183_v18 = vpop.f32.mrb[148].mxu0  ;;  %v3369_v58 = vsel %vm1202_vm0, %v2864_v5, 0.0  ;;  %v3921_v2 = vsel %vm1202_vm0, %v2864_v5, -inf  ;;  %v2513_v47 = vadd.f32 %v6774_v16, %v7805_v40  ;;  %v3152_v54 = vsel %vm1202_vm0, %v2763_v17, 0.0 }
 0x212   : > { %v7185_v8 = vpop.f32.mrb[149].mxu0  ;;  %v3151_v9 = vadd.f32 %v3150_v61, %v3149_v25  ;;  %v3703_v60 = vmax.f32 %v3701_v24, %v3702_v23  ;;  %v3368_v62 = vadd.f32 %v3367_v57, %v3366_v6  ;;  %v3920_v7 = vmax.f32 %v3918_v37, %v3919_v42  ;;  %4176 = vmatpush1.bf16.msra.mxu1 %v5565_v39 }
 0x213   : > { %v7194_v3 = vpop.f32.mrb[150].mxu0  ;;  %v3704_v5 = vsel %vm1202_vm0, %v2763_v17, -inf  ;;  %v2766_v36 = vmax.f32 %v7181_v56, 0.0  ;;  %v2102_v31 = vadd.f32 %v6774_v16, %v6941_v53  ;;  %v7806_v61 = vrot.slane %v6919_v28, 2  ;;  %v7807_v17 = vld [vmem:[#allocation29_spill] sm:$0xff] }
 0x214   : > { %v7199_v29 = vpop.f32.mrb[151].mxu0  ;;  %v3370_v26 = vadd.f32 %v3369_v58, %v3368_v62  ;;  %v3922_v21 = vmax.f32 %v3920_v7, %v3921_v2  ;;  %v3153_v48 = vadd.f32 %v3152_v54, %v3151_v9  ;;  %v3705_v40 = vmax.f32 %v3703_v60, %v3704_v5 }
 0x215   : > { %v7209_v23 = vadd.f32 %v7806_v61, %v6919_v28  ;;  %v7214_v57 = vmax.f32 %v6935_v15, %v3655_v43  ;;  %v2764_v42 = vmax.f32 %v2102_v31, 0.0  ;;  %v2505_v56 = vadd.f32 %v6774_v16, %v7807_v17 }
 0x216   : > { %v3373_v53 = vsel %vm1202_vm0, %v2866_v20, 0.0  ;;  %v3925_v6 = vsel %vm1202_vm0, %v2866_v20, -inf  ;;  %v2867_v37 = vmax.f32 %v2513_v47, 0.0  ;;  %v2105_v25 = vadd.f32 %v6774_v16, %v6956_v4  ;;  %v7808_v47 = vld [vmem:[#allocation30_spill] sm:$0xff] }
 0x217   : > { %v3154_v28 = vsel %vm1202_vm0, %v2764_v42, 0.0  ;;  %v3706_v24 = vsel %vm1202_vm0, %v2764_v42, -inf  ;;  %v2865_v59 = vmax.f32 %v2505_v56, 0.0  ;;  %v2113_v15 = vadd.f32 %v6774_v16, %v6946_v41 }
 0x218   : > { %v3158_v43 = vsel %vm1202_vm0, %v2766_v36, 0.0  ;;  %v3155_v58 = vadd.f32 %v3154_v28, %v3153_v48  ;;  %v3707_v2 = vmax.f32 %v3705_v40, %v3706_v24  ;;  %v2765_v39 = vmax.f32 %v2105_v25, 0.0  ;;  %v7809_v24 = vld [vmem:[#allocation31_spill] sm:$0xff] }
 0x219   : > { %v3371_v9 = vsel %vm1202_vm0, %v2865_v59, 0.0  ;;  %v3923_v20 = vsel %vm1202_vm0, %v2865_v59, -inf  ;;  %v2526_v4 = vadd.f32 %v6774_v16, %v6621_v14  ;;  %v2518_v60 = vadd.f32 %v6774_v16, %v7808_v47 }
 0x21a   : > { %v3375_v62 = vsel %vm1202_vm0, %v2867_v37, 0.0  ;;  %v3927_v7 = vsel %vm1202_vm0, %v2867_v37, -inf  ;;  %v3372_v41 = vadd.f32 %v3371_v9, %v3370_v26  ;;  %v3924_v54 = vmax.f32 %v3922_v21, %v3923_v20 }
 0x21b   : > { %v2767_v5 = vmax.f32 %v2113_v15, 0.0  ;;  %v3156_v31 = vsel %vm1202_vm0, %v2765_v39, 0.0  ;;  %v3708_v48 = vsel %vm1202_vm0, %v2765_v39, -inf  ;;  %v2126_v40 = vadd.f32 %v6774_v16, %v6974_v63 }
 0x21c   : > { %v3374_v61 = vadd.f32 %v3373_v53, %v3372_v41  ;;  %v3926_v42 = vmax.f32 %v3924_v54, %v3925_v6  ;;  %v3157_v14 = vadd.f32 %v3156_v31, %v3155_v58  ;;  %v3709_v17 = vmax.f32 %v3707_v2, %v3708_v48 }
 0x21d   : > { %v3710_v56 = vsel %vm1202_vm0, %v2766_v36, -inf  ;;  %v2870_v25 = vmax.f32 %v2526_v4, 0.0  ;;  %v2868_v28 = vmax.f32 %v2518_v60, 0.0  ;;  %v2529_v26 = vadd.f32 %v6774_v16, %v7809_v24  ;;  %v7811_v60 = vld [vmem:[#allocation32_spill] sm:$0xff] }
 0x21e   : > { %v7242_v21 = vadd.f32 %v3375_v62, %v3374_v61  ;;  %v7244_v37 = vmax.f32 %v3926_v42, %v3927_v7  ;;  %v3159_v59 = vadd.f32 %v3158_v43, %v3157_v14  ;;  %v3711_v15 = vmax.f32 %v3709_v17, %v3710_v56 }
 0x21f   : > { %v7810_v39 = vrot.slane %v6782_v34, 4  ;;  %v3160_v53 = vsel %vm1202_vm0, %v2767_v5, 0.0  ;;  %v3712_v36 = vsel %vm1202_vm0, %v2767_v5, -inf  ;;  %v2118_v6 = vadd.f32 %v6774_v16, %v6978_v27 }
 0x220   : > { %v3105_v58 = vrot.slane %v7209_v23, 1  ;;  %v2770_v2 = vmax.f32 %v2126_v40, 0.0  ;;  %v3161_v9 = vadd.f32 %v3160_v53, %v3159_v59  ;;  %v3713_v20 = vmax.f32 %v3711_v15, %v3712_v36 }
 0x221   : > { %v7249_v63 = vmax.f32 %v6782_v34, %v7810_v39  ;;  %v3657_v43 = vrot.slane %v7214_v57, 1  ;;  %v3386_v4 = vsel %vm1202_vm0, %v2870_v25, 0.0  ;;  %v2768_v47 = vmax.f32 %v2118_v6, 0.0 }
 0x222   : > { %v2521_v34 = vadd.f32 %v6774_v16, %v7811_v60  ;;  %v3383_v62 = vsel %vm1202_vm0, %v2868_v28, 0.0  ;;  %v3935_v7 = vsel %vm1202_vm0, %v2868_v28, -inf  ;;  %v2871_v41 = vmax.f32 %v2529_v26, 0.0  ;;  %v7812_v60 = vld [vmem:[#allocation33_spill] sm:$0xff] }
 0x223   : > { %v2121_v27 = vadd.f32 %v6774_v16, %v6988_v38  ;;  %v3162_v54 = vsel %vm1202_vm0, %v2768_v47, 0.0  ;;  %v3714_v5 = vsel %vm1202_vm0, %v2768_v47, -inf  ;;  %v2129_v48 = vadd.f32 %v6774_v16, %v6984_v11  ;;  %v7275_v38 = vld [vmem:[%s7705_s2] ss:$0 sm:$0xff] }
 0x224   : > { %v2869_v31 = vmax.f32 %v2521_v34, 0.0  ;;  %v3938_v40 = vsel %vm1202_vm0, %v2870_v25, -inf  ;;  %v3166_v61 = vsel %vm1202_vm0, %v2770_v2, 0.0  ;;  %v3163_v42 = vadd.f32 %v3162_v54, %v3161_v9 }
 0x225   : > { %v3715_v14 = vmax.f32 %v3713_v20, %v3714_v5  ;;  %v2769_v28 = vmax.f32 %v2121_v27, 0.0  ;;  %v2542_v24 = vadd.f32 %v7275_v38, %v6671_v12  ;;  %v3718_v16 = vsel %vm1202_vm0, %v2770_v2, -inf }
 0x226   : > { %v3384_v17 = vsel %vm1202_vm0, %v2869_v31, 0.0  ;;  %v3936_v56 = vsel %vm1202_vm0, %v2869_v31, -inf  ;;  %v3388_v11 = vsel %vm1202_vm0, %v2871_v41, 0.0  ;;  %v3940_v59 = vsel %vm1202_vm0, %v2871_v41, -inf  ;;  %v7813_v31 = vld [vmem:[#allocation34_spill] sm:$0xff] }
 0x227   : > { %v3385_v25 = vadd.f32 %v3384_v17, %v3383_v62  ;;  %v3937_v26 = vmax.f32 %v3935_v7, %v3936_v56  ;;  %v2771_v15 = vmax.f32 %v2129_v48, 0.0  ;;  %v3164_v39 = vsel %vm1202_vm0, %v2769_v28, 0.0  ;;  %v7814_v17 = vld [vmem:[#allocation35_spill] sm:$0xff] }
 0x228   : > { %v3716_v53 = vsel %vm1202_vm0, %v2769_v28, -inf  ;;  %v3165_v9 = vadd.f32 %v3164_v39, %v3163_v42  ;;  %v3929_v47 = vrot.slane %v7244_v37, 4  ;;  %v2874_v12 = vmax.f32 %v2542_v24, 0.0 }
 0x229   : > { %v3387_v36 = vadd.f32 %v3386_v4, %v3385_v25  ;;  %v3939_v6 = vmax.f32 %v3937_v26, %v3938_v40  ;;  %v3717_v20 = vmax.f32 %v3715_v14, %v3716_v53  ;;  %v2534_v2 = vadd.f32 %v7275_v38, %v7812_v60 }
 0x22a   : > { %v2142_v34 = vadd.f32 %v7275_v38, %v7010_v32  ;;  %v3167_v62 = vadd.f32 %v3166_v61, %v3165_v9  ;;  %v3168_v54 = vsel %vm1202_vm0, %v2771_v15, 0.0  ;;  %v3720_v4 = vsel %vm1202_vm0, %v2771_v15, -inf }
 0x22b   : > { %v3719_v7 = vmax.f32 %v3717_v20, %v3718_v16  ;;  %v3389_v41 = vadd.f32 %v3388_v11, %v3387_v36  ;;  %v3941_v27 = vmax.f32 %v3939_v6, %v3940_v59  ;;  %v2872_v5 = vmax.f32 %v2534_v2, 0.0 }
 0x22c   : > { %v2545_v48 = vadd.f32 %v7275_v38, %v7813_v31  ;;  %v3169_v40 = vadd.f32 %v3168_v54, %v3167_v62  ;;  %v2134_v14 = vadd.f32 %v7275_v38, %v7018_v46  ;;  %v2537_v32 = vadd.f32 %v7275_v38, %v7814_v17 }
 0x22d   : > { %v3721_v42 = vmax.f32 %v3719_v7, %v3720_v4  ;;  %v3862_v61 = vrot.slane %v7249_v63, 2  ;;  %v3390_v56 = vsel %vm1202_vm0, %v2872_v5, 0.0  ;;  %v3942_v28 = vsel %vm1202_vm0, %v2872_v5, -inf }
 0x22e   : > { %v2774_v24 = vmax.f32 %v2142_v34, 0.0  ;;  %v7301_v16 = vadd.f32 %v3105_v58, %v7209_v23  ;;  %v7304_v11 = vmax.f32 %v7214_v57, %v3657_v43  ;;  %v3391_v25 = vadd.f32 %v3390_v56, %v3389_v41 }
 0x22f   : > { %v3943_v26 = vmax.f32 %v3941_v27, %v3942_v28  ;;  %v7307_v46 = vmax.f32 %v7244_v37, %v3929_v47  ;;  %v2875_v59 = vmax.f32 %v2545_v48, 0.0  ;;  %v2873_v15 = vmax.f32 %v2537_v32, 0.0 }
 0x230   : > { %v2145_v39 = vadd.f32 %v7275_v38, %v7021_v44  ;;  %v3394_v53 = vsel %vm1202_vm0, %v2874_v12, 0.0  ;;  %v3946_v36 = vsel %vm1202_vm0, %v2874_v12, -inf  ;;  %v2772_v6 = vmax.f32 %v2134_v14, 0.0 }
 0x231   : > { %v2137_v23 = vadd.f32 %v7275_v38, %v7026_v19  ;;  %v3179_v57 = vsel %vm1202_vm0, %v2774_v24, 0.0  ;;  %v3731_v58 = vsel %vm1202_vm0, %v2774_v24, -inf  ;;  %v3392_v37 = vsel %vm1202_vm0, %v2873_v15, 0.0 }
 0x232   : > { %v3944_v43 = vsel %vm1202_vm0, %v2873_v15, -inf  ;;  %v3170_v9 = vrot.slane %v3169_v40, 4  ;;  %v3722_v20 = vrot.slane %v3721_v42, 4  ;;  %v3393_v47 = vadd.f32 %v3392_v37, %v3391_v25 }
 0x233   : > { %v3945_v44 = vmax.f32 %v3943_v26, %v3944_v43  ;;  %v3396_v60 = vsel %vm1202_vm0, %v2875_v59, 0.0  ;;  %v3948_v12 = vsel %vm1202_vm0, %v2875_v59, -inf  ;;  %v2775_v2 = vmax.f32 %v2145_v39, 0.0  ;;  %v7816_v43 = vld [vmem:[#allocation37_spill] sm:$0xff] }
 0x234   : > { %v2773_v34 = vmax.f32 %v2137_v23, 0.0  ;;  %v3176_v19 = vsel %vm1202_vm0, %v2772_v6, 0.0  ;;  %v3395_v62 = vadd.f32 %v3394_v53, %v3393_v47  ;;  %v2558_v41 = vadd.f32 %v7275_v38, %v6726_v45 }
 0x235   : > { %v3947_v7 = vmax.f32 %v3945_v44, %v3946_v36  ;;  %v3728_v27 = vsel %vm1202_vm0, %v2772_v6, -inf  ;;  %v2550_v5 = vadd.f32 %v7275_v38, %v6738_v22  ;;  %v7329_v31 = vadd.f32 %v3170_v9, %v3169_v40  ;;  %v7817_v44 = vld [vmem:[#allocation19_spill] sm:$0xff] }
 0x236   : > { %v3177_v54 = vsel %vm1202_vm0, %v2773_v34, 0.0  ;;  %v3729_v4 = vsel %vm1202_vm0, %v2773_v34, -inf  ;;  %v7331_v48 = vmax.f32 %v3721_v42, %v3722_v20  ;;  %v3181_v32 = vsel %vm1202_vm0, %v2775_v2, 0.0  ;;  %v7815_v42 = vld [vmem:[#allocation36_spill] sm:$0xff] }
 0x237   : > { %v3178_v14 = vadd.f32 %v3177_v54, %v3176_v19  ;;  %v3730_v17 = vmax.f32 %v3728_v27, %v3729_v4  ;;  %v3733_v56 = vsel %vm1202_vm0, %v2775_v2, -inf  ;;  %v2876_v45 = vmax.f32 %v2550_v5, 0.0  ;;  %v7819_v19 = vld [vmem:[#allocation39_spill] sm:$0xff] }
 0x238   : > { %v3397_v28 = vadd.f32 %v3396_v60, %v3395_v62  ;;  %v2878_v26 = vmax.f32 %v2558_v41, 0.0  ;;  %v3949_v59 = vmax.f32 %v3947_v7, %v3948_v12  ;;  %v2158_v40 = vadd.f32 %v7275_v38, %v7041_v52  ;;  %v7818_v60 = vld [vmem:[#allocation21_spill] sm:$0xff] }
 0x239   : > { %v3180_v24 = vadd.f32 %v3179_v57, %v3178_v14  ;;  %v3732_v25 = vmax.f32 %v3730_v17, %v3731_v58  ;;  %v3398_v15 = vsel %vm1202_vm0, %v2876_v45, 0.0  ;;  %v3950_v22 = vsel %vm1202_vm0, %v2876_v45, -inf }
 0x23a   : > { %v2561_v39 = vadd.f32 %v7275_v38, %v7815_v42  ;;  %v3399_v53 = vadd.f32 %v3398_v15, %v3397_v28  ;;  %v3951_v36 = vmax.f32 %v3949_v59, %v3950_v22  ;;  %v2150_v6 = vadd.f32 %v7275_v38, %v7045_v10 }
 0x23b   : > { %v3182_v23 = vadd.f32 %v3181_v32, %v3180_v24  ;;  %v3172_v57 = vrot.slane %v7329_v31, 2  ;;  %v2778_v58 = vmax.f32 %v2158_v40, 0.0  ;;  %v3734_v37 = vmax.f32 %v3732_v25, %v3733_v56 }
 0x23c   : > { %v2553_v9 = vadd.f32 %v7275_v38, %v7816_v43  ;;  %v2879_v20 = vmax.f32 %v2561_v39, 0.0  ;;  %v2776_v47 = vmax.f32 %v2150_v6, 0.0  ;;  %v2161_v52 = vadd.f32 %v7275_v38, %v7817_v44 }
 0x23d   : > { %v2153_v12 = vadd.f32 %v7275_v38, %v7818_v60  ;;  %v3402_v2 = vsel %vm1202_vm0, %v2878_v26, 0.0  ;;  %v3954_v10 = vsel %vm1202_vm0, %v2878_v26, -inf  ;;  %v3187_v34 = vsel %vm1202_vm0, %v2778_v58, 0.0 }
 0x23e   : > { %v2574_v62 = vadd.f32 %v7275_v38, %v7819_v19  ;;  %v3183_v7 = vsel %vm1202_vm0, %v2776_v47, 0.0  ;;  %v3735_v41 = vsel %vm1202_vm0, %v2776_v47, -inf  ;;  %v2877_v27 = vmax.f32 %v2553_v9, 0.0 }
 0x23f   : > { %v2779_v54 = vmax.f32 %v2161_v52, 0.0  ;;  %v3739_v4 = vsel %vm1202_vm0, %v2778_v58, -inf  ;;  %v3184_v5 = vadd.f32 %v3183_v7, %v3182_v23  ;;  %v3736_v14 = vmax.f32 %v3734_v37, %v3735_v41  ;;  %v7820_v23 = vld [vmem:[#allocation40_spill] sm:$0xff] }
 0x240   : > { %v2777_v17 = vmax.f32 %v2153_v12, 0.0  ;;  %v3404_v32 = vsel %vm1202_vm0, %v2879_v20, 0.0  ;;  %v3956_v56 = vsel %vm1202_vm0, %v2879_v20, -inf  ;;  %v3400_v45 = vsel %vm1202_vm0, %v2877_v27, 0.0 }
 0x241   : > { %v3952_v28 = vsel %vm1202_vm0, %v2877_v27, -inf  ;;  %v3401_v24 = vadd.f32 %v3400_v45, %v3399_v53  ;;  %v3189_v15 = vsel %vm1202_vm0, %v2779_v54, 0.0  ;;  %v2882_v42 = vmax.f32 %v2574_v62, 0.0 }
 0x242   : > { %v3953_v25 = vmax.f32 %v3951_v36, %v3952_v28  ;;  %v3185_v26 = vsel %vm1202_vm0, %v2777_v17, 0.0  ;;  %v3737_v59 = vsel %vm1202_vm0, %v2777_v17, -inf  ;;  %v2566_v58 = vadd.f32 %v7275_v38, %v7820_v23  ;;  %v7821_v36 = vld [vmem:[#allocation41_spill] sm:$0xff] }
 0x243   : > { %v3186_v22 = vadd.f32 %v3185_v26, %v3184_v5  ;;  %v3738_v40 = vmax.f32 %v3736_v14, %v3737_v59  ;;  %v3403_v39 = vadd.f32 %v3402_v2, %v3401_v24  ;;  %v2174_v37 = vadd.f32 %v7275_v38, %v7079_v35  ;;  %v7822_v14 = vld [vmem:[#allocation42_spill] sm:$0xff] }
 0x244   : > { %v3955_v6 = vmax.f32 %v3953_v25, %v3954_v10  ;;  %v2577_v9 = vadd.f32 %v7275_v38, %v7821_v36  ;;  %v2166_v20 = vadd.f32 %v7275_v38, %v7084_v49  ;;  %v3741_v47 = vsel %vm1202_vm0, %v2779_v54, -inf }
 0x245   : > { %v3188_v43 = vadd.f32 %v3187_v34, %v3186_v22  ;;  %v3740_v53 = vmax.f32 %v3738_v40, %v3739_v4  ;;  %v2880_v44 = vmax.f32 %v2566_v58, 0.0  ;;  %v3405_v52 = vadd.f32 %v3404_v32, %v3403_v39 }
 0x246   : > { %v3957_v60 = vmax.f32 %v3955_v6, %v3956_v56  ;;  %v2782_v12 = vmax.f32 %v2174_v37, 0.0  ;;  %v2780_v2 = vmax.f32 %v2166_v20, 0.0  ;;  %v3724_v62 = vrot.slane %v7331_v48, 2  ;;  %v7825_v37 = vld [vmem:[#allocation23_spill] sm:$0xff] }
 0x247   : > { %v3190_v10 = vadd.f32 %v3189_v15, %v3188_v43  ;;  %v3742_v19 = vmax.f32 %v3740_v53, %v3741_v47  ;;  %v3406_v35 = vsel %vm1202_vm0, %v2880_v44, 0.0  ;;  %v3958_v34 = vsel %vm1202_vm0, %v2880_v44, -inf  ;;  %v7823_v15 = vld [vmem:[#allocation47_spill] sm:$0xff] }
 0x248   : > { %v2883_v7 = vmax.f32 %v2577_v9, 0.0  ;;  %v3410_v41 = vsel %vm1202_vm0, %v2882_v42, 0.0  ;;  %v3962_v49 = vsel %vm1202_vm0, %v2882_v42, -inf  ;;  %v3407_v27 = vadd.f32 %v3406_v35, %v3405_v52 }
 0x249   : > { %v3959_v54 = vmax.f32 %v3957_v60, %v3958_v34  ;;  %v3191_v4 = vsel %vm1202_vm0, %v2780_v2, 0.0  ;;  %v3743_v5 = vsel %vm1202_vm0, %v2780_v2, -inf  ;;  %v2569_v17 = vadd.f32 %v7275_v38, %v7822_v14  ;;  %v7826_v60 = vld [vmem:[#allocation49_spill] sm:$0xff] }
 0x24a   : > { %v2177_v32 = vadd.f32 %v7275_v38, %v7087_v55  ;;  %v3195_v56 = vsel %vm1202_vm0, %v2782_v12, 0.0  ;;  %v3192_v45 = vadd.f32 %v3191_v4, %v3190_v10  ;;  %v3744_v28 = vmax.f32 %v3742_v19, %v3743_v5  ;;  %v7824_v55 = vld [vmem:[#allocation48_spill] sm:$0xff] }
 0x24b   : > { %v2169_v24 = vadd.f32 %v7275_v38, %v7091_v0  ;;  %v3747_v25 = vsel %vm1202_vm0, %v2782_v12, -inf  ;;  %v3412_v26 = vsel %vm1202_vm0, %v2883_v7, 0.0  ;;  %v2881_v59 = vmax.f32 %v2569_v17, 0.0 }
 0x24c   : > { %v2590_v22 = vadd.f32 %v7275_v38, %v7823_v15  ;;  %v3964_v40 = vsel %vm1202_vm0, %v2883_v7, -inf  ;;  %v2783_v42 = vmax.f32 %v2177_v32, 0.0  ;;  %v2582_v6 = vadd.f32 %v7275_v38, %v7824_v55 }
 0x24d   : > { %v2781_v39 = vmax.f32 %v2169_v24, 0.0  ;;  %v3408_v23 = vsel %vm1202_vm0, %v2881_v59, 0.0  ;;  %v3960_v58 = vsel %vm1202_vm0, %v2881_v59, -inf  ;;  %v2190_v0 = vadd.f32 %v7275_v38, %v7111_v1  ;;  %v7827_v59 = vld [vmem:[#allocation50_spill] sm:$0xff] }
 0x24e   : > { %v2182_v43 = vadd.f32 %v7275_v38, %v7825_v37  ;;  %v3409_v53 = vadd.f32 %v3408_v23, %v3407_v27  ;;  %v3961_v36 = vmax.f32 %v3959_v54, %v3960_v58  ;;  %v2886_v52 = vmax.f32 %v2590_v22, 0.0  ;;  %v7828_v22 = vld [vmem:[#allocation25_spill] sm:$0xff] }
 0x24f   : > { %v3193_v9 = vsel %vm1202_vm0, %v2781_v39, 0.0  ;;  %v3745_v20 = vsel %vm1202_vm0, %v2781_v39, -inf  ;;  %v2593_v12 = vadd.f32 %v7275_v38, %v7826_v60  ;;  %v3197_v19 = vsel %vm1202_vm0, %v2783_v42, 0.0 }
 0x250   : > { %v3194_v47 = vadd.f32 %v3193_v9, %v3192_v45  ;;  %v3746_v44 = vmax.f32 %v3744_v28, %v3745_v20  ;;  %v3411_v2 = vadd.f32 %v3410_v41, %v3409_v53  ;;  %v3963_v10 = vmax.f32 %v3961_v36, %v3962_v49 }
 0x251   : > { %v2884_v1 = vmax.f32 %v2582_v6, 0.0  ;;  %v2786_v7 = vmax.f32 %v2190_v0, 0.0  ;;  %v2784_v27 = vmax.f32 %v2182_v43, 0.0  ;;  %v3749_v17 = vsel %vm1202_vm0, %v2783_v42, -inf  ;;  %v7829_v6 = vld [vmem:[#allocation13_spill] sm:$0xff]  ;;  %v7830_v43 = vld [vmem:[#allocation12_spill] sm:$0xff] }
 0x252   : > { %v3196_v35 = vadd.f32 %v3195_v56, %v3194_v47  ;;  %v3748_v34 = vmax.f32 %v3746_v44, %v3747_v25  ;;  %v3413_v54 = vadd.f32 %v3412_v26, %v3411_v2  ;;  %v3965_v5 = vmax.f32 %v3963_v10, %v3964_v40 }
 0x253   : > { %v3414_v4 = vsel %vm1202_vm0, %v2884_v1, 0.0  ;;  %v3966_v14 = vsel %vm1202_vm0, %v2884_v1, -inf  ;;  %v3418_v32 = vsel %vm1202_vm0, %v2886_v52, 0.0  ;;  %v3970_v41 = vsel %vm1202_vm0, %v2886_v52, -inf }
 0x254   : > { %v2887_v49 = vmax.f32 %v2593_v12, 0.0  ;;  %v3415_v45 = vadd.f32 %v3414_v4, %v3413_v54  ;;  %v3967_v28 = vmax.f32 %v3965_v5, %v3966_v14  ;;  %v3198_v24 = vadd.f32 %v3197_v19, %v3196_v35 }
 0x255   : > { %v3199_v56 = vsel %vm1202_vm0, %v2784_v27, 0.0  ;;  %v3750_v25 = vmax.f32 %v3748_v34, %v3749_v17  ;;  %v3751_v26 = vsel %vm1202_vm0, %v2784_v27, -inf  ;;  %v2585_v15 = vadd.f32 %v7275_v38, %v7827_v59 }
 0x256   : > { %v2193_v40 = vadd.f32 %v7275_v38, %v7828_v22  ;;  %v3203_v42 = vsel %vm1202_vm0, %v2786_v7, 0.0  ;;  %v3200_v39 = vadd.f32 %v3199_v56, %v3198_v24  ;;  %v2185_v55 = vadd.f32 %v7275_v38, %v7124_v50 }
 0x257   : > { %v2598_v23 = vadd.f32 %v7275_v38, %v7829_v6  ;;  %v3755_v58 = vsel %vm1202_vm0, %v2786_v7, -inf  ;;  %v3752_v0 = vmax.f32 %v3750_v25, %v3751_v26  ;;  %v2885_v37 = vmax.f32 %v2585_v15, 0.0  ;;  %v7831_v7 = vld [vmem:[#allocation14_spill] sm:$0xff]  ;;  %v7832_v25 = vld [vmem:[#allocation15_spill] sm:$0xff] }
 0x258   : > { %v2606_v53 = vadd.f32 %v7275_v38, %v7830_v43  ;;  %v3420_v36 = vsel %vm1202_vm0, %v2887_v49, 0.0  ;;  %v3972_v9 = vsel %vm1202_vm0, %v2887_v49, -inf  ;;  %v2787_v20 = vmax.f32 %v2193_v40, 0.0 }
 0x259   : > { %v2785_v47 = vmax.f32 %v2185_v55, 0.0  ;;  %v3416_v44 = vsel %vm1202_vm0, %v2885_v37, 0.0  ;;  %v3968_v50 = vsel %vm1202_vm0, %v2885_v37, -inf  ;;  %v2888_v52 = vmax.f32 %v2598_v23, 0.0  ;;  %v7833_v37 = vld [vmem:[#allocation16_spill] sm:$0xff] }
 0x25a   : > { %v2206_v60 = vadd.f32 %v7275_v38, %v7143_v30  ;;  %v3417_v12 = vadd.f32 %v3416_v44, %v3415_v45  ;;  %v3969_v2 = vmax.f32 %v3967_v28, %v3968_v50  ;;  %v2890_v34 = vmax.f32 %v2606_v53, 0.0  ;;  %v7834_v53 = vld [vmem:[#allocation17_spill] sm:$0xff] }
 0x25b   : > { %v3201_v10 = vsel %vm1202_vm0, %v2785_v47, 0.0  ;;  %v3753_v19 = vsel %vm1202_vm0, %v2785_v47, -inf  ;;  %v2609_v27 = vadd.f32 %v7275_v38, %v7831_v7  ;;  %v3205_v5 = vsel %vm1202_vm0, %v2787_v20, 0.0 }
 0x25c   : > { %v3202_v1 = vadd.f32 %v3201_v10, %v3200_v39  ;;  %v3754_v35 = vmax.f32 %v3752_v0, %v3753_v19  ;;  %v3419_v54 = vadd.f32 %v3418_v32, %v3417_v12  ;;  %v3971_v4 = vmax.f32 %v3969_v2, %v3970_v41 }
 0x25d   : > { %v3757_v14 = vsel %vm1202_vm0, %v2787_v20, -inf  ;;  %v3422_v49 = vsel %vm1202_vm0, %v2888_v52, 0.0  ;;  %v3974_v45 = vsel %vm1202_vm0, %v2888_v52, -inf  ;;  %v2198_v56 = vadd.f32 %v7275_v38, %v7145_v13 }
 0x25e   : > { %v3204_v17 = vadd.f32 %v3203_v42, %v3202_v1  ;;  %v3756_v30 = vmax.f32 %v3754_v35, %v3755_v58  ;;  %v3421_v28 = vadd.f32 %v3420_v36, %v3419_v54  ;;  %v3973_v24 = vmax.f32 %v3971_v4, %v3972_v9 }
 0x25f   : > { %v2601_v26 = vadd.f32 %v7275_v38, %v7832_v25  ;;  %v3426_v32 = vsel %vm1202_vm0, %v2890_v34, 0.0  ;;  %v3978_v41 = vsel %vm1202_vm0, %v2890_v34, -inf  ;;  %v2790_v59 = vmax.f32 %v2206_v60, 0.0 }
 0x260   : > { %v2891_v15 = vmax.f32 %v2609_v27, 0.0  ;;  %v3423_v22 = vadd.f32 %v3422_v49, %v3421_v28  ;;  %v3975_v40 = vmax.f32 %v3973_v24, %v3974_v45  ;;  %v2788_v42 = vmax.f32 %v2198_v56, 0.0 }
 0x261   : > { %v3206_v39 = vadd.f32 %v3205_v5, %v3204_v17  ;;  %v3758_v55 = vmax.f32 %v3756_v30, %v3757_v14  ;;  %v2889_v6 = vmax.f32 %v2601_v26, 0.0  ;;  %v2209_v23 = vadd.f32 %v7275_v38, %v7151_v51  ;;  %v7835_v30 = vld [vmem:[#allocation51_spill] sm:$0xff] }
 0x262   : > { %v2201_v13 = vadd.f32 %v7275_v38, %v7158_v33  ;;  %v3207_v58 = vsel %vm1202_vm0, %v2788_v42, 0.0  ;;  %v3759_v0 = vsel %vm1202_vm0, %v2788_v42, -inf  ;;  %v2622_v43 = vadd.f32 %v7275_v38, %v7833_v37  ;;  %v7836_v42 = vld [vmem:[#allocation18_spill] sm:$0xff] }
 0x263   : > { %v2614_v36 = vadd.f32 %v7275_v38, %v7834_v53  ;;  %v3208_v9 = vadd.f32 %v3207_v58, %v3206_v39  ;;  %v3760_v20 = vmax.f32 %v3758_v55, %v3759_v0  ;;  %v3424_v47 = vsel %vm1202_vm0, %v2889_v6, 0.0  ;;  %v7837_v58 = vld [vmem:[#allocation22_spill] sm:$0xff] }
 0x264   : > { %v3976_v44 = vsel %vm1202_vm0, %v2889_v6, -inf  ;;  %v7460_v51 = vadd.f32 %v3172_v57, %v7329_v31  ;;  %v3425_v33 = vadd.f32 %v3424_v47, %v3423_v22  ;;  %v2789_v52 = vmax.f32 %v2201_v13, 0.0  ;;  %v7838_v47 = vld [vmem:[#allocation20_spill] sm:$0xff] }
 0x265   : > { %v3977_v50 = vmax.f32 %v3975_v40, %v3976_v44  ;;  %v7465_v60 = vmax.f32 %v7331_v48, %v3724_v62  ;;  %v3211_v12 = vsel %vm1202_vm0, %v2790_v59, 0.0  ;;  %v3428_v2 = vsel %vm1202_vm0, %v2891_v15, 0.0 }
 0x266   : > { %v2892_v10 = vmax.f32 %v2614_v36, 0.0  ;;  %v3980_v19 = vsel %vm1202_vm0, %v2891_v15, -inf  ;;  %v3427_v1 = vadd.f32 %v3426_v32, %v3425_v33  ;;  %v2791_v34 = vmax.f32 %v2209_v23, 0.0 }
 0x267   : > { %v3979_v35 = vmax.f32 %v3977_v50, %v3978_v41  ;;  %v3209_v31 = vsel %vm1202_vm0, %v2789_v52, 0.0  ;;  %v3761_v57 = vsel %vm1202_vm0, %v2789_v52, -inf  ;;  %v2894_v7 = vmax.f32 %v2622_v43, 0.0 }
 0x268   : > { %v2222_v27 = vadd.f32 %v7275_v38, %v7183_v18  ;;  %v3210_v48 = vadd.f32 %v3209_v31, %v3208_v9  ;;  %v3762_v62 = vmax.f32 %v3760_v20, %v3761_v57  ;;  %v3429_v54 = vadd.f32 %v3428_v2, %v3427_v1  ;;  %v7839_v31 = vld [vmem:[#allocation52_spill] sm:$0xff] }
 0x269   : > { %v3430_v4 = vsel %vm1202_vm0, %v2892_v10, 0.0  ;;  %v3763_v5 = vsel %vm1202_vm0, %v2790_v59, -inf  ;;  %v3981_v14 = vmax.f32 %v3979_v35, %v3980_v19  ;;  %v3982_v17 = vsel %vm1202_vm0, %v2892_v10, -inf }
 0x26a   : > { %v2625_v49 = vadd.f32 %v7275_v38, %v7835_v30  ;;  %v3212_v45 = vadd.f32 %v3211_v12, %v3210_v48  ;;  %v3764_v28 = vmax.f32 %v3762_v62, %v3763_v5  ;;  %v3431_v24 = vadd.f32 %v3430_v4, %v3429_v54 }
 0x26b   : > { %v2214_v56 = vadd.f32 %v7275_v38, %v7185_v8  ;;  %v3213_v18 = vsel %vm1202_vm0, %v2791_v34, 0.0  ;;  %v3765_v25 = vsel %vm1202_vm0, %v2791_v34, -inf  ;;  %v3983_v26 = vmax.f32 %v3981_v14, %v3982_v17 }
 0x26c   : > { %v2794_v32 = vmax.f32 %v2222_v27, 0.0  ;;  %v3434_v41 = vsel %vm1202_vm0, %v2894_v7, 0.0  ;;  %v3214_v15 = vadd.f32 %v3213_v18, %v3212_v45  ;;  %v3766_v22 = vmax.f32 %v3764_v28, %v3765_v25  ;;  %v7840_v45 = vld [vmem:[#allocation53_spill] sm:$0xff] }
 0x26d   : > { %v2792_v59 = vmax.f32 %v2214_v56, 0.0  ;;  %v2895_v40 = vmax.f32 %v2625_v49, 0.0  ;;  %v2617_v39 = vadd.f32 %v7275_v38, %v7836_v42  ;;  %v2225_v55 = vadd.f32 %v7275_v38, %v7194_v3  ;;  %v7843_v42 = vld [vmem:[#allocation4_spill] sm:$0xff] }
 0x26e   : > { %v2217_v8 = vadd.f32 %v7275_v38, %v7199_v29  ;;  %v3986_v6 = vsel %vm1202_vm0, %v2894_v7, -inf  ;;  %v2630_v0 = vadd.f32 %v7275_v38, %v7837_v58  ;;  %v3219_v37 = vsel %vm1202_vm0, %v2794_v32, 0.0  ;;  %v7845_v58 = vld [vmem:[#allocation8_spill] sm:$0xff] }
 0x26f   : > { %v3215_v23 = vsel %vm1202_vm0, %v2792_v59, 0.0  ;;  %v3767_v13 = vsel %vm1202_vm0, %v2792_v59, -inf  ;;  %v2893_v36 = vmax.f32 %v2617_v39, 0.0  ;;  %v3771_v9 = vsel %vm1202_vm0, %v2794_v32, -inf }
 0x270   : > { %v3216_v43 = vadd.f32 %v3215_v23, %v3214_v15  ;;  %v3768_v53 = vmax.f32 %v3766_v22, %v3767_v13  ;;  %v2795_v3 = vmax.f32 %v2225_v55, 0.0  ;;  %v2793_v20 = vmax.f32 %v2217_v8, 0.0  ;;  %v7841_v15 = vld [vmem:[#allocation6_spill] sm:$0xff] }
 0x271   : > { %v2638_v29 = vadd.f32 %v7275_v38, %v7838_v47  ;;  %v3436_v44 = vsel %vm1202_vm0, %v2895_v40, 0.0  ;;  %v3432_v33 = vsel %vm1202_vm0, %v2893_v36, 0.0  ;;  %v3984_v50 = vsel %vm1202_vm0, %v2893_v36, -inf }
 0x272   : > { %v2896_v52 = vmax.f32 %v2630_v0, 0.0  ;;  %v3433_v12 = vadd.f32 %v3432_v33, %v3431_v24  ;;  %v3985_v2 = vmax.f32 %v3983_v26, %v3984_v50  ;;  %v3217_v10 = vsel %vm1202_vm0, %v2793_v20, 0.0 }
 0x273   : > { %v3769_v19 = vsel %vm1202_vm0, %v2793_v20, -inf  ;;  %v3988_v1 = vsel %vm1202_vm0, %v2895_v40, -inf  ;;  %v3218_v35 = vadd.f32 %v3217_v10, %v3216_v43  ;;  %v2641_v57 = vadd.f32 %v7275_v38, %v7839_v31  ;;  %v7842_v40 = vld [vmem:[#allocation3_spill] sm:$0xff]  ;;  %v7846_v20 = vld [vmem:[#allocation5_spill] sm:$0xff] }
 0x274   : > { %v3770_v34 = vmax.f32 %v3768_v53, %v3769_v19  ;;  %v3435_v7 = vadd.f32 %v3434_v41, %v3433_v12  ;;  %v3987_v27 = vmax.f32 %v3985_v2, %v3986_v6  ;;  %v3221_v48 = vsel %vm1202_vm0, %v2795_v3, 0.0  ;;  %v7847_v12 = vld [vmem:[#allocation44_spill] sm:$0xff]  ;;  %v7848_v2 = vld [vmem:[#allocation46_spill] sm:$0xff]  ;;  %v7849_v19 = vld [vmem:[#allocation7_spill] sm:$0xff] }
 0x275   : > { %v2898_v62 = vmax.f32 %v2638_v29, 0.0  ;;  %v3220_v54 = vadd.f32 %v3219_v37, %v3218_v35  ;;  %v3438_v5 = vsel %vm1202_vm0, %v2896_v52, 0.0  ;;  %v3990_v14 = vsel %vm1202_vm0, %v2896_v52, -inf }
 0x276   : > { %v3772_v4 = vmax.f32 %v3770_v34, %v3771_v9  ;;  %v3773_v17 = vsel %vm1202_vm0, %v2795_v3, -inf  ;;  %v3437_v30 = vadd.f32 %v3436_v44, %v3435_v7  ;;  %v3989_v49 = vmax.f32 %v3987_v27, %v3988_v1  ;;  %v7851_v7 = vld [vmem:[#allocation45_spill] sm:$0xff]  ;;  %v7852_v27 = vld [vmem:[#allocation10_spill] sm:$0xff] }
 0x277   : > { %v2633_v28 = vadd.f32 %v7275_v38, %v7840_v45  ;;  %v3174_v24 = vrot.slane %v7460_v51, 1  ;;  %v3726_v56 = vrot.slane %v7465_v60, 1  ;;  %v3222_v18 = vadd.f32 %v3221_v48, %v3220_v54 }
 0x278   : > { %v3774_v25 = vmax.f32 %v3772_v4, %v3773_v17  ;;  %v3439_v26 = vadd.f32 %v3438_v5, %v3437_v30  ;;  %v3991_v32 = vmax.f32 %v3989_v49, %v3990_v14  ;;  %v2899_v41 = vmax.f32 %v2641_v57, 0.0 }
 0x279   : > { %v2897_v59 = vmax.f32 %v2633_v28, 0.0  ;;  %v3224_v22 = vadd.f32 %v7841_v15, %v3222_v18  ;;  %v7844_v39 = vmax.f32 %v7842_v40, %v7843_v42  ;;  %v3442_v8 = vsel %vm1202_vm0, %v2898_v62, 0.0 }
 0x27a   : > { %v3994_v38 = vsel %vm1202_vm0, %v2898_v62, -inf  ;;  %v3931_v13 = vrot.slane %v7307_v46, 2  ;;  %v3444_v36 = vsel %vm1202_vm0, %v2899_v41, 0.0  ;;  %v3996_v9 = vsel %vm1202_vm0, %v2899_v41, -inf }
 0x27b   : > { %v3790_v55 = vmax.f32 %v7844_v39, %v3774_v25  ;;  %v3440_v6 = vsel %vm1202_vm0, %v2897_v59, 0.0  ;;  %v3992_v23 = vsel %vm1202_vm0, %v2897_v59, -inf  ;;  %v3226_v0 = vadd.f32 %v7845_v58, %v3224_v22  ;;  %v7857_v22 = vld [vmem:[#allocation2_spill] sm:$0xff] }
 0x27c   : > { %v3441_v37 = vadd.f32 %v3440_v6, %v3439_v26  ;;  %v3993_v43 = vmax.f32 %v3991_v32, %v3992_v23  ;;  %v3863_v3 = vmax.f32 %v7249_v63, %v3862_v61  ;;  %v3727_v50 = vmax.f32 %v7465_v60, %v3726_v56  ;;  %v7850_v60 = vld [vmem:[#allocation43_spill] sm:$0xff]  ;;  %v7854_v56 = vld [vmem:[#allocation38_spill] sm:$0xff]  ;;  %v7856_v32 = vld [vmem:[#allocation9_spill] sm:$0xff] }
 0x27d   : > { %v3791_v53 = vrot.slane %v3790_v55, 4  ;;  %v3228_v47 = vadd.f32 %v7846_v20, %v3226_v0  ;;  %v3932_v52 = vmax.f32 %v7307_v46, %v3931_v13  ;;  %v4035_v10 = vsel %vm4012_vm1, %v7848_v2, %v7847_v12 }
 0x27e   : > { %v3443_v29 = vadd.f32 %v3442_v8, %v3441_v37  ;;  %v3995_v44 = vmax.f32 %v3993_v43, %v3994_v38  ;;  %v3377_v61 = vrot.slane %v7242_v21, 4  ;;  %v3175_v31 = vadd.f32 %v3174_v24, %v7460_v51  ;;  %v5570_v51 = vld [vmem:[%s7706_s3 + $0xc] ss:$16 sps:$4 sm:$0xff]  }
 0x27f   : > { %v3792_v33 = vmax.f32 %v3790_v55, %v3791_v53  ;;  %v3230_v1 = vadd.f32 %v7849_v19, %v3228_v47  ;;  %v4036_v57 = vsel %vm4014_vm2, %v7304_v11, %v4035_v10  ;;  %v4013_v46 = vsel %vm4012_vm1, %v7851_v7, %v7850_v60  ;;  %v7853_v11 = vld [vmem:[#allocation11_spill] sm:$0xff]  ;;  %4210 = vmatprep.subr.bf16.mxu1 %v5570_v51 }
 0x280   : > { %v3445_v35 = vadd.f32 %v3444_v36, %v3443_v29  ;;  %v3997_v34 = vmax.f32 %v3995_v44, %v3996_v9  ;;  %v3864_v4 = vrot.slane %v3863_v3, 1  ;;  %v4037_v14 = vsel %vm4016_vm3, %v3727_v50, %v4036_v57  ;;  %v5568_v7 = vld [vmem:[%s7706_s3 + $0x8] ss:$16 sps:$4 sm:$0xff]  }
 0x281   : > { %v3793_v63 = vrot.slane %v3792_v33, 2  ;;  %v3232_v48 = vadd.f32 %v7852_v27, %v3230_v1  ;;  %v4015_v17 = vsel %vm4014_vm2, %v7301_v16, %v4013_v46  ;;  %v3933_v45 = vrot.slane %v3932_v52, 1  ;;  %v5573_v27 = vld [vmem:[%s7706_s3 + $0x2c] ss:$16 sps:$4 sm:$0xff]  }
 0x282   : > { %v3998_v62 = vrot.slane %v3997_v34, 4  ;;  %v3446_v5 = vrot.slane %v3445_v35, 4  ;;  %v5623_v24 = vmov 0   ;;  %v7855_v18 = vrot.slane %v7854_v56, 4  ;;  %v5582_v51 = vld [vmem:[%s7708_s5 + $0x48] sm:$0xff]  }
 0x283   : > { %v3794_v54 = vmax.f32 %v3792_v33, %v3793_v63  ;;  %v3234_v30 = vadd.f32 %v7853_v11, %v3232_v48  ;;  %4201 = vmatprep.mubr.bf16.mxu1 %v5623_v24  ;;  %v3378_v26 = vadd.f32 %v3377_v61, %v7242_v21  ;;  %v4017_v16 = vsel %vm4016_vm3, %v3175_v31, %v4015_v17  ;;  %v5571_v48 = vld [vmem:[%s7706_s3 + $0x28] ss:$16 sps:$4 sm:$0xff]   ;;  %v5581_v17 = vld [vmem:[%s7708_s5] sm:$0xff]  }
 0x284   : > { %v3999_v28 = vmax.f32 %v3997_v34, %v3998_v62  ;;  %v3309_v25 = vadd.f32 %v7855_v18, %v7854_v56  ;;  %v7858_v40 = vmax.f32 %v7857_v22, 0.0  ;;  %v3447_v39 = vadd.f32 %v3446_v5, %v3445_v35  ;;  %v5576_v62 = vld [vmem:[%s7706_s3 + $0x4c] ss:$16 sps:$4 sm:$0xff]   ;;  %v5577_v5 = vld [vmem:[%s7706_s3 + $0x68] ss:$16 sps:$4 sm:$0xff]   ;;  %v5589_v56 = vld [vmem:[%s7708_s5 + $0x20] sm:$0xff]  }
 0x285   : > { %v3795_v49 = vrot.slane %v3794_v54, 1  ;;  %v3236_v41 = vadd.f32 %v7856_v32, %v3234_v30  ;;  %v3865_v55 = vmax.f32 %v3863_v3, %v3864_v4  ;;  %v3934_v8 = vmax.f32 %v3932_v52, %v3933_v45  ;;  %v5579_v4 = vld [vmem:[%s7706_s3 + $0x6c] ss:$16 sps:$4 sm:$0xff]   ;;  %v5584_v30 = vld [vmem:[%s7708_s5 + $0x50] sm:$0xff]  }
 0x286   : > { %v4000_v15 = vrot.slane %v3999_v28, 2  ;;  %v3237_v42 = vsel %vm1202_vm0, %v7858_v40, 0.0  ;;  %v3310_v23 = vrot.slane %v3309_v25, 2  ;;  %v3379_v58 = vrot.slane %v3378_v26, 2  ;;  %v5583_v11 = vld [vmem:[%s7708_s5 + $0x8] sm:$0xff]   ;;  %v5586_v45 = vld [vmem:[%s7708_s5 + $0x58] sm:$0xff]  }
 0x287   : > { %v3796_v59 = vmax.f32 %v3794_v54, %v3795_v49  ;;  %v3238_v6 = vadd.f32 %v3237_v42, %v3236_v41  ;;  %v3448_v53 = vrot.slane %v3447_v39, 2  ;;  %v5574_v54 = vld [vmem:[%s7706_s3 + $0x48] ss:$16 sps:$4 sm:$0xff]   ;;  %v5585_v49 = vld [vmem:[%s7708_s5 + $0x10] sm:$0xff]   ;;  %v4063_v42 = vld [vmem:[%s7707_s4] sm:$0xf] }
 0x288   : > { %v4001_v38 = vmax.f32 %v3999_v28, %v4000_v15  ;;  %v3311_v20 = vadd.f32 %v3310_v23, %v3309_v25  ;;  %v3380_v3 = vadd.f32 %v3379_v58, %v3378_v26  ;;  %v5587_v28 = vld [vmem:[%s7708_s5 + $0x18] sm:$0xff]   ;;  %v5590_v18 = vld [vmem:[%s7708_s5 + $0x68] sm:$0xff]   ;;  %v5592_v26 = vld [vmem:[%s7708_s5 + $0x70] sm:$0xff]   ;;  %v4065_v15 = vlaneseq }
 0x289   : > { %v4038_v21 = vsel %vm4018_vm4, %v3796_v59, %v4037_v14  ;;  %v3239_v43 = vrot.slane %v3238_v6, 4  ;;  %v3449_v44 = vadd.f32 %v3448_v53, %v3447_v39  ;;  %v5580_v14 = vld [vmem:[%s7708_s5 + $0x40] sm:$0xff]   ;;  %v5591_v25 = vld [vmem:[%s7708_s5 + $0x28] sm:$0xff]   ;;  %v5594_v32 = vld [vmem:[%s7708_s5 + $0x78] sm:$0xff]  }
 0x28a   : > { %v4039_v13 = vsel %vm4020_vm5, %v3865_v55, %v4038_v21  ;;  %v4002_v0 = vrot.slane %v4001_v38, 1  ;;  %v3312_v50 = vrot.slane %v3311_v20, 1  ;;  %v3381_v12 = vrot.slane %v3380_v3, 1  ;;  %v5595_v41 = vld [vmem:[%s7708_s5 + $0x38] sm:$0xff]   ;;  %v5596_v59 = vld [vmem:[%s7708_s5 + $0xc0] sm:$0xff]  }
 0x28b   : > { %v4040_v37 = vsel %vm4022_vm6, %v3934_v8, %v4039_v13  ;;  %v3240_v9 = vadd.f32 %v3239_v43, %v3238_v6  ;;  %v3450_v2 = vrot.slane %v3449_v44, 1  ;;  %v4066_v22 = vshrl.u32 %v4065_v15, 7  ;;  %v5597_v53 = vld [vmem:[%s7708_s5 + $0x80] sm:$0xff]  }
 0x28c   : > { %v4003_v36 = vmax.f32 %v4001_v38, %v4002_v0  ;;  %v3313_v19 = vadd.f32 %v3312_v50, %v3311_v20  ;;  %v3382_v1 = vadd.f32 %v3381_v12, %v3380_v3  ;;  %v5599_v20 = vld [vmem:[%s7708_s5 + $0x88] sm:$0xff]  }
 0x28d   : > { %v3241_v29 = vrot.slane %v3240_v9, 2  ;;  %v3451_v34 = vadd.f32 %v3450_v2, %v3449_v44  ;;  %v4067_v40 = vsub.s32 0, %v4066_v22  ;;  %v4071_v39 = vsub.s32 1, %v4066_v22  ;;  %v5601_v44 = vld [vmem:[%s7708_s5 + $0x90] sm:$0xff]  }
 0x28e   : > { %v4041_v47 = vsel %vm4024_vm7, %v4003_v36, %v4040_v37  ;;  %v4079_v3 = vsub.s32 3, %v4066_v22 }
 0x28f   : > { %4042 = vrot.lane.b32.xlu0 %v4041_v47, %s5624_s17  ;;  %v3242_v33 = vadd.f32 %v3241_v29, %v3240_v9  ;;  %v4068_v55 = vrot.slane %v4063_v42, %v4067_v40  ;;  %v4072_v8 = vrot.slane %v4063_v42, %v4071_v39  ;;  %v5598_v9 = vld [vmem:[%s7708_s5 + $0xc8] sm:$0xff]   ;;  %v5600_v47 = vld [vmem:[%s7708_s5 + $0xd0] sm:$0xff]  }
 0x290   : > { %v4080_v29 = vrot.slane %v4063_v42, %v4079_v3 }
 0x291   : > { %v3243_v52 = vrot.slane %v3242_v33, 1 }
 0x293   : > { %v3244_v10 = vadd.f32 %v3243_v52, %v3242_v33  ;;  %v5602_v33 = vld [vmem:[%s7708_s5 + $0xd8] sm:$0xff]  }
 0x295   : > { %v4019_v35 = vsel %vm4018_vm4, %v3244_v10, %v4017_v16  ;;  %v5593_v16 = vld [vmem:[%s7708_s5 + $0x30] sm:$0xff]   ;;  %v5603_v10 = vld [vmem:[%s7708_s5 + $0x98] sm:$0xff]  }
 0x296   : > { %v4021_v63 = vsel %vm4020_vm5, %v3313_v19, %v4019_v35 }
 0x297   : > { %v4023_v61 = vsel %vm4022_vm6, %v3382_v1, %v4021_v63  ;;  %v5604_v1 = vld [vmem:[%s7708_s5 + $0xe0] sm:$0xff]  }
 0x298   : > { %v4025_v31 = vsel %vm4024_vm7, %v3451_v34, %v4023_v61  ;;  %v5605_v63 = vld [vmem:[%s7708_s5 + $0xa0] sm:$0xff]   ;;  %v4075_v61 = vsub.s32 2, %v4066_v22 }
 0x301   : > { %v4043_v57 = vpop.permute.xlu0 %4042 }
 0x302   : > { %v4045_v60 = vsel %vm1202_vm0, %v4025_v31, %v4043_v57  ;;  %v5606_v31 = vld [vmem:[%s7708_s5 + $0xe8] sm:$0xff]  }
 0x303   : > { %v4046_v46 = vpack.c.bf16 %v4045_v60, %v4045_v60  ;;  %v5607_v57 = vld [vmem:[%s7708_s5 + $0xa8] sm:$0xff]   ;;  %v4076_v60 = vrot.slane %v4063_v42, %v4075_v61 }
 0x305   : > { %4940 = vmatmul.mubr.msk.bf16.vlgmr.msra.gmra.mrb[104].mxu1 %vm4165_vm8, %v4046_v46 }
 0x306   : > { %4211 = vmatpush1.bf16.msra.mxu1 %v5568_v7  ;;  %4242 = vmatprep.mubr.bf16.mxu1 %v5623_v24  ;;  %v5588_v24 = vld [vmem:[%s7708_s5 + $0x60] sm:$0xff]   ;;  %v5608_v7 = vld [vmem:[%s7708_s5 + $0xf0] sm:$0xff]  }
 0x307   : > { %4212 = vmatprep.subr.bf16.mxu1 %v5573_v27 }
 0x30a   : > { %4213 = vmatpush1.bf16.msra.mxu1 %v5571_v48  ;;  %v5610_v48 = vld [vmem:[%s7708_s5 + $0xf8] sm:$0xff]  }
 0x30b   : > { %4214 = vmatprep.subr.bf16.mxu1 %v5576_v62  ;;  %v5611_v62 = vld [vmem:[%s7708_s5 + $0xb8] sm:$0xff]  }
 0x30e   : > { %4215 = vmatpush1.bf16.msra.mxu1 %v5574_v54 }
 0x30f   : > { %4216 = vmatprep.subr.bf16.mxu1 %v5579_v4 }
 0x312   : > { %4217 = vmatpush1.bf16.msra.mxu1 %v5577_v5 }
 0x313   : > { %5108 = vmatprep.subr.bf16.mxu1 %v5580_v14 }
 0x315   : > { %4941 = vmatmul.mubr.msk.bf16.vlgmr.msra.gmra.mrb[108].mxu1 %vm4165_vm8, %v4046_v46  ;;  %v5609_v46 = vld [vmem:[%s7708_s5 + $0xb0] sm:$0xff]  }
 0x316   : > { %5109 = vmatpush3.bf16.msra.mxu1 %v5581_v17 }
 0x317   : > { %5110 = vmatprep.subr.bf16.mxu1 %v5582_v51 }
 0x31a   : > { %5111 = vmatpush3.bf16.msra.mxu1 %v5583_v11 }
 0x31b   : > { %5112 = vmatprep.subr.bf16.mxu1 %v5584_v30  ;;  %v4942_v30 = vld [vmem:[%s7709_s6] ss:$0 sm:$0xff] }
 0x31e   : > { %5113 = vmatpush3.bf16.msra.mxu1 %v5585_v49 }
 0x31f   : > { %5114 = vmatprep.subr.bf16.mxu1 %v5586_v45 }
 0x322   : > { %5115 = vmatpush3.bf16.msra.mxu1 %v5587_v28 }
 0x323   : > { %5116 = vmatprep.subr.bf16.mxu1 %v5588_v24 }
 0x326   : > { %5117 = vmatpush3.bf16.msra.mxu1 %v5589_v56 }
 0x327   : > { %5118 = vmatprep.subr.bf16.mxu1 %v5590_v18 }
 0x32a   : > { %5119 = vmatpush3.bf16.msra.mxu1 %v5591_v25 }
 0x32b   : > { %5120 = vmatprep.subr.bf16.mxu1 %v5592_v26 }
 0x32e   : > { %5121 = vmatpush3.bf16.msra.mxu1 %v5593_v16 }
 0x32f   : > { %5122 = vmatprep.subr.bf16.mxu1 %v5594_v32 }
 0x332   : > { %5123 = vmatpush3.bf16.msra.mxu1 %v5595_v41 }
 0x333   : > { %5130 = vmatprep.subr.bf16.mxu1 %v5596_v59 }
 0x3d8   : > { %v4203_v38 = vpop.f32.mrb[104].mxu1 }
 0x3d9   : > { %v4204_v21 = vadd.f32 %v4203_v38, %v4068_v55  ;;  %v4205_v6 = vpop.f32.mrb[105].mxu1 }
 0x3da   : > { %v4206_v23 = vadd.f32 %v4205_v6, %v4072_v8  ;;  %v4207_v13 = vpop.f32.mrb[106].mxu1 }
 0x3db   : > { %v4251_v58 = vmax.f32 %v4204_v21, 0.0  ;;  %v4208_v0 = vpop.f32.mrb[107].mxu1 }
 0x3dc   : > { %v4252_v37 = vmax.f32 %v4206_v23, 0.0 }
 0x3dd   : > { %v4255_v36 = vpack.c.bf16 %v4251_v58, %v4251_v58 }
 0x3de   : > { %v4256_v43 = vpack.c.bf16 %v4252_v37, %v4252_v37 }
 0x3e0   : > { %4554 = vmatprep.mubr.bf16.mxu1 %v4256_v43 }
 0x3e1   : > { %4555 = vmatmul.mubr.bf16.vlgmr.msra.gmra.mrb[112].mxu1 %v4255_v36 }
 0x3e2   : > { %5131 = vmatpush3.bf16.msra.mxu1 %v5597_v53 }
 0x3e3   : > { %5132 = vmatprep.subr.bf16.mxu1 %v5598_v9 }
 0x3e6   : > { %5133 = vmatpush3.bf16.msra.mxu1 %v5599_v20 }
 0x3e7   : > { %5134 = vmatprep.subr.bf16.mxu1 %v5600_v47 }
 0x3e8   : > { %v4244_v50 = vpop.f32.mrb[108].mxu1 }
 0x3e9   : > { %v4246_v52 = vpop.f32.mrb[109].mxu1  ;;  %v4245_v27 = vadd.f32 %v4244_v50, %v4076_v60 }
 0x3ea   : > { %v4247_v12 = vadd.f32 %v4246_v52, %v4080_v29  ;;  %v4248_v2 = vpop.f32.mrb[110].mxu1  ;;  %5135 = vmatpush3.bf16.msra.mxu1 %v5601_v44 }
 0x3eb   : > { %v4249_v19 = vpop.f32.mrb[111].mxu1  ;;  %5136 = vmatprep.subr.bf16.mxu1 %v5602_v33  ;;  %v4253_v54 = vmax.f32 %v4245_v27, 0.0 }
 0x3ec   : > { %v4254_v35 = vmax.f32 %v4247_v12, 0.0 }
 0x3ed   : > { %v4257_v4 = vpack.c.bf16 %v4253_v54, %v4253_v54 }
 0x3ee   : > { %v4258_v34 = vpack.c.bf16 %v4254_v35, %v4254_v35  ;;  %5137 = vmatpush3.bf16.msra.mxu1 %v5603_v10 }
 0x3ef   : > { %5138 = vmatprep.subr.bf16.mxu1 %v5604_v1 }
 0x3f0   : > { %4594 = vmatprep.mubr.bf16.mxu1 %v4258_v34 }
 0x3f2   : > { %5139 = vmatpush3.bf16.msra.mxu1 %v5605_v63 }
 0x3f3   : > { %5140 = vmatprep.subr.bf16.mxu1 %v5606_v31 }
 0x3f6   : > { %5141 = vmatpush3.bf16.msra.mxu1 %v5607_v57 }
 0x3f7   : > { %5142 = vmatprep.subr.bf16.mxu1 %v5608_v7 }
 0x3fa   : > { %5143 = vmatpush3.bf16.msra.mxu1 %v5609_v46 }
 0x3fb   : > { %5144 = vmatprep.subr.bf16.mxu1 %v5610_v48 }
 0x3fe   : > { %5145 = vmatpush3.bf16.msra.mxu1 %v5611_v62 }
 0x401   : > { %4595 = vmatmul.mubr.bf16.vlgmr.msra.gmra.mrb[116].mxu1 %v4257_v4 }
 0x4b4   : > { %v5124_v5 = vpop.f32.mrb[112].mxu1 }
 0x4b5   : > { %v5125_v14 = vpop.f32.mrb[113].mxu1 }
 0x4b6   : > { %v5126_v17 = vadd.f32 %v5125_v14, %v5124_v5  ;;  %v5127_v51 = vpop.f32.mrb[114].mxu1 }
 0x4b7   : > { %v5128_v11 = vpop.f32.mrb[115].mxu1 }
 0x4b8   : > { %v4557_v28 = vadd.f32 %v5126_v17, %v4942_v30 }
 0x4d4   : > { %v5146_v49 = vpop.f32.mrb[116].mxu1 }
 0x4d5   : > { %v5147_v45 = vpop.f32.mrb[117].mxu1 }
 0x4d6   : > { %v5148_v24 = vadd.f32 %v5147_v45, %v5146_v49  ;;  %v5149_v56 = vpop.f32.mrb[118].mxu1 }
 0x4d7   : > { %v5150_v18 = vpop.f32.mrb[119].mxu1 }
 0x4d8   : > { %v4597_v25 = vadd.f32 %v5148_v24, %v4557_v28 }
 0x4da   : > { %4602 = vst [vmem:[%s281_s19] sm:$0xff] %v4597_v25 }
 0x4db PF: > { %s17_s24 = sadd.s32 1, %s5621_s24  }
 0x4dc   : > { %p14_p5 = scmp.ge.s32.totalorder %s17_s24, 4  }
 0x4de   :  { %16 = sbr.rel (!%p14_p5) target bundleno = 1 (0x1), region = 78 }

</bundles_post_ra>
